<compile_context>
chip_gen: v6e
topology: v6e:2x2x1
jax: 0.10.0
libtpu: 0.0.40
codegen_flags: <defaults>
</compile_context>

<pallas_src>
import math

import jax
import jax.numpy as jnp
import numpy as np
from jax.experimental import pallas as pl
from jax.experimental.pallas import tpu as pltpu

# ----- synthetic GPT-2 config (small, but 128-lane aligned per review) -----
HIDDEN = 128
NUM_HEADS = 2
HEAD_DIM = HIDDEN // NUM_HEADS      # 64
INNER = 4 * HIDDEN                  # config.n_inner is None -> 4 * hidden_size
MLP_CHUNK = 256                     # K-chunk of INNER for the down-projection
SEQ = 128
BATCH = 2
EPS = 1e-5                          # layer_norm_epsilon
SCALE_ATTN_WEIGHTS = True
SCALE_BY_INV_LAYER_IDX = False
LAYER_IDX = 0
# resid/attn dropout is identity at inference time (nn.Dropout in eval mode).


def _layer_norm(x, g, b, eps):
    mu = jnp.mean(x, axis=-1, keepdims=True)
    var = jnp.mean(jnp.square(x - mu), axis=-1, keepdims=True)
    return (x - mu) * jax.lax.rsqrt(var + eps) * g + b


def _gelu_new(x):
    # GPT-2 default activation_function == "gelu_new"
    c = math.sqrt(2.0 / math.pi)
    return 0.5 * x * (1.0 + jnp.tanh(c * (x + 0.044715 * x * x * x)))


def _attn_scale():
    scale = 1.0
    if SCALE_ATTN_WEIGHTS:
        scale /= math.sqrt(HEAD_DIM)
    if SCALE_BY_INV_LAYER_IDX:
        scale /= float(LAYER_IDX + 1)
    return scale


def gpt2_block(x, params):
    """Full GPT-2 block; Conv1D semantics (x @ W + b, W is [in, out]).

    x: (B, S, H). Returns (hidden_out (B,S,H), k_cache (B,NH,S,D), v_cache).
    """
    B, S, H = x.shape
    NH, D = NUM_HEADS, HEAD_DIM
    assert H == NH * D and H % 128 == 0 and S % 8 == 0
    assert INNER % MLP_CHUNK == 0 and MLP_CHUNK % 128 == 0
    (g1, b1, wqkv, bqkv, wo, bo, g2, b2, wfc, bfc, wpr, bpr) = params

    scale = _attn_scale()
    mask_value = float(jnp.finfo(jnp.float32).min)

    def kernel(x_ref, g1_ref, b1_ref, wqkv_ref, bqkv_ref, wo_ref, bo_ref,
               g2_ref, b2_ref, wfc_ref, bfc_ref, wpr_ref, bpr_ref,
               o_ref, k_ref, v_ref):
        xf = x_ref[...].astype(jnp.float32)                       # (S, H) residual #1

        # ---- ln_1 ----
        h = _layer_norm(xf, g1_ref[...], b1_ref[...], EPS)

        # ---- c_attn (Conv1D): single fused N=3H MXU matmul, vreg-aligned slices
        qkv = jnp.dot(h, wqkv_ref[...],
                      preferred_element_type=jnp.float32) + bqkv_ref[...]
        q = qkv[:, :H] * scale            # fold attention scale into q (S*H elems)
        k = qkv[:, H:2 * H]
        v = qkv[:, 2 * H:]

        # Lane-dense (S, H) KV-cache outputs; split-heads is wrapper plumbing.
        k_ref[...] = k.astype(k_ref.dtype)
        v_ref[...] = v.astype(v_ref.dtype)

        # ---- causal self-attention: per-(batch, head) tiles (S=128, D=64) ----
        row = jax.lax.broadcasted_iota(jnp.int32, (S, S), 0)
        col = jax.lax.broadcasted_iota(jnp.int32, (S, S), 1)
        causal = col <= row

        ctx = []
        for hd in range(NH):              # NH=2, unrolled; slices are 64-lane aligned
            lo, hi = hd * D, (hd + 1) * D
            qh, kh, vh = q[:, lo:hi], k[:, lo:hi], v[:, lo:hi]
            s = jnp.einsum("qd,kd->qk", qh, kh,
                           preferred_element_type=jnp.float32)    # (S, S) lane-dense
            s = jnp.where(causal, s, mask_value)
            s = s - jnp.max(s, axis=-1, keepdims=True)
            p = jnp.exp(s)
            p = p * pl.reciprocal(jnp.sum(p, axis=-1, keepdims=True), approx=True)
            ctx.append(jnp.dot(p, vh, preferred_element_type=jnp.float32))
        attn = jnp.concatenate(ctx, axis=-1)                      # (S, H) merge heads

        # ---- attn c_proj (Conv1D) + residual #1 ----
        attn = jnp.dot(attn, wo_ref[...],
                       preferred_element_type=jnp.float32) + bo_ref[...]
        h2 = attn + xf

        # ---- ln_2 + MLP (c_fc -> gelu_new -> c_proj), K-chunked over INNER so
        #      the (S, INNER) gelu intermediate never materializes in full ----
        hn = _layer_norm(h2, g2_ref[...], b2_ref[...], EPS)
        m = jnp.zeros((S, H), jnp.float32)
        for c0 in range(0, INNER, MLP_CHUNK):
            c1 = c0 + MLP_CHUNK
            f = jnp.dot(hn, wfc_ref[:, c0:c1],
                        preferred_element_type=jnp.float32) + bfc_ref[:, c0:c1]
            f = _gelu_new(f)
            m = m + jnp.dot(f, wpr_ref[c0:c1, :],
                            preferred_element_type=jnp.float32)
        m = m + bpr_ref[...]

        o_ref[...] = (h2 + m).astype(o_ref.dtype)                 # residual #2

    # One grid step per batch element (full sequence of rows per step).
    row_spec = pl.BlockSpec((None, S, H), lambda b: (b, 0, 0))

    def resident(arr):
        # Full block + constant block index -> weight loaded once, VMEM-resident
        # across all grid steps (no per-step re-DMA).
        return pl.BlockSpec(arr.shape, lambda b: (0, 0))

    grid_spec = pltpu.PrefetchScalarGridSpec(
        num_scalar_prefetch=0,
        grid=(B,),
        in_specs=[
            row_spec,                                   # x rows
            resident(g1), resident(b1),
            resident(wqkv), resident(bqkv),
            resident(wo), resident(bo),
            resident(g2), resident(b2),
            resident(wfc), resident(bfc),
            resident(wpr), resident(bpr),
        ],
        out_specs=[row_spec, row_spec, row_spec],
    )

    out_shape = (
        jax.ShapeDtypeStruct((B, S, H), x.dtype),       # hidden_states out
        jax.ShapeDtypeStruct((B, S, H), x.dtype),       # K (lane-dense)
        jax.ShapeDtypeStruct((B, S, H), x.dtype),       # V (lane-dense)
    )

    o, kc, vc = pl.pallas_call(
        kernel,
        out_shape=out_shape,
        grid_spec=grid_spec,
        compiler_params=pltpu.CompilerParams(
            dimension_semantics=("parallel",)),         # 2-TC sharding on v7x
    )(x, g1, b1, wqkv, bqkv, wo, bo, g2, b2, wfc, bfc, wpr, bpr)

    # Wrapper-side split-heads (free layout plumbing, outside the kernel).
    def split_heads(t):
        return t.reshape(B, S, NH, D).transpose(0, 2, 1, 3)

    return o, split_heads(kc), split_heads(vc)


# ---------------- pure-JAX reference (for sanity check) ----------------
def reference_block(x, params):
    (g1, b1, wqkv, bqkv, wo, bo, g2, b2, wfc, bfc, wpr, bpr) = params
    xf = x.astype(jnp.float32)
    h = _layer_norm(xf, g1, b1, EPS)
    qkv = h @ wqkv + bqkv
    q, k, v = jnp.split(qkv, 3, axis=-1)

    def split_heads(t):
        B, S, _ = t.shape
        return t.reshape(B, S, NUM_HEADS, HEAD_DIM).transpose(0, 2, 1, 3)

    qh, kh, vh = split_heads(q), split_heads(k), split_heads(v)
    scores = jnp.einsum("bhqd,bhkd->bhqk", qh, kh) * _attn_scale()
    S = x.shape[1]
    causal = jnp.tril(jnp.ones((S, S), bool))
    scores = jnp.where(causal[None, None], scores, jnp.finfo(jnp.float32).min)
    p = jax.nn.softmax(scores, axis=-1)
    ao = jnp.einsum("bhqk,bhkd->bhqd", p, vh)
    ao = ao.transpose(0, 2, 1, 3).reshape(x.shape)
    ao = ao @ wo + bo
    h2 = ao + xf
    hn = _layer_norm(h2, g2, b2, EPS)
    f = _gelu_new(hn @ wfc + bfc)
    m = f @ wpr + bpr
    return h2 + m, kh, vh


if __name__ == "__main__":
    key = jax.random.PRNGKey(0)
    ks = jax.random.split(key, 12)

    x = jax.random.normal(ks[0], (BATCH, SEQ, HIDDEN), jnp.float32)

    # Conv1D: weight normal(std=0.02) [in, out]; biases perturbed from zero and
    # LN params perturbed from (1, 0) so the bias/affine paths are exercised.
    g1 = 1.0 + 0.1 * jax.random.normal(ks[1], (1, HIDDEN), jnp.float32)
    b1 = 0.1 * jax.random.normal(ks[2], (1, HIDDEN), jnp.float32)
    wqkv = 0.02 * jax.random.normal(ks[3], (HIDDEN, 3 * HIDDEN), jnp.float32)
    bqkv = 0.02 * jax.random.normal(ks[4], (1, 3 * HIDDEN), jnp.float32)
    wo = 0.02 * jax.random.normal(ks[5], (HIDDEN, HIDDEN), jnp.float32)
    bo = 0.02 * jax.random.normal(ks[6], (1, HIDDEN), jnp.float32)
    g2 = 1.0 + 0.1 * jax.random.normal(ks[7], (1, HIDDEN), jnp.float32)
    b2 = 0.1 * jax.random.normal(ks[8], (1, HIDDEN), jnp.float32)
    wfc = 0.02 * jax.random.normal(ks[9], (HIDDEN, INNER), jnp.float32)
    bfc = 0.02 * jax.random.normal(ks[10], (1, INNER), jnp.float32)
    wpr = 0.02 * jax.random.normal(ks[11], (INNER, HIDDEN), jnp.float32)
    bpr = jnp.zeros((1, HIDDEN), jnp.float32)

    params = (g1, b1, wqkv, bqkv, wo, bo, g2, b2, wfc, bfc, wpr, bpr)

    out, k_cache, v_cache = gpt2_block(x, params)
    jax.block_until_ready((out, k_cache, v_cache))

    ref_out, ref_k, ref_v = reference_block(x, params)
    # Output tolerance accounts for the approximate (EUP) softmax reciprocal;
    # K/V are plain f32 matmul outputs.
    assert np.allclose(np.asarray(out), np.asarray(ref_out), atol=2e-3, rtol=2e-3)
    assert np.allclose(np.asarray(k_cache), np.asarray(ref_k), atol=1e-3, rtol=1e-3)
    assert np.allclose(np.asarray(v_cache), np.asarray(ref_v), atol=1e-3, rtol=1e-3)

    print("KERNEL_OK")
</pallas_src>

<mosaic_0001>
module attributes {stable_mosaic.version = 11 : i64} {
  func.func @kernel(%arg0: i32, %arg1: memref<1x128x128xf32, #tpu.memory_space<vmem>>, %arg2: memref<1x128xf32, #tpu.memory_space<vmem>>, %arg3: memref<1x128xf32, #tpu.memory_space<vmem>>, %arg4: memref<128x384xf32, #tpu.memory_space<vmem>>, %arg5: memref<1x384xf32, #tpu.memory_space<vmem>>, %arg6: memref<128x128xf32, #tpu.memory_space<vmem>>, %arg7: memref<1x128xf32, #tpu.memory_space<vmem>>, %arg8: memref<1x128xf32, #tpu.memory_space<vmem>>, %arg9: memref<1x128xf32, #tpu.memory_space<vmem>>, %arg10: memref<128x512xf32, #tpu.memory_space<vmem>>, %arg11: memref<1x512xf32, #tpu.memory_space<vmem>>, %arg12: memref<512x128xf32, #tpu.memory_space<vmem>>, %arg13: memref<1x128xf32, #tpu.memory_space<vmem>>, %arg14: memref<1x128x128xf32, #tpu.memory_space<vmem>>, %arg15: memref<1x128x128xf32, #tpu.memory_space<vmem>>, %arg16: memref<1x128x128xf32, #tpu.memory_space<vmem>>) attributes {dimension_semantics = [#tpu.dimension_semantics<parallel>], iteration_bounds = array<i64: 2>, scalar_prefetch = 0 : i64, scratch_operands = 0 : i64, tpu.core_type = #tpu.core_type<tc>, window_params = [{transform_indices = @transform_0, window_bounds = array<i64: 1, 128, 128>}, {pipeline_mode = #tpu.pipeline_mode<synchronous>, transform_indices = @transform_1, window_bounds = array<i64: 1, 128>}, {pipeline_mode = #tpu.pipeline_mode<synchronous>, transform_indices = @transform_2, window_bounds = array<i64: 1, 128>}, {pipeline_mode = #tpu.pipeline_mode<synchronous>, transform_indices = @transform_3, window_bounds = array<i64: 128, 384>}, {pipeline_mode = #tpu.pipeline_mode<synchronous>, transform_indices = @transform_4, window_bounds = array<i64: 1, 384>}, {pipeline_mode = #tpu.pipeline_mode<synchronous>, transform_indices = @transform_5, window_bounds = array<i64: 128, 128>}, {pipeline_mode = #tpu.pipeline_mode<synchronous>, transform_indices = @transform_6, window_bounds = array<i64: 1, 128>}, {pipeline_mode = #tpu.pipeline_mode<synchronous>, transform_indices = @transform_7, window_bounds = array<i64: 1, 128>}, {pipeline_mode = #tpu.pipeline_mode<synchronous>, transform_indices = @transform_8, window_bounds = array<i64: 1, 128>}, {pipeline_mode = #tpu.pipeline_mode<synchronous>, transform_indices = @transform_9, window_bounds = array<i64: 128, 512>}, {pipeline_mode = #tpu.pipeline_mode<synchronous>, transform_indices = @transform_10, window_bounds = array<i64: 1, 512>}, {pipeline_mode = #tpu.pipeline_mode<synchronous>, transform_indices = @transform_11, window_bounds = array<i64: 512, 128>}, {pipeline_mode = #tpu.pipeline_mode<synchronous>, transform_indices = @transform_12, window_bounds = array<i64: 1, 128>}, {transform_indices = @transform_13, window_bounds = array<i64: 1, 128, 128>}, {transform_indices = @transform_14, window_bounds = array<i64: 1, 128, 128>}, {transform_indices = @transform_15, window_bounds = array<i64: 1, 128, 128>}]} {
    %c0 = arith.constant 0 : index
    %c0_0 = arith.constant 0 : index
    %c0_1 = arith.constant 0 : index
    %0 = vector.load %arg1[%c0, %c0_0, %c0_1] : memref<1x128x128xf32, #tpu.memory_space<vmem>>, vector<1x128x128xf32>
    %1 = vector.shape_cast %0 : vector<1x128x128xf32> to vector<128x128xf32>
    %c0_2 = arith.constant 0 : index
    %c0_3 = arith.constant 0 : index
    %2 = vector.load %arg2[%c0_2, %c0_3] : memref<1x128xf32, #tpu.memory_space<vmem>>, vector<1x128xf32>
    %c0_4 = arith.constant 0 : index
    %c0_5 = arith.constant 0 : index
    %3 = vector.load %arg3[%c0_4, %c0_5] : memref<1x128xf32, #tpu.memory_space<vmem>>, vector<1x128xf32>
    %cst = arith.constant dense<0.000000e+00> : vector<128xf32>
    %4 = vector.multi_reduction <add>, %1, %cst [1] : vector<128x128xf32> to vector<128xf32>
    %5 = vector.shape_cast %4 : vector<128xf32> to vector<128x1xf32>
    %cst_6 = arith.constant 1.280000e+02 : f32
    %6 = vector.broadcast %cst_6 : f32 to vector<128x1xf32>
    %7 = arith.divf %5, %6 : vector<128x1xf32>
    %8 = vector.broadcast %7 : vector<128x1xf32> to vector<128x128xf32>
    %9 = arith.subf %1, %8 : vector<128x128xf32>
    %10 = arith.mulf %9, %9 : vector<128x128xf32>
    %cst_7 = arith.constant dense<0.000000e+00> : vector<128xf32>
    %11 = vector.multi_reduction <add>, %10, %cst_7 [1] : vector<128x128xf32> to vector<128xf32>
    %12 = vector.shape_cast %11 : vector<128xf32> to vector<128x1xf32>
    %cst_8 = arith.constant 1.280000e+02 : f32
    %13 = vector.broadcast %cst_8 : f32 to vector<128x1xf32>
    %14 = arith.divf %12, %13 : vector<128x1xf32>
    %15 = vector.broadcast %7 : vector<128x1xf32> to vector<128x128xf32>
    %16 = arith.subf %1, %15 : vector<128x128xf32>
    %cst_9 = arith.constant 9.99999974E-6 : f32
    %17 = vector.broadcast %cst_9 : f32 to vector<128x1xf32>
    %18 = arith.addf %14, %17 : vector<128x1xf32>
    %19 = math.rsqrt %18 : vector<128x1xf32>
    %20 = vector.broadcast %19 : vector<128x1xf32> to vector<128x128xf32>
    %21 = arith.mulf %16, %20 : vector<128x128xf32>
    %22 = vector.broadcast %2 : vector<1x128xf32> to vector<128x128xf32>
    %23 = arith.mulf %21, %22 : vector<128x128xf32>
    %24 = vector.broadcast %3 : vector<1x128xf32> to vector<128x128xf32>
    %25 = arith.addf %23, %24 : vector<128x128xf32>
    %c0_10 = arith.constant 0 : index
    %c0_11 = arith.constant 0 : index
    %26 = vector.load %arg4[%c0_10, %c0_11] : memref<128x384xf32, #tpu.memory_space<vmem>>, vector<128x384xf32>
    %cst_12 = arith.constant dense<0.000000e+00> : vector<128x384xf32>
    %27 = tpu.matmul %25, %26, %cst_12 {dimension_numbers = #tpu.dot_dimension_numbers<[1], [0], [0], [1], [0, 0, 1, 1], [], []>} : vector<128x128xf32>, vector<128x384xf32>, vector<128x384xf32> -> vector<128x384xf32>
    %c0_13 = arith.constant 0 : index
    %c0_14 = arith.constant 0 : index
    %28 = vector.load %arg5[%c0_13, %c0_14] : memref<1x384xf32, #tpu.memory_space<vmem>>, vector<1x384xf32>
    %29 = vector.broadcast %28 : vector<1x384xf32> to vector<128x384xf32>
    %30 = arith.addf %27, %29 : vector<128x384xf32>
    %31 = vector.extract_strided_slice %30 {offsets = [0, 0], sizes = [128, 128], strides = [1, 1]} : vector<128x384xf32> to vector<128x128xf32>
    %cst_15 = arith.constant 1.250000e-01 : f32
    %32 = vector.broadcast %cst_15 : f32 to vector<128x128xf32>
    %33 = arith.mulf %31, %32 : vector<128x128xf32>
    %34 = vector.extract_strided_slice %30 {offsets = [0, 128], sizes = [128, 128], strides = [1, 1]} : vector<128x384xf32> to vector<128x128xf32>
    %35 = vector.extract_strided_slice %30 {offsets = [0, 256], sizes = [128, 128], strides = [1, 1]} : vector<128x384xf32> to vector<128x128xf32>
    %c0_16 = arith.constant 0 : index
    %c0_17 = arith.constant 0 : index
    %c0_18 = arith.constant 0 : index
    %36 = vector.load %arg15[%c0_16, %c0_17, %c0_18] : memref<1x128x128xf32, #tpu.memory_space<vmem>>, vector<1x128x128xf32>
    %37 = vector.shape_cast %36 : vector<1x128x128xf32> to vector<128x128xf32>
    %38 = vector.shape_cast %34 : vector<128x128xf32> to vector<1x128x128xf32>
    tpu.vector_store %arg15[%c0_16, %c0_17, %c0_18], %38 {strides = array<i32>} : memref<1x128x128xf32, #tpu.memory_space<vmem>>, vector<1x128x128xf32>,
    %c0_19 = arith.constant 0 : index
    %c0_20 = arith.constant 0 : index
    %c0_21 = arith.constant 0 : index
    %39 = vector.load %arg16[%c0_19, %c0_20, %c0_21] : memref<1x128x128xf32, #tpu.memory_space<vmem>>, vector<1x128x128xf32>
    %40 = vector.shape_cast %39 : vector<1x128x128xf32> to vector<128x128xf32>
    %41 = vector.shape_cast %35 : vector<128x128xf32> to vector<1x128x128xf32>
    tpu.vector_store %arg16[%c0_19, %c0_20, %c0_21], %41 {strides = array<i32>} : memref<1x128x128xf32, #tpu.memory_space<vmem>>, vector<1x128x128xf32>,
    %42 = tpu.iota {dimensions = array<i32: 0>} : vector<128x128xi32>
    %43 = tpu.iota {dimensions = array<i32: 1>} : vector<128x128xi32>
    %44 = arith.cmpi sle, %43, %42 : vector<128x128xi32>
    %45 = vector.extract_strided_slice %33 {offsets = [0, 0], sizes = [128, 64], strides = [1, 1]} : vector<128x128xf32> to vector<128x64xf32>
    %46 = vector.extract_strided_slice %34 {offsets = [0, 0], sizes = [128, 64], strides = [1, 1]} : vector<128x128xf32> to vector<128x64xf32>
    %47 = vector.extract_strided_slice %35 {offsets = [0, 0], sizes = [128, 64], strides = [1, 1]} : vector<128x128xf32> to vector<128x64xf32>
    "tpu.trace_start"() <{level = 10 : i32, message = "qd,kd->qk"}> : () -> ()
    %cst_22 = arith.constant dense<0.000000e+00> : vector<128x128xf32>
    %48 = tpu.matmul %45, %46, %cst_22 {dimension_numbers = #tpu.dot_dimension_numbers<[1], [1], [0], [0], [0, 0, 1, 0], [], []>} : vector<128x64xf32>, vector<128x64xf32>, vector<128x128xf32> -> vector<128x128xf32>
    %cst_23 = arith.constant -3.40282347E+38 : f32
    "tpu.trace_stop"() : () -> ()
    %49 = vector.broadcast %cst_23 : f32 to vector<128x128xf32>
    %50 = arith.select %44, %48, %49 : vector<128x128xi1>, vector<128x128xf32>
    %cst_24 = arith.constant dense<0xFF800000> : vector<128xf32>
    %51 = vector.multi_reduction <maximumf>, %50, %cst_24 [1] : vector<128x128xf32> to vector<128xf32>
    %52 = vector.shape_cast %51 : vector<128xf32> to vector<128x1xf32>
    %53 = vector.broadcast %52 : vector<128x1xf32> to vector<128x128xf32>
    %54 = arith.subf %50, %53 : vector<128x128xf32>
    %55 = math.exp %54 : vector<128x128xf32>
    %cst_25 = arith.constant dense<0.000000e+00> : vector<128xf32>
    %56 = vector.multi_reduction <add>, %55, %cst_25 [1] : vector<128x128xf32> to vector<128xf32>
    %57 = vector.shape_cast %56 : vector<128xf32> to vector<128x1xf32>
    %58 = tpu.reciprocal %57 {approx = true} : vector<128x1xf32> -> vector<128x1xf32>
    %59 = vector.broadcast %58 : vector<128x1xf32> to vector<128x128xf32>
    %60 = arith.mulf %55, %59 : vector<128x128xf32>
    %cst_26 = arith.constant dense<0.000000e+00> : vector<128x64xf32>
    %61 = tpu.matmul %60, %47, %cst_26 {dimension_numbers = #tpu.dot_dimension_numbers<[1], [0], [0], [1], [0, 0, 1, 1], [], []>} : vector<128x128xf32>, vector<128x64xf32>, vector<128x64xf32> -> vector<128x64xf32>
    %62 = vector.extract_strided_slice %33 {offsets = [0, 64], sizes = [128, 64], strides = [1, 1]} : vector<128x128xf32> to vector<128x64xf32>
    %63 = vector.extract_strided_slice %34 {offsets = [0, 64], sizes = [128, 64], strides = [1, 1]} : vector<128x128xf32> to vector<128x64xf32>
    %64 = vector.extract_strided_slice %35 {offsets = [0, 64], sizes = [128, 64], strides = [1, 1]} : vector<128x128xf32> to vector<128x64xf32>
    "tpu.trace_start"() <{level = 10 : i32, message = "qd,kd->qk"}> : () -> ()
    %cst_27 = arith.constant dense<0.000000e+00> : vector<128x128xf32>
    %65 = tpu.matmul %62, %63, %cst_27 {dimension_numbers = #tpu.dot_dimension_numbers<[1], [1], [0], [0], [0, 0, 1, 0], [], []>} : vector<128x64xf32>, vector<128x64xf32>, vector<128x128xf32> -> vector<128x128xf32>
    %cst_28 = arith.constant -3.40282347E+38 : f32
    "tpu.trace_stop"() : () -> ()
    %66 = vector.broadcast %cst_28 : f32 to vector<128x128xf32>
    %67 = arith.select %44, %65, %66 : vector<128x128xi1>, vector<128x128xf32>
    %cst_29 = arith.constant dense<0xFF800000> : vector<128xf32>
    %68 = vector.multi_reduction <maximumf>, %67, %cst_29 [1] : vector<128x128xf32> to vector<128xf32>
    %69 = vector.shape_cast %68 : vector<128xf32> to vector<128x1xf32>
    %70 = vector.broadcast %69 : vector<128x1xf32> to vector<128x128xf32>
    %71 = arith.subf %67, %70 : vector<128x128xf32>
    %72 = math.exp %71 : vector<128x128xf32>
    %cst_30 = arith.constant dense<0.000000e+00> : vector<128xf32>
    %73 = vector.multi_reduction <add>, %72, %cst_30 [1] : vector<128x128xf32> to vector<128xf32>
    %74 = vector.shape_cast %73 : vector<128xf32> to vector<128x1xf32>
    %75 = tpu.reciprocal %74 {approx = true} : vector<128x1xf32> -> vector<128x1xf32>
    %76 = vector.broadcast %75 : vector<128x1xf32> to vector<128x128xf32>
    %77 = arith.mulf %72, %76 : vector<128x128xf32>
    %cst_31 = arith.constant dense<0.000000e+00> : vector<128x64xf32>
    %78 = tpu.matmul %77, %64, %cst_31 {dimension_numbers = #tpu.dot_dimension_numbers<[1], [0], [0], [1], [0, 0, 1, 1], [], []>} : vector<128x128xf32>, vector<128x64xf32>, vector<128x64xf32> -> vector<128x64xf32>
    %79 = tpu.concatenate %61, %78 in 1 : vector<128x64xf32>, vector<128x64xf32> -> vector<128x128xf32>
    %c0_32 = arith.constant 0 : index
    %c0_33 = arith.constant 0 : index
    %80 = vector.load %arg6[%c0_32, %c0_33] : memref<128x128xf32, #tpu.memory_space<vmem>>, vector<128x128xf32>
    %cst_34 = arith.constant dense<0.000000e+00> : vector<128x128xf32>
    %81 = tpu.matmul %79, %80, %cst_34 {dimension_numbers = #tpu.dot_dimension_numbers<[1], [0], [0], [1], [0, 0, 1, 1], [], []>} : vector<128x128xf32>, vector<128x128xf32>, vector<128x128xf32> -> vector<128x128xf32>
    %c0_35 = arith.constant 0 : index
    %c0_36 = arith.constant 0 : index
    %82 = vector.load %arg7[%c0_35, %c0_36] : memref<1x128xf32, #tpu.memory_space<vmem>>, vector<1x128xf32>
    %83 = vector.broadcast %82 : vector<1x128xf32> to vector<128x128xf32>
    %84 = arith.addf %81, %83 : vector<128x128xf32>
    %85 = arith.addf %84, %1 : vector<128x128xf32>
    %c0_37 = arith.constant 0 : index
    %c0_38 = arith.constant 0 : index
    %86 = vector.load %arg8[%c0_37, %c0_38] : memref<1x128xf32, #tpu.memory_space<vmem>>, vector<1x128xf32>
    %c0_39 = arith.constant 0 : index
    %c0_40 = arith.constant 0 : index
    %87 = vector.load %arg9[%c0_39, %c0_40] : memref<1x128xf32, #tpu.memory_space<vmem>>, vector<1x128xf32>
    %cst_41 = arith.constant dense<0.000000e+00> : vector<128xf32>
    %88 = vector.multi_reduction <add>, %85, %cst_41 [1] : vector<128x128xf32> to vector<128xf32>
    %89 = vector.shape_cast %88 : vector<128xf32> to vector<128x1xf32>
    %cst_42 = arith.constant 1.280000e+02 : f32
    %90 = vector.broadcast %cst_42 : f32 to vector<128x1xf32>
    %91 = arith.divf %89, %90 : vector<128x1xf32>
    %92 = vector.broadcast %91 : vector<128x1xf32> to vector<128x128xf32>
    %93 = arith.subf %85, %92 : vector<128x128xf32>
    %94 = arith.mulf %93, %93 : vector<128x128xf32>
    %cst_43 = arith.constant dense<0.000000e+00> : vector<128xf32>
    %95 = vector.multi_reduction <add>, %94, %cst_43 [1] : vector<128x128xf32> to vector<128xf32>
    %96 = vector.shape_cast %95 : vector<128xf32> to vector<128x1xf32>
    %cst_44 = arith.constant 1.280000e+02 : f32
    %97 = vector.broadcast %cst_44 : f32 to vector<128x1xf32>
    %98 = arith.divf %96, %97 : vector<128x1xf32>
    %99 = vector.broadcast %91 : vector<128x1xf32> to vector<128x128xf32>
    %100 = arith.subf %85, %99 : vector<128x128xf32>
    %cst_45 = arith.constant 9.99999974E-6 : f32
    %101 = vector.broadcast %cst_45 : f32 to vector<128x1xf32>
    %102 = arith.addf %98, %101 : vector<128x1xf32>
    %103 = math.rsqrt %102 : vector<128x1xf32>
    %104 = vector.broadcast %103 : vector<128x1xf32> to vector<128x128xf32>
    %105 = arith.mulf %100, %104 : vector<128x128xf32>
    %106 = vector.broadcast %86 : vector<1x128xf32> to vector<128x128xf32>
    %107 = arith.mulf %105, %106 : vector<128x128xf32>
    %108 = vector.broadcast %87 : vector<1x128xf32> to vector<128x128xf32>
    %109 = arith.addf %107, %108 : vector<128x128xf32>
    %cst_46 = arith.constant 0.000000e+00 : f32
    %110 = vector.broadcast %cst_46 : f32 to vector<128x128xf32>
    %c0_47 = arith.constant 0 : index
    %c0_48 = arith.constant 0 : index
    %111 = vector.load %arg10[%c0_47, %c0_48] : memref<128x512xf32, #tpu.memory_space<vmem>>, vector<128x256xf32>
    %cst_49 = arith.constant dense<0.000000e+00> : vector<128x256xf32>
    %112 = tpu.matmul %109, %111, %cst_49 {dimension_numbers = #tpu.dot_dimension_numbers<[1], [0], [0], [1], [0, 0, 1, 1], [], []>} : vector<128x128xf32>, vector<128x256xf32>, vector<128x256xf32> -> vector<128x256xf32>
    %c0_50 = arith.constant 0 : index
    %c0_51 = arith.constant 0 : index
    %113 = vector.load %arg11[%c0_50, %c0_51] : memref<1x512xf32, #tpu.memory_space<vmem>>, vector<1x256xf32>
    %114 = vector.broadcast %113 : vector<1x256xf32> to vector<128x256xf32>
    %115 = arith.addf %112, %114 : vector<128x256xf32>
    %cst_52 = arith.constant 5.000000e-01 : f32
    %116 = vector.broadcast %cst_52 : f32 to vector<128x256xf32>
    %117 = arith.mulf %116, %115 : vector<128x256xf32>
    %cst_53 = arith.constant 4.471500e-02 : f32
    %118 = vector.broadcast %cst_53 : f32 to vector<128x256xf32>
    %119 = arith.mulf %118, %115 : vector<128x256xf32>
    %120 = arith.mulf %119, %115 : vector<128x256xf32>
    %121 = arith.mulf %120, %115 : vector<128x256xf32>
    %122 = arith.addf %115, %121 : vector<128x256xf32>
    %cst_54 = arith.constant 0.797884583 : f32
    %123 = vector.broadcast %cst_54 : f32 to vector<128x256xf32>
    %124 = arith.mulf %123, %122 : vector<128x256xf32>
    %125 = math.tanh %124 : vector<128x256xf32>
    %cst_55 = arith.constant 1.000000e+00 : f32
    %126 = vector.broadcast %cst_55 : f32 to vector<128x256xf32>
    %127 = arith.addf %126, %125 : vector<128x256xf32>
    %128 = arith.mulf %117, %127 : vector<128x256xf32>
    %c0_56 = arith.constant 0 : index
    %c0_57 = arith.constant 0 : index
    %129 = vector.load %arg12[%c0_56, %c0_57] : memref<512x128xf32, #tpu.memory_space<vmem>>, vector<256x128xf32>
    %cst_58 = arith.constant dense<0.000000e+00> : vector<128x128xf32>
    %130 = tpu.matmul %128, %129, %cst_58 {dimension_numbers = #tpu.dot_dimension_numbers<[1], [0], [0], [1], [0, 0, 1, 1], [], []>} : vector<128x256xf32>, vector<256x128xf32>, vector<128x128xf32> -> vector<128x128xf32>
    %131 = arith.addf %110, %130 : vector<128x128xf32>
    %c0_59 = arith.constant 0 : index
    %c256 = arith.constant 256 : index
    %132 = vector.load %arg10[%c0_59, %c256] : memref<128x512xf32, #tpu.memory_space<vmem>>, vector<128x256xf32>
    %cst_60 = arith.constant dense<0.000000e+00> : vector<128x256xf32>
    %133 = tpu.matmul %109, %132, %cst_60 {dimension_numbers = #tpu.dot_dimension_numbers<[1], [0], [0], [1], [0, 0, 1, 1], [], []>} : vector<128x128xf32>, vector<128x256xf32>, vector<128x256xf32> -> vector<128x256xf32>
    %c0_61 = arith.constant 0 : index
    %c256_62 = arith.constant 256 : index
    %134 = vector.load %arg11[%c0_61, %c256_62] : memref<1x512xf32, #tpu.memory_space<vmem>>, vector<1x256xf32>
    %135 = vector.broadcast %134 : vector<1x256xf32> to vector<128x256xf32>
    %136 = arith.addf %133, %135 : vector<128x256xf32>
    %cst_63 = arith.constant 5.000000e-01 : f32
    %137 = vector.broadcast %cst_63 : f32 to vector<128x256xf32>
    %138 = arith.mulf %137, %136 : vector<128x256xf32>
    %cst_64 = arith.constant 4.471500e-02 : f32
    %139 = vector.broadcast %cst_64 : f32 to vector<128x256xf32>
    %140 = arith.mulf %139, %136 : vector<128x256xf32>
    %141 = arith.mulf %140, %136 : vector<128x256xf32>
    %142 = arith.mulf %141, %136 : vector<128x256xf32>
    %143 = arith.addf %136, %142 : vector<128x256xf32>
    %cst_65 = arith.constant 0.797884583 : f32
    %144 = vector.broadcast %cst_65 : f32 to vector<128x256xf32>
    %145 = arith.mulf %144, %143 : vector<128x256xf32>
    %146 = math.tanh %145 : vector<128x256xf32>
    %cst_66 = arith.constant 1.000000e+00 : f32
    %147 = vector.broadcast %cst_66 : f32 to vector<128x256xf32>
    %148 = arith.addf %147, %146 : vector<128x256xf32>
    %149 = arith.mulf %138, %148 : vector<128x256xf32>
    %c256_67 = arith.constant 256 : index
    %c0_68 = arith.constant 0 : index
    %150 = vector.load %arg12[%c256_67, %c0_68] : memref<512x128xf32, #tpu.memory_space<vmem>>, vector<256x128xf32>
    %cst_69 = arith.constant dense<0.000000e+00> : vector<128x128xf32>
    %151 = tpu.matmul %149, %150, %cst_69 {dimension_numbers = #tpu.dot_dimension_numbers<[1], [0], [0], [1], [0, 0, 1, 1], [], []>} : vector<128x256xf32>, vector<256x128xf32>, vector<128x128xf32> -> vector<128x128xf32>
    %152 = arith.addf %131, %151 : vector<128x128xf32>
    %c0_70 = arith.constant 0 : index
    %c0_71 = arith.constant 0 : index
    %153 = vector.load %arg13[%c0_70, %c0_71] : memref<1x128xf32, #tpu.memory_space<vmem>>, vector<1x128xf32>
    %154 = vector.broadcast %153 : vector<1x128xf32> to vector<128x128xf32>
    %155 = arith.addf %152, %154 : vector<128x128xf32>
    %156 = arith.addf %85, %155 : vector<128x128xf32>
    %c0_72 = arith.constant 0 : index
    %c0_73 = arith.constant 0 : index
    %c0_74 = arith.constant 0 : index
    %157 = vector.load %arg14[%c0_72, %c0_73, %c0_74] : memref<1x128x128xf32, #tpu.memory_space<vmem>>, vector<1x128x128xf32>
    %158 = vector.shape_cast %157 : vector<1x128x128xf32> to vector<128x128xf32>
    %159 = vector.shape_cast %156 : vector<128x128xf32> to vector<1x128x128xf32>
    tpu.vector_store %arg14[%c0_72, %c0_73, %c0_74], %159 {strides = array<i32>} : memref<1x128x128xf32, #tpu.memory_space<vmem>>, vector<1x128x128xf32>,
    return
  }
  func.func @transform_0(%arg0: i32) -> (i32, i32, i32) {
    %c0_i32 = arith.constant 0 : i32
    %c0_i32_0 = arith.constant 0 : i32
    %c0_i32_1 = arith.constant 0 : i32
    return %arg0, %c0_i32, %c0_i32_0 : i32, i32, i32
  }
  func.func @transform_1(%arg0: i32) -> (i32, i32) {
    %c0_i32 = arith.constant 0 : i32
    %c0_i32_0 = arith.constant 0 : i32
    %c0_i32_1 = arith.constant 0 : i32
    return %c0_i32, %c0_i32_0 : i32, i32
  }
  func.func @transform_2(%arg0: i32) -> (i32, i32) {
    %c0_i32 = arith.constant 0 : i32
    %c0_i32_0 = arith.constant 0 : i32
    %c0_i32_1 = arith.constant 0 : i32
    return %c0_i32, %c0_i32_0 : i32, i32
  }
  func.func @transform_3(%arg0: i32) -> (i32, i32) {
    %c0_i32 = arith.constant 0 : i32
    %c0_i32_0 = arith.constant 0 : i32
    %c0_i32_1 = arith.constant 0 : i32
    return %c0_i32, %c0_i32_0 : i32, i32
  }
  func.func @transform_4(%arg0: i32) -> (i32, i32) {
    %c0_i32 = arith.constant 0 : i32
    %c0_i32_0 = arith.constant 0 : i32
    %c0_i32_1 = arith.constant 0 : i32
    return %c0_i32, %c0_i32_0 : i32, i32
  }
  func.func @transform_5(%arg0: i32) -> (i32, i32) {
    %c0_i32 = arith.constant 0 : i32
    %c0_i32_0 = arith.constant 0 : i32
    %c0_i32_1 = arith.constant 0 : i32
    return %c0_i32, %c0_i32_0 : i32, i32
  }
  func.func @transform_6(%arg0: i32) -> (i32, i32) {
    %c0_i32 = arith.constant 0 : i32
    %c0_i32_0 = arith.constant 0 : i32
    %c0_i32_1 = arith.constant 0 : i32
    return %c0_i32, %c0_i32_0 : i32, i32
  }
  func.func @transform_7(%arg0: i32) -> (i32, i32) {
    %c0_i32 = arith.constant 0 : i32
    %c0_i32_0 = arith.constant 0 : i32
    %c0_i32_1 = arith.constant 0 : i32
    return %c0_i32, %c0_i32_0 : i32, i32
  }
  func.func @transform_8(%arg0: i32) -> (i32, i32) {
    %c0_i32 = arith.constant 0 : i32
    %c0_i32_0 = arith.constant 0 : i32
    %c0_i32_1 = arith.constant 0 : i32
    return %c0_i32, %c0_i32_0 : i32, i32
  }
  func.func @transform_9(%arg0: i32) -> (i32, i32) {
    %c0_i32 = arith.constant 0 : i32
    %c0_i32_0 = arith.constant 0 : i32
    %c0_i32_1 = arith.constant 0 : i32
    return %c0_i32, %c0_i32_0 : i32, i32
  }
  func.func @transform_10(%arg0: i32) -> (i32, i32) {
    %c0_i32 = arith.constant 0 : i32
    %c0_i32_0 = arith.constant 0 : i32
    %c0_i32_1 = arith.constant 0 : i32
    return %c0_i32, %c0_i32_0 : i32, i32
  }
  func.func @transform_11(%arg0: i32) -> (i32, i32) {
    %c0_i32 = arith.constant 0 : i32
    %c0_i32_0 = arith.constant 0 : i32
    %c0_i32_1 = arith.constant 0 : i32
    return %c0_i32, %c0_i32_0 : i32, i32
  }
  func.func @transform_12(%arg0: i32) -> (i32, i32) {
    %c0_i32 = arith.constant 0 : i32
    %c0_i32_0 = arith.constant 0 : i32
    %c0_i32_1 = arith.constant 0 : i32
    return %c0_i32, %c0_i32_0 : i32, i32
  }
  func.func @transform_13(%arg0: i32) -> (i32, i32, i32) {
    %c0_i32 = arith.constant 0 : i32
    %c0_i32_0 = arith.constant 0 : i32
    %c0_i32_1 = arith.constant 0 : i32
    return %arg0, %c0_i32, %c0_i32_0 : i32, i32, i32
  }
  func.func @transform_14(%arg0: i32) -> (i32, i32, i32) {
    %c0_i32 = arith.constant 0 : i32
    %c0_i32_0 = arith.constant 0 : i32
    %c0_i32_1 = arith.constant 0 : i32
    return %arg0, %c0_i32, %c0_i32_0 : i32, i32, i32
  }
  func.func @transform_15(%arg0: i32) -> (i32, i32, i32) {
    %c0_i32 = arith.constant 0 : i32
    %c0_i32_0 = arith.constant 0 : i32
    %c0_i32_1 = arith.constant 0 : i32
    return %arg0, %c0_i32, %c0_i32_0 : i32, i32, i32
  }
}

</mosaic_0001>

<bundles_post_ra>
// kernel: tpu_custom_call.1
= control target key start
LH: loop header
LB: loop body
LE: loop exit
PB: predicated region body
PF: predicated region fallthrough
CT: control target
= control target key end

     0   :  { %s9191_s0 = inlined_call_operand.hbm [shape: f32[2,128,128], index: 0, kind: input, shape index: {}]   ;;  %s9192_s1 = inlined_call_operand.hbm [shape: f32[1,128], index: 1, kind: input, shape index: {}]   ;;  %s9193_s2 = inlined_call_operand.hbm [shape: f32[1,128], index: 2, kind: input, shape index: {}]   ;;  %s9194_s3 = inlined_call_operand.hbm [shape: f32[128,384], index: 3, kind: input, shape index: {}]   ;;  %s9195_s4 = inlined_call_operand.vmem [shape: f32[1,384], index: 4, kind: input, shape index: {}]   ;;  %s9196_s5 = inlined_call_operand.hbm [shape: f32[128,128], index: 5, kind: input, shape index: {}]   ;;  %s9197_s6 = inlined_call_operand.vmem [shape: f32[1,128], index: 6, kind: input, shape index: {}]   ;;  %s9198_s7 = inlined_call_operand.vmem [shape: f32[1,128], index: 7, kind: input, shape index: {}]   ;;  %s9199_s8 = inlined_call_operand.vmem [shape: f32[1,128], index: 8, kind: input, shape index: {}]   ;;  %s9200_s9 = inlined_call_operand.hbm [shape: f32[128,512], index: 9, kind: input, shape index: {}]   ;;  %s9201_s10 = inlined_call_operand.vmem [shape: f32[1,512], index: 10, kind: input, shape index: {}]   ;;  %s9202_s11 = inlined_call_operand.hbm [shape: f32[512,128], index: 11, kind: input, shape index: {}]   ;;  %s9203_s12 = inlined_call_operand.vmem [shape: f32[1,128], index: 12, kind: input, shape index: {}]   ;;  %s9204_s13 = inlined_call_operand.hbm [shape: f32[2,128,128], index: 13, kind: output, shape index: {0}]   ;;  %s9205_s14 = inlined_call_operand.hbm [shape: f32[2,128,128], index: 14, kind: output, shape index: {1}]   ;;  %s9206_s15 = inlined_call_operand.hbm [shape: f32[2,128,128], index: 15, kind: output, shape index: {2}]  }
   0x1   :  { %9326 = sst [smem:[#allocation85_spill]] %s9192_s1 }
   0x2   :  { %9327 = sst [smem:[#allocation86_spill]] %s9193_s2 }
   0x3   :  { %9328 = sst [smem:[#allocation87_spill]] %s9194_s3 }
   0x4   :  { %9329 = sst [smem:[#allocation88_spill]] %s9196_s5 }
   0x5   :  { %9330 = sst [smem:[#allocation89_spill]] %s9200_s9 }
   0x6   :  { %9331 = sst [smem:[#allocation90_spill]] %s9202_s11 }
   0x7   :  { %9332 = sst [smem:[#allocation91_spill]] %s9204_s13 }
   0x8   :  { %9333 = sst [smem:[#allocation92_spill]] %s9206_s15 }
   0x9   :  { %21 = vsyncpa [#allocation3], 0 }
   0xa   :  { %23 = vsyncpa [#allocation3 + $0x1], 0 }
   0xb   :  { %24 = vsyncpa [#allocation6], 0 }
   0xc   :  { %25 = vsyncpa [#allocation9], 0 }
   0xd   :  { %26 = vsyncpa [#allocation12], 0 }
   0xe   :  { %27 = vsyncpa [#allocation4], 0 }
   0xf   :  { %29 = vsyncpa [#allocation4 + $0x1], 0 }
  0x10   :  { %30 = vsyncpa [#allocation16], 0 }
  0x11   :  { %32 = vsyncpa [#allocation16 + $0x1], 0  ;;  %s6377_s18 = smov 0   ;;  %s6379_s19 = smov 0  }
  0x12   :  { %s6381_s20 = smov 0   ;;  %s6383_s21 = smov 0  }
  0x13 LB: > { %s6277_s22 = smov [#allocation5]   ;;  %s6398_s24 = sadd.s32 4294967295, %s6275_s21   ;;  %s6275_s21 = sphi %s6383_s21, %s9574_s21   ;;  %s6271_s20 = sphi %s6381_s20, %s9573_s20   ;;  %s6267_s19 = sphi %s6379_s19, %s9572_s19   ;;  %s6263_s18 = sphi %s6377_s18, %s9571_s18  }
  0x14   : > { %s412_s23 = sshll.u32 %s6277_s22, 4  ;;  %p4625_p0 = scmp.ge.s32.totalorder %s6275_s21, 1  ;;  %s413_s23 = int_to_ptr.vmem [resolvable:$true] %s412_s23 }
  0x15   : > { %p9209_p1 = scmp.eq.s32.totalorder %s6398_s24, 0  ;;  %p399_p2 = scmp.lt.s32.totalorder %s6275_s21, 3 }
  0x16   : > { %s6278_s26 = smov [#allocation8]   ;;  %s6279_s29 = smov [#allocation11]  }
  0x17   : > { %p6403_p3 = pnand %p4625_p0, %p399_p2  ;;  %s433_s27 = sshll.u32 %s6278_s26, 4  ;;  %s6410_s27 = int_to_ptr.vmem [resolvable:$true] %s433_s27 }
  0x18   : > { %s471_s30 = sshll.u32 %s6279_s29, 4  ;;  %s5970_s17 = scalar_lea.vmem %s413_s23, 16  ;;  %s6418_s30 = int_to_ptr.vmem [resolvable:$true] %s471_s30 }
  0x19   : > { %s9334_s25 = scalar_select %p6403_p3, 1, 0 }
  0x1a   : > { %p5484_p5 = pneg %p6403_p3  ;;  %p5971_p8 = scmp.ne.s32.totalorder %s413_s23, %s5970_s17 }
  0x1b   : > { %s5977_s22 = scalar_lea.vmem %s413_s23, 32  ;;  %p5978_p11 = scmp.lt.s32.totalorder %s413_s23, %s413_s23 }
  0x1c   : > { %p6414_p6 = pnand %p5484_p5, %p9209_p1  ;;  %p5979_p12 = scmp.lt.s32.totalorder %s5977_s22, %s5970_s17 }
  0x1e   : > { %p6422_p7 = pneg %p6414_p6  ;;  %p5980_p13 = por %p5979_p12, %p5978_p11 }
  0x20   : > { %p5973_p9 = pnand %p5971_p8, %p6422_p7 }
  0x22   : > { %p5974_p10 = pneg %p5973_p9 }
  0x24   : > { %p5981_p0 = pnand %p5980_p13, %p5974_p10 }
  0x26   : > { %5984 = shalt.err (!%p5981_p0)
}
  0x27   : > { %s9337_s1 = sld [smem:[#allocation85_spill]]  ;;  %s5996_s13 = scalar_lea.vmem %s6410_s27, 6144 }
  0x28   : > { %p5997_p2 = scmp.ne.s32.totalorder %s6410_s27, %s5996_s13  ;;  %p6004_p9 = scmp.lt.s32.totalorder %s6410_s27, %s6410_s27 }
  0x29   : > { %p6005_p11 = scmp.lt.s32.totalorder %s5996_s13, %s5996_s13 }
  0x2a   : > { %p5999_p5 = pnand %p5997_p2, %p6422_p7 }
  0x2b   : > { %p6006_p10 = por %p6005_p11, %p6004_p9 }
  0x2c   : > { %p6000_p8 = pneg %p5999_p5 }
  0x2d   : > { %5487 = dma.hbm_to_vmem [thread:$0]  (!%p6414_p6), %s9337_s1, 16, %s413_s23, [#allocation6]  }
  0x2e   : > { %p6007_p12 = pnand %p6006_p10, %p6000_p8 }
  0x30   : > { %6010 = shalt.err (!%p6007_p12)
}
  0x31   : > { %s6280_s17 = smov 384   ;;  %s6281_s22 = smov 24  }
  0x32   : > { %s9338_s3 = sld [smem:[#allocation87_spill]]  ;;  %s6022_s29 = scalar_lea.vmem %s6418_s30, 8192 }
  0x33   : > { %p6023_p13 = scmp.ne.s32.totalorder %s6418_s30, %s6022_s29  ;;  %p6030_p5 = scmp.lt.s32.totalorder %s6418_s30, %s6418_s30 }
  0x34   : > { %p6031_p8 = scmp.lt.s32.totalorder %s6022_s29, %s6022_s29 }
  0x35   : > { %p6025_p0 = pnand %p6023_p13, %p6422_p7 }
  0x36   : > { %p6032_p9 = por %p6031_p8, %p6030_p5 }
  0x37   : > { %p6026_p2 = pneg %p6025_p0 }
  0x38   : > { %5493 = dma.hbm_to_vmem [thread:$0]  (!%p6414_p6), %s9338_s3, 6144, %s6410_s27, [#allocation9], %s6280_s17, %s6280_s17, %s6281_s22  }
  0x39   : > { %p6033_p11 = pnand %p6032_p9, %p6026_p2 }
  0x3b   : > { %6036 = shalt.err (!%p6033_p11)
}
  0x3c   : > { %s6282_s13 = smov 512   ;;  %s6283_s1 = smov 32  }
  0x3d   : > { %s9339_s9 = sld [smem:[#allocation89_spill]]  ;;  %s6284_s27 = smov [#allocation7]  }
  0x3e   : > { %s423_s17 = sshll.u32 %s6284_s27, 4  ;;  %s6285_s22 = smov [#allocation10]   ;;  %s424_s17 = int_to_ptr.vmem [resolvable:$true] %s423_s17 }
  0x3f   : > { %s449_s26 = sshll.u32 %s6285_s22, 4  ;;  %s6048_s3 = scalar_lea.vmem %s424_s17, 16  ;;  %s450_s26 = int_to_ptr.vmem [resolvable:$true] %s449_s26 }
  0x40   : > { %p6049_p10 = scmp.ne.s32.totalorder %s424_s17, %s6048_s3  ;;  %s6055_s29 = scalar_lea.vmem %s424_s17, 32 }
  0x41   : > { %p6056_p0 = scmp.lt.s32.totalorder %s424_s17, %s424_s17  ;;  %p6057_p2 = scmp.lt.s32.totalorder %s6055_s29, %s6048_s3 }
  0x42   : > { %p6051_p12 = pnand %p6049_p10, %p6422_p7 }
  0x43   : > { %5499 = dma.hbm_to_vmem [thread:$0]  (!%p6414_p6), %s9339_s9, 8192, %s6418_s30, [#allocation12], %s6282_s13, %s6282_s13, %s6283_s1  }
  0x44   : > { %p6052_p13 = pneg %p6051_p12  ;;  %p6058_p5 = por %p6057_p2, %p6056_p0 }
  0x46   : > { %p6059_p8 = pnand %p6058_p5, %p6052_p13 }
  0x48   : > { %6062 = shalt.err (!%p6059_p8)
}
  0x49   : > { %s9340_s2 = sld [smem:[#allocation86_spill]]  ;;  %s6074_s30 = scalar_lea.vmem %s450_s26, 2048 }
  0x4a   : > { %p6075_p9 = scmp.ne.s32.totalorder %s450_s26, %s6074_s30  ;;  %p6082_p12 = scmp.lt.s32.totalorder %s450_s26, %s450_s26 }
  0x4b   : > { %p6083_p4 = scmp.lt.s32.totalorder %s6074_s30, %s6074_s30 }
  0x4c   : > { %p6077_p11 = pnand %p6075_p9, %p6422_p7 }
  0x4d   : > { %p6084_p1 = por %p6083_p4, %p6082_p12 }
  0x4e   : > { %p6078_p10 = pneg %p6077_p11 }
  0x4f   : > { %5490 = dma.hbm_to_vmem [thread:$0]  (!%p6414_p6), %s9340_s2, 16, %s424_s17, [#allocation6]  }
  0x50   : > { %p6085_p3 = pnand %p6084_p1, %p6078_p10 }
  0x52   : > { %6088 = shalt.err (!%p6085_p3)
}
  0x53   : > { %s9211_s3 = smov 128   ;;  %s9212_s13 = smov 8  }
  0x54   : > { %s9341_s5 = sld [smem:[#allocation88_spill]]  ;;  %s6288_s17 = smov [#allocation13]  }
  0x55   : > { %s487_s22 = sshll.u32 %s6288_s17, 4  ;;  %s488_s22 = int_to_ptr.vmem [resolvable:$true] %s487_s22 }
  0x56   : > { %s6100_s29 = scalar_lea.vmem %s488_s22, 8192  ;;  %p6108_p4 = scmp.lt.s32.totalorder %s488_s22, %s488_s22 }
  0x57   : > { %p6101_p13 = scmp.ne.s32.totalorder %s488_s22, %s6100_s29  ;;  %p6109_p0 = scmp.lt.s32.totalorder %s6100_s29, %s6100_s29 }
  0x59   : > { %p6103_p1 = pnand %p6101_p13, %p6422_p7  ;;  %p6110_p2 = por %p6109_p0, %p6108_p4 }
  0x5a   : > { %5496 = dma.hbm_to_vmem [thread:$0]  (!%p6414_p6), %s9341_s5, 2048, %s450_s26, [#allocation9], %s9211_s3, %s9211_s3, %s9212_s13  }
  0x5b   : > { %p6104_p3 = pneg %p6103_p1 }
  0x5d   : > { %p6111_p5 = pnand %p6110_p2, %p6104_p3 }
  0x5f   : > { %6114 = shalt.err (!%p6111_p5)
}
  0x60   : > { %s9342_s11 = sld [smem:[#allocation90_spill]]  ;;  %s9213_s28 = sadd.s32 4294967294, %s6275_s21  }
  0x61   : > { %s6486_s16 = sadd.s32 1, %s6275_s21   ;;  %s45_s30 = sadd.s32 1, %s6271_s20 }
  0x62   : > { %s42_s1 = ssub.s32 %s6275_s21, %s6486_s16  ;;  %p52_p8 = scmp.ne.s32.totalorder %s6271_s20, %s6267_s19 }
  0x63   : > { %p43_p7 = scmp.eq.s32.totalorder %s42_s1, 0  ;;  %p53_p9 = scmp.eq.s32.totalorder %s6275_s21, 0 }
  0x64   : > { %p58_p11 = scmp.ne.s32.totalorder %s6267_s19, %s6263_s18  ;;  %p9345_p12 = scmp.eq.s32.totalorder %s6398_s24, 0 }
  0x65   : > { %s6497_s23 = scalar_select %p43_p7, %s6271_s20, %s45_s30  }
  0x66   : > { %5502 = dma.hbm_to_vmem [thread:$0]  (!%p6414_p6), %s9342_s11, 8192, %s488_s22, [#allocation12], %s9211_s3, %s9211_s3, %s9212_s13  }
  0x67   : > { %9343 = sst [smem:[#allocation24_spill]] %s6497_s23  ;;  %p6499_p10 = por %p53_p9, %p52_p8 }
  0x68   : > { %p6505_p6 = por %p9345_p12, %p58_p11  ;;  %p334_p13 = scmp.eq.s32.totalorder %s6398_s24, 1 }
  0x69   : > { %p340_p1 = scmp.eq.s32.totalorder %s9213_s28, 1  ;;  %p5523_p3 = scmp.lt.s32.totalorder %s6275_s21, 2 }
  0x6a   : > { %s9346_s17 = scalar_select %p6505_p6, 1, 0 }
  0x6b   : > { %s504_s22 = sand.u32 1, %s6271_s20   ;;  %p6514_p4 = por %p334_p13, %p52_p8 }
  0x6c   : > { %p6518_p0 = por %p340_p1, %p58_p11  ;;  %s4633_s26 = sshll.u32 %s504_s22, 7 }
  0x6d   : > { %s9347_s29 = scalar_select %p6514_p4, 1, 0 }
  0x6e   : > { %s9348_s15 = scalar_select %p6518_p0, 1, 0 }
  0x6f   : > { %s4728_s1 = sshll.u32 %s6275_s21, 11  ;;  %s508_s28 = scalar_lea.vmem [#allocation2], %s4633_s26 }
  0x70   : > { %s6526_s13 = scalar_lea.hbm %s9191_s0, %s4728_s1  ;;  %s515_s2 = sshll.u32 %s508_s28, 4  ;;  %s6528_s2 = int_to_ptr.vmem [resolvable:$true] %s515_s2 }
  0x71   : > { %p6532_p2 = pnand %p5523_p3, %p6499_p10  ;;  %s6536_s9 = scalar_lea.sflag [#allocation3], %s504_s22 }
  0x72   : > { %s6115_s11 = scalar_lea.hbm %s6526_s13, 2048  ;;  %s6120_s28 = scalar_lea.hbm %s9191_s0, 4096 }
  0x73   : > { %p6116_p5 = scmp.ne.s32.totalorder %s6526_s13, %s6115_s11  ;;  %p6117_p7 = pneg %p6532_p2 }
  0x74   : > { %p6121_p11 = scmp.lt.s32.totalorder %s6526_s13, %s9191_s0  ;;  %p6122_p10 = scmp.lt.s32.totalorder %s6120_s28, %s6115_s11 }
  0x75   : > { %p6118_p8 = pnand %p6117_p7, %p6116_p5 }
  0x76   : > { %p6123_p12 = por %p6122_p10, %p6121_p11 }
  0x77   : > { %p6119_p9 = pneg %p6118_p8 }
  0x79   : > { %p6124_p13 = pnand %p6123_p12, %p6119_p9 }
  0x7b   : > { %6127 = shalt.err (!%p6124_p13)
}
  0x7c   : > { %s6128_s27 = scalar_lea.vmem %s6528_s2, 2048  ;;  %s6289_s22 = smov [#allocation2]  }
  0x7d   : > { %p6129_p1 = scmp.ne.s32.totalorder %s6528_s2, %s6128_s27  ;;  %s6133_s23 = sshll.u32 %s6289_s22, 4  ;;  %s6134_s23 = int_to_ptr.vmem [resolvable:$false] %s6133_s23 }
  0x7e   : > { %s6135_s3 = scalar_lea.vmem %s6134_s23, 4096  ;;  %p6136_p8 = scmp.lt.s32.totalorder %s6528_s2, %s6134_s23 }
  0x7f   : > { %p6131_p3 = pnand %p6129_p1, %p6117_p7  ;;  %p6137_p0 = scmp.lt.s32.totalorder %s6135_s3, %s6128_s27 }
  0x81   : > { %p6132_p5 = pneg %p6131_p3  ;;  %p6138_p4 = por %p6137_p0, %p6136_p8 }
  0x83   : > { %p6139_p6 = pnand %p6138_p4, %p6132_p5 }
  0x85   : > { %6142 = shalt.err (!%p6139_p6)
}
  0x86   : > { %s9350_s11 = smov 8   ;;  %s9351_s1 = smov 128  }
  0x87   : > { %5506 = dma.hbm_to_vmem [thread:$0]  (!%p6532_p2), %s6526_s13, 2048, %s6528_s2, %s6536_s9, %s9351_s1, %s9351_s1, %s9350_s11  }
  0x88   : > { %p9352_p7 = scmp.ne.s32.totalorder %s9334_s25, 0 }
  0x8a   : > { %527 = sbr.rel (%p9352_p7) target bundleno = 3379 (0xd33), region = 72 }
  0x8f   : > { %s6563_s28 = sand.u32 1, %s6267_s19   ;;  %p9353_p6 = scmp.ne.s32.totalorder %s9346_s17, 0 }
  0x90   : > { %s6566_s23 = sshll.u32 %s6563_s28, 7  ;;  %s530_s5 = scalar_lea.sflag [#allocation3], %s6563_s28 }
  0x91   : > { %s6570_s26 = scalar_lea.vmem [#allocation2], %s6566_s23 }
  0x92   : > { %6238 = dma.done.wait (%p9353_p6), %s530_s5, 2048  }
  0x93   : > { %6240 = vsyncadd (%p9353_p6), %s530_s5, 4294965248  ;;  %p9354_p4 = scmp.eq.s32.totalorder %s6398_s24, 0 }
  0x95   : > { %6242 = dma.done.wait (%p9354_p4), [#allocation6], 32   ;;  %p9355_p0 = pmov %p9354_p4 }
  0x97   : > { %6244 = vsyncadd (%p9355_p0), [#allocation6], 4294967264  ;;  %p9356_p2 = pmov %p9355_p0 }
  0x98   : > { %p9357_p9 = pmov %p9355_p0 }
  0x99   : > { %6246 = dma.done.wait (%p9356_p2), [#allocation9], 8192  }
  0x9a   : > { %6248 = vsyncadd (%p9357_p9), [#allocation9], 4294959104  ;;  %p9358_p11 = pmov %p9355_p0 }
  0x9b   : > { %p9359_p10 = pmov %p9355_p0 }
  0x9c   : > { %6250 = dma.done.wait (%p9358_p11), [#allocation12], 16384  }
  0x9d   : > { %6252 = vsyncadd (%p9359_p10), [#allocation12], 4294950912  ;;  %v614_v0 = vld [vmem:[%s6570_s26] sm:$0xff]  ;;  %v616_v1 = vld [vmem:[%s6570_s26 + $0x10] sm:$0xff]  ;;  %vm1307_vm0 = vcmask 523264   ;;  %s6820_s25 = scalar_lea.vmem [#allocation15], %s6566_s23 }
  0x9e   : > { %632 = vadd.xlane.f32.xlu0 %v614_v0  ;;  %636 = vadd.xlane.f32.xlu1 %v616_v1  ;;  %v6591_v2 = vld [vmem:[%s6570_s26 + $0x8] sm:$0xff]  ;;  %v6594_v3 = vld [vmem:[%s6570_s26 + $0x18] sm:$0xff]  ;;  %v6599_v4 = vld [vmem:[%s6570_s26 + $0x20] sm:$0xff]  ;;  %s6833_s13 = scalar_lea.vmem [#allocation17], %s6566_s23  ;;  %s6291_s17 = smov 64  }
  0x9f   : > { %v6602_v5 = vld [vmem:[%s6570_s26 + $0x28] sm:$0xff]  ;;  %v6607_v6 = vld [vmem:[%s6570_s26 + $0x30] sm:$0xff]  ;;  %v6610_v7 = vld [vmem:[%s6570_s26 + $0x38] sm:$0xff]  ;;  %s9018_s27 = scalar_lea.vmem [#allocation14], %s6566_s23  ;;  %s4382_s22 = sand.u32 1, %s6398_s24  }
  0xa0   : > { %v6615_v8 = vld [vmem:[%s6570_s26 + $0x40] sm:$0xff]  ;;  %v6618_v9 = vld [vmem:[%s6570_s26 + $0x48] sm:$0xff]  ;;  %v6623_v10 = vld [vmem:[%s6570_s26 + $0x50] sm:$0xff]  ;;  %s9024_s3 = sshll.u32 %s6398_s24, 11  ;;  %s4417_s5 = sshll.u32 %s6820_s25, 4  ;;  %s9036_s5 = int_to_ptr.vmem [resolvable:$true] %s4417_s5 }
  0xa1   : > { %v6626_v11 = vld [vmem:[%s6570_s26 + $0x58] sm:$0xff]  ;;  %v6631_v12 = vld [vmem:[%s6570_s26 + $0x60] sm:$0xff]  ;;  %v6634_v13 = vld [vmem:[%s6570_s26 + $0x68] sm:$0xff]  ;;  %s9031_s1 = scalar_lea.hbm %s9205_s14, %s9024_s3  ;;  %s9038_s24 = scalar_lea.sflag [#allocation16], %s4382_s22 }
  0xa2   : > { %634 = vadd.xlane.f32.xlu0 %v6591_v2  ;;  %638 = vadd.xlane.f32.xlu1 %v6594_v3  ;;  %v6639_v14 = vld [vmem:[%s6570_s26 + $0x70] sm:$0xff]  ;;  %v6642_v15 = vld [vmem:[%s6570_s26 + $0x78] sm:$0xff]  ;;  %v893_v21 = vld [vmem:[#allocation8 + $0x140] sm:$0xff]  ;;  %p9548_p13 = scmp.ne.s32.totalorder %s9347_s29, 0  ;;  %s6292_s2 = smov [#allocation15]  }
  0xa3   : > { %v899_v16 = vld [vmem:[#allocation8 + $0x170] sm:$0xff]  ;;  %v898_v17 = vld [vmem:[#allocation8 + $0x168] sm:$0xff]  ;;  %v896_v18 = vld [vmem:[#allocation8 + $0x158] sm:$0xff]  ;;  %s6147_s9 = sshll.u32 %s6292_s2, 4  ;;  %s6148_s9 = int_to_ptr.vmem [resolvable:$false] %s6147_s9 }
  0xa4   : > { %918 = vmatprep.subr.mxu0 %v899_v16  ;;  %v895_v19 = vld [vmem:[#allocation8 + $0x150] sm:$0xff]  ;;  %v900_v20 = vld [vmem:[#allocation8 + $0x178] sm:$0xff]  ;;  %v897_v22 = vld [vmem:[#allocation8 + $0x160] sm:$0xff]  ;;  %p6150_p5 = scmp.lt.s32.totalorder %s9036_s5, %s6148_s9 }
  0xa5   : > { %919 = vmatpush1.msra.mxu0 %v898_v17  ;;  %5084 = vmatprep.subr.mxu1 %v900_v20  ;;  %v892_v23 = vld [vmem:[#allocation8 + $0x138] sm:$0xff]  ;;  %v890_v24 = vld [vmem:[#allocation8 + $0x128] sm:$0xff]  ;;  %v889_v25 = vld [vmem:[#allocation8 + $0x120] sm:$0xff] }
  0xa6   : > { %640 = vadd.xlane.f32.xlu0 %v6599_v4  ;;  %642 = vadd.xlane.f32.xlu1 %v6602_v5  ;;  %v887_v58 = vld [vmem:[#allocation8 + $0x110] sm:$0xff]  ;;  %v894_v59 = vld [vmem:[#allocation8 + $0x148] sm:$0xff] }
  0xa7   : > { %920 = vmatprep.subr.mxu0 %v896_v18  ;;  %5085 = vmatpush3.msra.mxu1 %v900_v20  ;;  %v886_v63 = vld [vmem:[#allocation8 + $0x108] sm:$0xff]  ;;  %v888_v20 = vld [vmem:[#allocation8 + $0x118] sm:$0xff] }
  0xa8   : > { %921 = vmatpush1.msra.mxu0 %v895_v19  ;;  %5086 = vmatprep.subr.mxu1 %v897_v22  ;;  %v881_v19 = vld [vmem:[#allocation8 + $0xe0] sm:$0xff] }
  0xa9   : > { %922 = vmatprep.subr.mxu0 %v893_v21  ;;  %5087 = vmatpush3.msra.mxu1 %v897_v22 }
  0xaa   : > { %644 = vadd.xlane.f32.xlu0 %v6607_v6  ;;  %646 = vadd.xlane.f32.xlu1 %v6610_v7 }
  0xab   : > { %923 = vmatpush1.msra.mxu0 %v892_v23  ;;  %5088 = vmatprep.subr.mxu1 %v894_v59  ;;  %v878_v23 = vld [vmem:[#allocation8 + $0xc8] sm:$0xff] }
  0xac   : > { %924 = vmatprep.subr.mxu0 %v890_v24  ;;  %5089 = vmatpush3.msra.mxu1 %v894_v59  ;;  %v885_v24 = vld [vmem:[#allocation8 + $0x100] sm:$0xff]  ;;  %v870_v59 = vld [vmem:[#allocation8 + $0x88] sm:$0xff] }
  0xad   : > { %925 = vmatpush1.msra.mxu0 %v889_v25 }
  0xae   : > { %648 = vadd.xlane.f32.xlu0 %v6615_v8  ;;  %650 = vadd.xlane.f32.xlu1 %v6618_v9 }
  0xaf   : > { %926 = vmatprep.subr.mxu0 %v887_v58  ;;  %v865_v58 = vld [vmem:[#allocation8 + $0x60] sm:$0xff] }
  0xb0   : > { %927 = vmatpush1.msra.mxu0 %v886_v63  ;;  %v859_v63 = vld [vmem:[#allocation8 + $0x30] sm:$0xff] }
  0xb2   : > { %652 = vadd.xlane.f32.xlu0 %v6623_v10  ;;  %654 = vadd.xlane.f32.xlu1 %v6626_v11 }
  0xb6   : > { %656 = vadd.xlane.f32.xlu0 %v6631_v12  ;;  %658 = vadd.xlane.f32.xlu1 %v6634_v13 }
  0xba   : > { %660 = vadd.xlane.f32.xlu0 %v6639_v14  ;;  %662 = vadd.xlane.f32.xlu1 %v6642_v15 }
 0x127   : > { %v633_v26 = vpop.xlane.xlu0 %632  ;;  %v637_v27 = vpop.xlane.xlu1 %636 }
 0x128   : > { %v665_v28 = vmul.f32 0.0078125, %v633_v26  ;;  %v667_v29 = vmul.f32 0.0078125, %v637_v27  ;;  %v877_v27 = vld [vmem:[#allocation8 + $0xc0] sm:$0xff] }
 0x12a   : > { %v6646_v30 = vsub.f32 %v614_v0, %v665_v28  ;;  %v6648_v31 = vsub.f32 %v616_v1, %v667_v29  ;;  %v884_v0 = vld [vmem:[#allocation8 + $0xf8] sm:$0xff]  ;;  %v891_v1 = vld [vmem:[#allocation8 + $0x130] sm:$0xff] }
 0x12b   : > { %v635_v32 = vpop.xlane.xlu0 %634  ;;  %v639_v33 = vpop.xlane.xlu1 %638  ;;  %928 = vmatprep.subr.mxu0 %v884_v0  ;;  %5090 = vmatprep.subr.mxu1 %v891_v1  ;;  %v857_v0 = vld [vmem:[#allocation8 + $0x20] sm:$0xff] }
 0x12c   : > { %v666_v34 = vmul.f32 0.0078125, %v635_v32  ;;  %v697_v35 = vmul.f32 %v6646_v30, %v6646_v30  ;;  %v668_v36 = vmul.f32 0.0078125, %v639_v33  ;;  %v699_v37 = vmul.f32 %v6648_v31, %v6648_v31  ;;  %5091 = vmatpush3.msra.mxu1 %v891_v1  ;;  %v875_v33 = vld [vmem:[#allocation8 + $0xb0] sm:$0xff]  ;;  %v864_v1 = vld [vmem:[#allocation8 + $0x58] sm:$0xff] }
 0x12d   : > { %5092 = vmatprep.subr.mxu1 %v888_v20 }
 0x12e   : > { %713 = vadd.xlane.f32.xlu0 %v697_v35  ;;  %v6655_v38 = vsub.f32 %v6591_v2, %v666_v34  ;;  %v6658_v39 = vsub.f32 %v6594_v3, %v668_v36  ;;  %5093 = vmatpush3.msra.mxu1 %v888_v20 }
 0x12f   : > { %v641_v40 = vpop.xlane.xlu0 %640  ;;  %v643_v41 = vpop.xlane.xlu1 %642  ;;  %5094 = vmatprep.subr.mxu1 %v885_v24 }
 0x130   : > { %v669_v42 = vmul.f32 0.0078125, %v641_v40  ;;  %v698_v43 = vmul.f32 %v6655_v38, %v6655_v38  ;;  %v670_v44 = vmul.f32 0.0078125, %v643_v41  ;;  %v700_v45 = vmul.f32 %v6658_v39, %v6658_v39  ;;  %5095 = vmatpush3.msra.mxu1 %v885_v24  ;;  %v879_v40 = vld [vmem:[#allocation8 + $0xd0] sm:$0xff] }
 0x132   : > { %717 = vadd.xlane.f32.xlu0 %v699_v37  ;;  %715 = vadd.xlane.f32.xlu1 %v698_v43  ;;  %v6665_v46 = vsub.f32 %v6599_v4, %v669_v42  ;;  %v6668_v47 = vsub.f32 %v6602_v5, %v670_v44  ;;  %v883_v5 = vld [vmem:[#allocation8 + $0xf0] sm:$0xff]  ;;  %v872_v37 = vld [vmem:[#allocation8 + $0x98] sm:$0xff] }
 0x133   : > { %v645_v48 = vpop.xlane.xlu0 %644  ;;  %v647_v49 = vpop.xlane.xlu1 %646  ;;  %929 = vmatpush1.msra.mxu0 %v883_v5  ;;  %v854_v5 = vld [vmem:[#allocation8 + $0x8] sm:$0xff] }
 0x134   : > { %v671_v50 = vmul.f32 0.0078125, %v645_v48  ;;  %v701_v51 = vmul.f32 %v6665_v46, %v6665_v46  ;;  %v672_v52 = vmul.f32 0.0078125, %v647_v49  ;;  %v702_v53 = vmul.f32 %v6668_v47, %v6668_v47  ;;  %930 = vmatprep.subr.mxu0 %v881_v19  ;;  %v871_v48 = vld [vmem:[#allocation8 + $0x90] sm:$0xff]  ;;  %v876_v49 = vld [vmem:[#allocation8 + $0xb8] sm:$0xff] }
 0x136   : > { %719 = vadd.xlane.f32.xlu1 %v700_v45  ;;  %721 = vadd.xlane.f32.xlu0 %v701_v51  ;;  %v6675_v54 = vsub.f32 %v6607_v6, %v671_v50  ;;  %v6678_v55 = vsub.f32 %v6610_v7, %v672_v52  ;;  %v868_v52 = vld [vmem:[#allocation8 + $0x78] sm:$0xff] }
 0x137   : > { %v649_v56 = vpop.xlane.xlu0 %648  ;;  %v651_v57 = vpop.xlane.xlu1 %650 }
 0x138   : > { %v673_v60 = vmul.f32 0.0078125, %v649_v56  ;;  %v703_v61 = vmul.f32 %v6675_v54, %v6675_v54  ;;  %v674_v62 = vmul.f32 0.0078125, %v651_v57  ;;  %v704_v2 = vmul.f32 %v6678_v55, %v6678_v55  ;;  %v866_v56 = vld [vmem:[#allocation8 + $0x68] sm:$0xff]  ;;  %v873_v57 = vld [vmem:[#allocation8 + $0xa0] sm:$0xff] }
 0x13a   : > { %723 = vadd.xlane.f32.xlu1 %v702_v53  ;;  %725 = vadd.xlane.f32.xlu0 %v703_v61  ;;  %v6685_v3 = vsub.f32 %v6615_v8, %v673_v60  ;;  %v6688_v4 = vsub.f32 %v6618_v9, %v674_v62  ;;  %v880_v8 = vld [vmem:[#allocation8 + $0xd8] sm:$0xff]  ;;  %v862_v60 = vld [vmem:[#allocation8 + $0x48] sm:$0xff]  ;;  %v867_v62 = vld [vmem:[#allocation8 + $0x70] sm:$0xff] }
 0x13b   : > { %v653_v6 = vpop.xlane.xlu0 %652  ;;  %v655_v7 = vpop.xlane.xlu1 %654  ;;  %931 = vmatpush1.msra.mxu0 %v880_v8  ;;  %v860_v61 = vld [vmem:[#allocation8 + $0x38] sm:$0xff] }
 0x13c   : > { %v675_v16 = vmul.f32 0.0078125, %v653_v6  ;;  %v705_v17 = vmul.f32 %v6685_v3, %v6685_v3  ;;  %v676_v18 = vmul.f32 0.0078125, %v655_v7  ;;  %v706_v9 = vmul.f32 %v6688_v4, %v6688_v4  ;;  %932 = vmatprep.subr.mxu0 %v878_v23  ;;  %v861_v6 = vld [vmem:[#allocation8 + $0x40] sm:$0xff] }
 0x13d   : > { %933 = vmatpush1.msra.mxu0 %v877_v27  ;;  %v853_v7 = vld [vmem:[#allocation8] sm:$0xff] }
 0x13e   : > { %727 = vadd.xlane.f32.xlu1 %v704_v2  ;;  %729 = vadd.xlane.f32.xlu0 %v705_v17  ;;  %v6695_v21 = vsub.f32 %v6623_v10, %v675_v16  ;;  %v6698_v22 = vsub.f32 %v6626_v11, %v676_v18  ;;  %v882_v10 = vld [vmem:[#allocation8 + $0xe8] sm:$0xff]  ;;  %v856_v2 = vld [vmem:[#allocation8 + $0x18] sm:$0xff]  ;;  %v9216_v17 = vmov 0.0   ;;  %v855_v18 = vld [vmem:[#allocation8 + $0x10] sm:$0xff] }
 0x13f   : > { %v657_v25 = vpop.xlane.xlu0 %656  ;;  %v659_v26 = vpop.xlane.xlu1 %658  ;;  %v874_v11 = vld [vmem:[#allocation8 + $0xa8] sm:$0xff]  ;;  %934 = vmatprep.subr.mxu0 %v875_v33  ;;  %5096 = vmatprep.subr.mxu1 %v882_v10 }
 0x140   : > { %v677_v28 = vmul.f32 0.0078125, %v657_v25  ;;  %v707_v29 = vmul.f32 %v6695_v21, %v6695_v21  ;;  %v678_v32 = vmul.f32 0.0078125, %v659_v26  ;;  %v708_v34 = vmul.f32 %v6698_v22, %v6698_v22  ;;  %935 = vmatpush1.msra.mxu0 %v874_v11  ;;  %5097 = vmatpush3.msra.mxu1 %v882_v10  ;;  %v858_v16 = vld [vmem:[#allocation8 + $0x28] sm:$0xff] }
 0x141   : > { %936 = vmatprep.subr.mxu0 %v872_v37  ;;  %5098 = vmatprep.subr.mxu1 %v879_v40 }
 0x142   : > { %731 = vadd.xlane.f32.xlu1 %v706_v9  ;;  %733 = vadd.xlane.f32.xlu0 %v707_v29  ;;  %v6705_v35 = vsub.f32 %v6631_v12, %v677_v28  ;;  %v6708_v36 = vsub.f32 %v6634_v13, %v678_v32  ;;  %v869_v12 = vld [vmem:[#allocation8 + $0x80] sm:$0xff] }
 0x143   : > { %v661_v41 = vpop.xlane.xlu0 %660  ;;  %v663_v42 = vpop.xlane.xlu1 %662  ;;  %937 = vmatpush1.msra.mxu0 %v871_v48  ;;  %5099 = vmatpush3.msra.mxu1 %v879_v40 }
 0x144   : > { %v679_v43 = vmul.f32 0.0078125, %v661_v41  ;;  %v709_v44 = vmul.f32 %v6705_v35, %v6705_v35  ;;  %v680_v45 = vmul.f32 0.0078125, %v663_v42  ;;  %v710_v13 = vmul.f32 %v6708_v36, %v6708_v36  ;;  %938 = vmatprep.subr.mxu0 %v869_v12  ;;  %5100 = vmatprep.subr.mxu1 %v876_v49 }
 0x145   : > { %939 = vmatpush1.msra.mxu0 %v868_v52  ;;  %5101 = vmatpush3.msra.mxu1 %v876_v49 }
 0x146   : > { %735 = vadd.xlane.f32.xlu1 %v708_v34  ;;  %737 = vadd.xlane.f32.xlu0 %v709_v44  ;;  %v6715_v50 = vsub.f32 %v6639_v14, %v679_v43  ;;  %v6718_v51 = vsub.f32 %v6642_v15, %v680_v45  ;;  %v863_v15 = vld [vmem:[#allocation8 + $0x50] sm:$0xff] }
 0x147   : > { %940 = vmatprep.subr.mxu0 %v866_v56  ;;  %5102 = vmatprep.subr.mxu1 %v873_v57 }
 0x148   : > { %v711_v53 = vmul.f32 %v6715_v50, %v6715_v50  ;;  %v712_v14 = vmul.f32 %v6718_v51, %v6718_v51  ;;  %941 = vmatpush1.msra.mxu0 %v865_v58  ;;  %5103 = vmatpush3.msra.mxu1 %v873_v57 }
 0x149   : > { %942 = vmatprep.subr.mxu0 %v863_v15  ;;  %5104 = vmatprep.subr.mxu1 %v870_v59 }
 0x14a   : > { %739 = vadd.xlane.f32.xlu1 %v710_v13  ;;  %741 = vadd.xlane.f32.xlu0 %v711_v53  ;;  %v6725_v13 = vld [vmem:[#allocation5] ss:$0 sm:$0xff] }
 0x14b   : > { %943 = vmatpush1.msra.mxu0 %v862_v60  ;;  %5105 = vmatpush3.msra.mxu1 %v870_v59 }
 0x14c   : > { %944 = vmatprep.subr.mxu0 %v860_v61  ;;  %5106 = vmatprep.subr.mxu1 %v867_v62 }
 0x14d   : > { %945 = vmatpush1.msra.mxu0 %v859_v63  ;;  %5107 = vmatpush3.msra.mxu1 %v867_v62 }
 0x14e   : > { %743 = vadd.xlane.f32.xlu1 %v712_v14  ;;  %946 = vmatprep.subr.mxu0 %v857_v0  ;;  %v6728_v14 = vld [vmem:[#allocation7] ss:$0 sm:$0xff] }
 0x14f   : > { %5108 = vmatprep.subr.mxu1 %v864_v1  ;;  %947 = vmatpush1.msra.mxu0 %v856_v2 }
 0x150   : > { %5109 = vmatpush3.msra.mxu1 %v864_v1  ;;  %948 = vmatprep.subr.mxu0 %v854_v5 }
 0x151   : > { %5110 = vmatprep.subr.mxu1 %v861_v6  ;;  %949 = vmatpush1.msra.mxu0 %v853_v7 }
 0x152   : > { %982 = vmatprep.mubr.f32.mxu0 %v9216_v17  ;;  %5111 = vmatpush3.msra.mxu1 %v861_v6 }
 0x153   : > { %5112 = vmatprep.subr.mxu1 %v858_v16 }
 0x154   : > { %5113 = vmatpush3.msra.mxu1 %v858_v16 }
 0x155   : > { %5114 = vmatprep.subr.mxu1 %v855_v18 }
 0x156   : > { %5115 = vmatpush3.msra.mxu1 %v855_v18 }
 0x1b7   : > { %v714_v19 = vpop.xlane.xlu0 %713 }
 0x1b8   : > { %v745_v20 = vmul.f32 0.0078125, %v714_v19 }
 0x1ba   : > { %v761_v8 = vadd.f32 1e-05, %v745_v20 }
 0x1bb   : > { %v716_v9 = vpop.xlane.xlu1 %715  ;;  %v718_v23 = vpop.xlane.xlu0 %717 }
 0x1bc   : > { %5619 = vrsqrt.f32 %v761_v8  ;;  %v746_v24 = vmul.f32 0.0078125, %v716_v9  ;;  %v747_v25 = vmul.f32 0.0078125, %v718_v23 }
 0x1be   : > { %v762_v26 = vadd.f32 1e-05, %v746_v24  ;;  %v763_v27 = vadd.f32 1e-05, %v747_v25 }
 0x1bf   : > { %v720_v28 = vpop.xlane.xlu1 %719  ;;  %v722_v29 = vpop.xlane.xlu0 %721 }
 0x1c0   : > { %5621 = vrsqrt.f32 %v762_v26  ;;  %v748_v32 = vmul.f32 0.0078125, %v720_v28  ;;  %v749_v33 = vmul.f32 0.0078125, %v722_v29 }
 0x1c1   : > { %5623 = vrsqrt.f32 %v763_v27 }
 0x1c2   : > { %v764_v10 = vadd.f32 1e-05, %v748_v32  ;;  %v765_v11 = vadd.f32 1e-05, %v749_v33 }
 0x1c3   : > { %v724_v34 = vpop.xlane.xlu1 %723  ;;  %v726_v37 = vpop.xlane.xlu0 %725 }
 0x1c4   : > { %5625 = vrsqrt.f32 %v764_v10  ;;  %v750_v40 = vmul.f32 0.0078125, %v724_v34  ;;  %v751_v41 = vmul.f32 0.0078125, %v726_v37 }
 0x1c5   : > { %5627 = vrsqrt.f32 %v765_v11 }
 0x1c6   : > { %v766_v42 = vadd.f32 1e-05, %v750_v40  ;;  %v767_v43 = vadd.f32 1e-05, %v751_v41 }
 0x1c7   : > { %v728_v44 = vpop.xlane.xlu1 %727  ;;  %v730_v45 = vpop.xlane.xlu0 %729 }
 0x1c8   : > { %5629 = vrsqrt.f32 %v766_v42  ;;  %v752_v48 = vmul.f32 0.0078125, %v728_v44  ;;  %v753_v12 = vmul.f32 0.0078125, %v730_v45 }
 0x1c9   : > { %v5620_v49 = vpop.eup %5619  ;;  %5631 = vrsqrt.f32 %v767_v43 }
 0x1ca   : > { %v768_v52 = vadd.f32 1e-05, %v752_v48  ;;  %v769_v53 = vadd.f32 1e-05, %v753_v12  ;;  %v793_v56 = vmul.f32 %v5620_v49, %v6646_v30 }
 0x1cb   : > { %v732_v57 = vpop.xlane.xlu1 %731  ;;  %v734_v58 = vpop.xlane.xlu0 %733 }
 0x1cc   : > { %5633 = vrsqrt.f32 %v768_v52  ;;  %v754_v15 = vmul.f32 0.0078125, %v732_v57  ;;  %v755_v59 = vmul.f32 0.0078125, %v734_v58  ;;  %v815_v60 = vmul.f32 %v6725_v13, %v793_v56 }
 0x1cd   : > { %v5622_v61 = vpop.eup %5621  ;;  %5635 = vrsqrt.f32 %v769_v53 }
 0x1ce   : > { %v5624_v62 = vpop.eup %5623  ;;  %v770_v63 = vadd.f32 1e-05, %v754_v15  ;;  %v771_v0 = vadd.f32 1e-05, %v755_v59  ;;  %v837_v1 = vadd.f32 %v6728_v14, %v815_v60  ;;  %v794_v2 = vmul.f32 %v5622_v61, %v6655_v38 }
 0x1cf   : > { %v736_v5 = vpop.xlane.xlu1 %735  ;;  %v738_v30 = vpop.xlane.xlu0 %737  ;;  %v795_v6 = vmul.f32 %v5624_v62, %v6648_v31 }
 0x1d0   : > { %5637 = vrsqrt.f32 %v770_v63  ;;  %v756_v7 = vmul.f32 0.0078125, %v736_v5  ;;  %v757_v16 = vmul.f32 0.0078125, %v738_v30  ;;  %983 = vmatmul.mubr.f32.vlgmr.msra.gmra.mxu0 %v837_v1  ;;  %5116 = vmatprep.mubr.f32.mxu1 %v837_v1  ;;  %v816_v18 = vmul.f32 %v6725_v13, %v794_v2 }
 0x1d1   : > { %v5626_v19 = vpop.eup %5625  ;;  %5639 = vrsqrt.f32 %v771_v0  ;;  %988 = vmatprep.mubr.f32.mxu0 %v9216_v17  ;;  %v817_v20 = vmul.f32 %v6725_v13, %v795_v6 }
 0x1d2   : > { %v5628_v8 = vpop.eup %5627  ;;  %v772_v9 = vadd.f32 1e-05, %v756_v7  ;;  %v773_v38 = vadd.f32 1e-05, %v757_v16  ;;  %v838_v23 = vadd.f32 %v6728_v14, %v816_v18  ;;  %v796_v31 = vmul.f32 %v5626_v19, %v6658_v39 }
 0x1d3   : > { %v740_v24 = vpop.xlane.xlu1 %739  ;;  %v742_v25 = vpop.xlane.xlu0 %741  ;;  %v839_v26 = vadd.f32 %v6728_v14, %v817_v20  ;;  %v797_v27 = vmul.f32 %v5628_v8, %v6665_v46 }
 0x1d4   : > { %5641 = vrsqrt.f32 %v772_v9  ;;  %v758_v28 = vmul.f32 0.0078125, %v740_v24  ;;  %v759_v29 = vmul.f32 0.0078125, %v742_v25  ;;  %989 = vmatmul.mubr.f32.gmra.mxu0 %v838_v23  ;;  %5117 = vmatmul.mubr.f32.vlgmr.msra.gmra.mxu1 %v838_v23  ;;  %v818_v32 = vmul.f32 %v6725_v13, %v796_v31  ;;  %v901_v31 = vld [vmem:[%s9195_s4] sm:$0x7] }
 0x1d5   : > { %v5630_v33 = vpop.eup %5629  ;;  %5643 = vrsqrt.f32 %v773_v38  ;;  %5119 = vmatprep.mubr.f32.mxu1 %v839_v26  ;;  %994 = vmatprep.mubr.f32.mxu0 %v9216_v17  ;;  %v819_v39 = vmul.f32 %v6725_v13, %v797_v27 }
 0x1d6   : > { %v5632_v10 = vpop.eup %5631  ;;  %v774_v11 = vadd.f32 1e-05, %v758_v28  ;;  %v775_v34 = vadd.f32 1e-05, %v759_v29  ;;  %v840_v37 = vadd.f32 %v6728_v14, %v818_v32  ;;  %v798_v46 = vmul.f32 %v5630_v33, %v6668_v47 }
 0x1d7   : > { %v744_v40 = vpop.xlane.xlu1 %743  ;;  %v841_v41 = vadd.f32 %v6728_v14, %v819_v39  ;;  %v799_v42 = vmul.f32 %v5632_v10, %v6675_v54 }
 0x1d8   : > { %5645 = vrsqrt.f32 %v774_v11  ;;  %v760_v43 = vmul.f32 0.0078125, %v744_v40  ;;  %995 = vmatmul.mubr.f32.gmra.mxu0 %v839_v26  ;;  %5120 = vmatmul.mubr.f32.gmra.mxu1 %v840_v37  ;;  %v820_v44 = vmul.f32 %v6725_v13, %v798_v46 }
 0x1d9   : > { %v5634_v45 = vpop.eup %5633  ;;  %5647 = vrsqrt.f32 %v775_v34  ;;  %5122 = vmatprep.mubr.f32.mxu1 %v841_v41  ;;  %1000 = vmatprep.mubr.f32.mxu0 %v9216_v17  ;;  %v821_v48 = vmul.f32 %v6725_v13, %v799_v42 }
 0x1da   : > { %v5636_v12 = vpop.eup %5635  ;;  %v776_v47 = vadd.f32 1e-05, %v760_v43  ;;  %v842_v49 = vadd.f32 %v6728_v14, %v820_v44  ;;  %v800_v52 = vmul.f32 %v5634_v45, %v6678_v55 }
 0x1db   : > { %v843_v54 = vadd.f32 %v6728_v14, %v821_v48  ;;  %v801_v53 = vmul.f32 %v5636_v12, %v6685_v3 }
 0x1dc   : > { %5649 = vrsqrt.f32 %v776_v47  ;;  %1001 = vmatmul.mubr.f32.gmra.mxu0 %v840_v37  ;;  %5123 = vmatmul.mubr.f32.gmra.mxu1 %v842_v49  ;;  %v822_v56 = vmul.f32 %v6725_v13, %v800_v52 }
 0x1dd   : > { %v5638_v57 = vpop.eup %5637  ;;  %5125 = vmatprep.mubr.f32.mxu1 %v843_v54  ;;  %1006 = vmatprep.mubr.f32.mxu0 %v9216_v17  ;;  %v823_v58 = vmul.f32 %v6725_v13, %v801_v53 }
 0x1de   : > { %v5640_v15 = vpop.eup %5639  ;;  %v844_v59 = vadd.f32 %v6728_v14, %v822_v56  ;;  %v802_v55 = vmul.f32 %v5638_v57, %v6688_v4 }
 0x1df   : > { %v845_v60 = vadd.f32 %v6728_v14, %v823_v58  ;;  %v803_v3 = vmul.f32 %v5640_v15, %v6695_v21 }
 0x1e0   : > { %1007 = vmatmul.mubr.f32.gmra.mxu0 %v841_v41  ;;  %5126 = vmatmul.mubr.f32.gmra.mxu1 %v844_v59  ;;  %v824_v61 = vmul.f32 %v6725_v13, %v802_v55 }
 0x1e1   : > { %v5642_v62 = vpop.eup %5641  ;;  %5128 = vmatprep.mubr.f32.mxu1 %v845_v60  ;;  %1012 = vmatprep.mubr.f32.mxu0 %v9216_v17  ;;  %v825_v63 = vmul.f32 %v6725_v13, %v803_v3 }
 0x1e2   : > { %v5644_v0 = vpop.eup %5643  ;;  %v846_v1 = vadd.f32 %v6728_v14, %v824_v61  ;;  %v804_v2 = vmul.f32 %v5642_v62, %v6698_v22 }
 0x1e3   : > { %v847_v4 = vadd.f32 %v6728_v14, %v825_v63  ;;  %v805_v5 = vmul.f32 %v5644_v0, %v6705_v35 }
 0x1e4   : > { %1013 = vmatmul.mubr.f32.gmra.mxu0 %v842_v49  ;;  %5129 = vmatmul.mubr.f32.gmra.mxu1 %v846_v1  ;;  %v826_v21 = vmul.f32 %v6725_v13, %v804_v2 }
 0x1e5   : > { %v5646_v30 = vpop.eup %5645  ;;  %5131 = vmatprep.mubr.f32.mxu1 %v847_v4  ;;  %1018 = vmatprep.mubr.f32.mxu0 %v9216_v17  ;;  %v827_v6 = vmul.f32 %v6725_v13, %v805_v5 }
 0x1e6   : > { %v5648_v7 = vpop.eup %5647  ;;  %v848_v16 = vadd.f32 %v6728_v14, %v826_v21  ;;  %v806_v18 = vmul.f32 %v5646_v30, %v6708_v36 }
 0x1e7   : > { %v849_v22 = vadd.f32 %v6728_v14, %v827_v6  ;;  %v807_v19 = vmul.f32 %v5648_v7, %v6715_v50 }
 0x1e8   : > { %1019 = vmatmul.mubr.f32.gmra.mxu0 %v843_v54  ;;  %5132 = vmatmul.mubr.f32.gmra.mxu1 %v848_v16  ;;  %v828_v35 = vmul.f32 %v6725_v13, %v806_v18 }
 0x1e9   : > { %v5650_v20 = vpop.eup %5649  ;;  %5134 = vmatprep.mubr.f32.mxu1 %v849_v22  ;;  %1024 = vmatprep.mubr.f32.mxu0 %v9216_v17  ;;  %v829_v8 = vmul.f32 %v6725_v13, %v807_v19 }
 0x1ea   : > { %v850_v9 = vadd.f32 %v6728_v14, %v828_v35  ;;  %v808_v38 = vmul.f32 %v5650_v20, %v6718_v51  ;;  %v903_v51 = vlaneseq }
 0x1eb   : > { %v851_v36 = vadd.f32 %v6728_v14, %v829_v8 }
 0x1ec   : > { %1025 = vmatmul.mubr.f32.gmra.mxu0 %v844_v59  ;;  %5135 = vmatmul.mubr.f32.gmra.mxu1 %v850_v9  ;;  %v830_v50 = vmul.f32 %v6725_v13, %v808_v38  ;;  %v6793_v13 = vshrl.u32 %v903_v51, 7 }
 0x1ed   : > { %5137 = vmatprep.mubr.f32.mxu1 %v851_v36  ;;  %1030 = vmatprep.mubr.f32.mxu0 %v9216_v17 }
 0x1ee   : > { %v852_v23 = vadd.f32 %v6728_v14, %v830_v50  ;;  %9360 = vst [vmem:[#allocation25_spill] sm:$0xff] %v6793_v13  ;;  %v6796_v14 = vsub.s32 0, %v6793_v13  ;;  %v6802_v24 = vsub.s32 1, %v6793_v13  ;;  %v913_v26 = vsub.s32 2, %v6793_v13 }
 0x1f0   : > { %1031 = vmatmul.mubr.f32.gmra.mxu0 %v845_v60  ;;  %5138 = vmatmul.mubr.f32.gmra.mxu1 %v852_v23  ;;  %9361 = vst [vmem:[#allocation26_spill] sm:$0xff] %v6796_v14  ;;  %9362 = vst [vmem:[#allocation27_spill] sm:$0xff] %v6802_v24  ;;  %v6805_v25 = vrot.slane %v901_v31, %v6796_v14  ;;  %v6809_v27 = vrot.slane %v901_v31, %v6802_v24 }
 0x1f1   : > { %1036 = vmatprep.mubr.f32.mxu0 %v9216_v17  ;;  %v6812_v32 = vrot.slane %v901_v31, %v913_v26 }
 0x1f4   : > { %1037 = vmatmul.mubr.f32.gmra.mxu0 %v846_v1 }
 0x1f5   : > { %1042 = vmatprep.mubr.f32.mxu0 %v9216_v17 }
 0x1f8   : > { %1043 = vmatmul.mubr.f32.gmra.mxu0 %v847_v4 }
 0x1f9   : > { %1048 = vmatprep.mubr.f32.mxu0 %v9216_v17 }
 0x1fc   : > { %1049 = vmatmul.mubr.f32.gmra.mxu0 %v848_v16 }
 0x1fd   : > { %1054 = vmatprep.mubr.f32.mxu0 %v9216_v17 }
 0x200   : > { %1055 = vmatmul.mubr.f32.gmra.mxu0 %v849_v22 }
 0x201   : > { %1060 = vmatprep.mubr.f32.mxu0 %v9216_v17 }
 0x204   : > { %1061 = vmatmul.mubr.f32.gmra.mxu0 %v850_v9 }
 0x205   : > { %1066 = vmatprep.mubr.f32.mxu0 %v9216_v17 }
 0x208   : > { %1067 = vmatmul.mubr.f32.gmra.mxu0 %v851_v36 }
 0x209   : > { %1072 = vmatprep.mubr.f32.mxu0 %v9216_v17 }
 0x20c   : > { %1073 = vmatmul.mubr.f32.gmra.mxu0 %v852_v23 }
 0x290   : > { %v984_v28 = vpop.f32.mrf.mxu0 }
 0x291   : > { %v985_v29 = vadd.f32 %v984_v28, %v6805_v25 }
 0x292   : > { %v986_v33 = vpop.f32.mrf.mxu0 }
 0x293   : > { %v6814_v39 = vmul.f32 0.125, %v985_v29  ;;  %v6817_v10 = vadd.f32 %v986_v33, %v6809_v27 }
 0x294   : > { %v990_v11 = vpop.f32.mrf.mxu0  ;;  %v5118_v34 = vpop.f32.mrf.mxu1 }
 0x295   : > { %1240 = vst [vmem:[%s6820_s25] sm:$0xff] %v6817_v10  ;;  %v6825_v37 = vadd.f32 %v990_v11, %v6805_v25  ;;  %v6828_v46 = vadd.f32 %v5118_v34, %v6812_v32  ;;  %5172 = vmatprep.mubr.msk.f32.mxu0 %vm1307_vm0, %v6814_v39 }
 0x296   : > { %v992_v40 = vpop.f32.mrf.mxu0  ;;  %v1145_v41 = vpop.f32.mrf.mxu1 }
 0x297   : > { %1257 = vst [vmem:[%s6833_s13 + $0x8] sm:$0xff] %v6828_v46  ;;  %v6838_v42 = vadd.f32 %v992_v40, %v6809_v27  ;;  %v6841_v43 = vadd.f32 %v1145_v41, %v6812_v32 }
 0x298   : > { %v996_v44 = vpop.f32.mrf.mxu0  ;;  %v5121_v45 = vpop.f32.mrf.mxu1 }
 0x299   : > { %1241 = vst [vmem:[%s6820_s25 + $0x8] sm:$0xff] %v6838_v42  ;;  %1256 = vst [vmem:[%s6833_s13] sm:$0xff] %v6841_v43  ;;  %v6848_v48 = vadd.f32 %v996_v44, %v6805_v25  ;;  %v6851_v12 = vadd.f32 %v5121_v45, %v6812_v32 }
 0x29a   : > { %v998_v47 = vpop.f32.mrf.mxu0  ;;  %v1155_v49 = vpop.f32.mrf.mxu1 }
 0x29b   : > { %1259 = vst [vmem:[%s6833_s13 + $0x18] sm:$0xff] %v6851_v12  ;;  %v6856_v52 = vadd.f32 %v998_v47, %v6809_v27  ;;  %v6859_v54 = vadd.f32 %v1155_v49, %v6812_v32 }
 0x29c   : > { %v1002_v53 = vpop.f32.mrf.mxu0  ;;  %v5124_v56 = vpop.f32.mrf.mxu1 }
 0x29d   : > { %1242 = vst [vmem:[%s6820_s25 + $0x10] sm:$0xff] %v6856_v52  ;;  %1258 = vst [vmem:[%s6833_s13 + $0x10] sm:$0xff] %v6859_v54  ;;  %v6866_v57 = vadd.f32 %v1002_v53, %v6805_v25  ;;  %v6869_v58 = vadd.f32 %v5124_v56, %v6812_v32 }
 0x29e   : > { %v1004_v15 = vpop.f32.mrf.mxu0  ;;  %v1165_v59 = vpop.f32.mrf.mxu1 }
 0x29f   : > { %1261 = vst [vmem:[%s6833_s13 + $0x28] sm:$0xff] %v6869_v58  ;;  %v6874_v55 = vadd.f32 %v1004_v15, %v6809_v27  ;;  %v6877_v60 = vadd.f32 %v1165_v59, %v6812_v32 }
 0x2a0   : > { %v1008_v3 = vpop.f32.mrf.mxu0  ;;  %v5127_v61 = vpop.f32.mrf.mxu1 }
 0x2a1   : > { %9363 = vst [vmem:[#allocation28_spill] sm:$0xff] %v6877_v60  ;;  %1243 = vst [vmem:[%s6820_s25 + $0x18] sm:$0xff] %v6874_v55  ;;  %v6884_v62 = vadd.f32 %v1008_v3, %v6805_v25  ;;  %v6887_v63 = vadd.f32 %v5127_v61, %v6812_v32 }
 0x2a2   : > { %1260 = vst [vmem:[%s6833_s13 + $0x20] sm:$0xff] %v6877_v60  ;;  %v1010_v0 = vpop.f32.mrf.mxu0  ;;  %v1175_v1 = vpop.f32.mrf.mxu1 }
 0x2a3   : > { %9364 = vst [vmem:[#allocation29_spill] sm:$0xff] %v6887_v63  ;;  %1263 = vst [vmem:[%s6833_s13 + $0x38] sm:$0xff] %v6887_v63  ;;  %v6892_v2 = vadd.f32 %v1010_v0, %v6809_v27  ;;  %v6895_v4 = vadd.f32 %v1175_v1, %v6812_v32 }
 0x2a4   : > { %v1014_v5 = vpop.f32.mrf.mxu0  ;;  %v5130_v21 = vpop.f32.mrf.mxu1 }
 0x2a5   : > { %1244 = vst [vmem:[%s6820_s25 + $0x20] sm:$0xff] %v6892_v2  ;;  %1262 = vst [vmem:[%s6833_s13 + $0x30] sm:$0xff] %v6895_v4  ;;  %v6902_v30 = vadd.f32 %v1014_v5, %v6805_v25  ;;  %v6905_v6 = vadd.f32 %v5130_v21, %v6812_v32 }
 0x2a6   : > { %v1016_v7 = vpop.f32.mrf.mxu0  ;;  %v1185_v16 = vpop.f32.mrf.mxu1 }
 0x2a7   : > { %1265 = vst [vmem:[%s6833_s13 + $0x48] sm:$0xff] %v6905_v6  ;;  %v6910_v18 = vadd.f32 %v1016_v7, %v6809_v27  ;;  %v6913_v22 = vadd.f32 %v1185_v16, %v6812_v32 }
 0x2a8   : > { %v1020_v19 = vpop.f32.mrf.mxu0  ;;  %v5133_v35 = vpop.f32.mrf.mxu1 }
 0x2a9   : > { %9365 = vst [vmem:[#allocation30_spill] sm:$0xff] %v6913_v22  ;;  %1245 = vst [vmem:[%s6820_s25 + $0x28] sm:$0xff] %v6910_v18  ;;  %v6920_v20 = vadd.f32 %v1020_v19, %v6805_v25  ;;  %v6923_v8 = vadd.f32 %v5133_v35, %v6812_v32 }
 0x2aa   : > { %1264 = vst [vmem:[%s6833_s13 + $0x40] sm:$0xff] %v6913_v22  ;;  %v1022_v9 = vpop.f32.mrf.mxu0  ;;  %v1195_v38 = vpop.f32.mrf.mxu1 }
 0x2ab   : > { %9366 = vst [vmem:[#allocation31_spill] sm:$0xff] %v6923_v8  ;;  %1267 = vst [vmem:[%s6833_s13 + $0x58] sm:$0xff] %v6923_v8  ;;  %v6928_v36 = vadd.f32 %v1022_v9, %v6809_v27  ;;  %v6931_v50 = vadd.f32 %v1195_v38, %v6812_v32 }
 0x2ac   : > { %v1026_v23 = vpop.f32.mrf.mxu0  ;;  %v5136_v31 = vpop.f32.mrf.mxu1 }
 0x2ad   : > { %1246 = vst [vmem:[%s6820_s25 + $0x30] sm:$0xff] %v6928_v36  ;;  %1266 = vst [vmem:[%s6833_s13 + $0x50] sm:$0xff] %v6931_v50  ;;  %v6938_v26 = vadd.f32 %v1026_v23, %v6805_v25  ;;  %v6941_v28 = vadd.f32 %v5136_v31, %v6812_v32 }
 0x2ae   : > { %v1028_v29 = vpop.f32.mrf.mxu0  ;;  %v1205_v33 = vpop.f32.mrf.mxu1 }
 0x2af   : > { %1269 = vst [vmem:[%s6833_s13 + $0x68] sm:$0xff] %v6941_v28  ;;  %v6946_v11 = vadd.f32 %v1028_v29, %v6809_v27  ;;  %v6949_v34 = vadd.f32 %v1205_v33, %v6812_v32 }
 0x2b0   : > { %v1032_v40 = vpop.f32.mrf.mxu0  ;;  %v5139_v41 = vpop.f32.mrf.mxu1 }
 0x2b1   : > { %9367 = vst [vmem:[#allocation32_spill] sm:$0xff] %v6949_v34  ;;  %1247 = vst [vmem:[%s6820_s25 + $0x38] sm:$0xff] %v6946_v11  ;;  %v6956_v44 = vadd.f32 %v1032_v40, %v6805_v25  ;;  %v6959_v45 = vadd.f32 %v5139_v41, %v6812_v32 }
 0x2b2   : > { %1268 = vst [vmem:[%s6833_s13 + $0x60] sm:$0xff] %v6949_v34  ;;  %v1034_v47 = vpop.f32.mrf.mxu0  ;;  %v1215_v49 = vpop.f32.mrf.mxu1 }
 0x2b3   : > { %1271 = vst [vmem:[%s6833_s13 + $0x78] sm:$0xff] %v6959_v45  ;;  %v6964_v53 = vadd.f32 %v1034_v47, %v6809_v27  ;;  %v6967_v56 = vadd.f32 %v1215_v49, %v6812_v32  ;;  %5196 = vmatprep.subr.mxu1 %v6959_v45 }
 0x2b4   : > { %v1038_v15 = vpop.f32.mrf.mxu0  ;;  %5197 = vmatpush3.msra.mxu1 %v6959_v45 }
 0x2b5   : > { %9368 = vst [vmem:[#allocation33_spill] sm:$0xff] %v6967_v56  ;;  %1248 = vst [vmem:[%s6820_s25 + $0x40] sm:$0xff] %v6964_v53  ;;  %v6976_v59 = vadd.f32 %v1038_v15, %v6805_v25  ;;  %5198 = vmatprep.subr.mxu1 %v6967_v56 }
 0x2b6   : > { %1270 = vst [vmem:[%s6833_s13 + $0x70] sm:$0xff] %v6967_v56  ;;  %v1040_v3 = vpop.f32.mrf.mxu0  ;;  %5199 = vmatpush3.msra.mxu1 %v6967_v56 }
 0x2b7   : > { %v6981_v32 = vadd.f32 %v1040_v3, %v6809_v27  ;;  %5200 = vmatprep.subr.mxu1 %v6941_v28 }
 0x2b8   : > { %v1044_v61 = vpop.f32.mrf.mxu0  ;;  %5201 = vmatpush3.msra.mxu1 %v6941_v28 }
 0x2b9   : > { %1249 = vst [vmem:[%s6820_s25 + $0x48] sm:$0xff] %v6981_v32  ;;  %v6988_v0 = vadd.f32 %v1044_v61, %v6805_v25  ;;  %5202 = vmatprep.subr.mxu1 %v6949_v34 }
 0x2ba   : > { %v1046_v1 = vpop.f32.mrf.mxu0  ;;  %5203 = vmatpush3.msra.mxu1 %v6949_v34 }
 0x2bb   : > { %v6993_v5 = vadd.f32 %v1046_v1, %v6809_v27  ;;  %5204 = vmatprep.subr.mxu1 %v6923_v8 }
 0x2bc   : > { %v1050_v21 = vpop.f32.mrf.mxu0  ;;  %5205 = vmatpush3.msra.mxu1 %v6923_v8 }
 0x2bd   : > { %1250 = vst [vmem:[%s6820_s25 + $0x50] sm:$0xff] %v6993_v5  ;;  %v7000_v7 = vadd.f32 %v1050_v21, %v6805_v25  ;;  %1906 = vrot.lane.b32.xlu1 %v6993_v5, %s6291_s17  ;;  %5206 = vmatprep.subr.mxu1 %v6931_v50 }
 0x2be   : > { %v1052_v16 = vpop.f32.mrf.mxu0  ;;  %5207 = vmatpush3.msra.mxu1 %v6931_v50 }
 0x2bf   : > { %v1053_v19 = vadd.f32 %v1052_v16, %v6809_v27  ;;  %5208 = vmatprep.subr.mxu1 %v6905_v6  ;;  %v7191_v16 = vadd.s32 8, %v6793_v13 }
 0x2c0   : > { %v1056_v35 = vpop.f32.mrf.mxu0  ;;  %5209 = vmatpush3.msra.mxu1 %v6905_v6 }
 0x2c1   : > { %1251 = vst [vmem:[%s6820_s25 + $0x58] sm:$0xff] %v1053_v19  ;;  %v7011_v9 = vadd.f32 %v1056_v35, %v6805_v25  ;;  %1908 = vrot.lane.b32.xlu0 %v1053_v19, %s6291_s17  ;;  %5210 = vmatprep.subr.mxu1 %v6913_v22  ;;  %9376 = vst [vmem:[#allocation41_spill] sm:$0xff] %v7191_v16  ;;  %v7199_v35 = vadd.s32 24, %v6793_v13 }
 0x2c2   : > { %v1058_v38 = vpop.f32.mrf.mxu0  ;;  %5211 = vmatpush3.msra.mxu1 %v6913_v22 }
 0x2c3   : > { %v1059_v23 = vadd.f32 %v1058_v38, %v6809_v27  ;;  %5212 = vmatprep.subr.mxu1 %v6887_v63  ;;  %9378 = vst [vmem:[#allocation43_spill] sm:$0xff] %v7199_v35  ;;  %v7204_v38 = vadd.s32 16, %v6793_v13 }
 0x2c4   : > { %v1062_v31 = vpop.f32.mrf.mxu0  ;;  %5213 = vmatpush3.msra.mxu1 %v6887_v63 }
 0x2c5   : > { %1252 = vst [vmem:[%s6820_s25 + $0x60] sm:$0xff] %v1059_v23  ;;  %v7021_v29 = vadd.f32 %v1062_v31, %v6805_v25  ;;  %1910 = vrot.lane.b32.xlu1 %v1059_v23, %s6291_s17  ;;  %5214 = vmatprep.subr.mxu1 %v6895_v4  ;;  %9379 = vst [vmem:[#allocation44_spill] sm:$0xff] %v7204_v38  ;;  %v7215_v31 = vadd.s32 40, %v6793_v13 }
 0x2c6   : > { %v1064_v33 = vpop.f32.mrf.mxu0  ;;  %5215 = vmatpush3.msra.mxu1 %v6895_v4 }
 0x2c7   : > { %v1065_v40 = vadd.f32 %v1064_v33, %v6809_v27  ;;  %5216 = vmatprep.subr.mxu1 %v6869_v58  ;;  %9380 = vst [vmem:[#allocation45_spill] sm:$0xff] %v7215_v31 }
 0x2c8   : > { %v1068_v41 = vpop.f32.mrf.mxu0  ;;  %5217 = vmatpush3.msra.mxu1 %v6869_v58 }
 0x2c9   : > { %1253 = vst [vmem:[%s6820_s25 + $0x68] sm:$0xff] %v1065_v40  ;;  %v7031_v47 = vadd.f32 %v1068_v41, %v6805_v25  ;;  %1912 = vrot.lane.b32.xlu0 %v1065_v40, %s6291_s17  ;;  %5218 = vmatprep.subr.mxu1 %v6877_v60 }
 0x2ca   : > { %v1070_v49 = vpop.f32.mrf.mxu0  ;;  %5219 = vmatpush3.msra.mxu1 %v6877_v60 }
 0x2cb   : > { %v1071_v15 = vadd.f32 %v1070_v49, %v6809_v27  ;;  %5220 = vmatprep.subr.mxu1 %v6851_v12  ;;  %v7237_v49 = vadd.s32 56, %v6793_v13 }
 0x2cc   : > { %v1074_v3 = vpop.f32.mrf.mxu0  ;;  %5221 = vmatpush3.msra.mxu1 %v6851_v12  ;;  %v7138_v12 = vmul.f32 0.125, %v6938_v26  ;;  %v7168_v26 = vmul.f32 0.125, %v7021_v29 }
 0x2cd   : > { %1254 = vst [vmem:[%s6820_s25 + $0x70] sm:$0xff] %v1071_v15  ;;  %v7041_v61 = vadd.f32 %v1074_v3, %v6805_v25  ;;  %5222 = vmatprep.subr.mxu1 %v6859_v54  ;;  %1914 = vrot.lane.b32.xlu1 %v1071_v15, %s6291_s17  ;;  %v7108_v25 = vmul.f32 0.125, %v6825_v37  ;;  %v7128_v37 = vmul.f32 0.125, %v6902_v30  ;;  %v7158_v30 = vmul.f32 0.125, %v7000_v7  ;;  %9382 = vst [vmem:[#allocation47_spill] sm:$0xff] %v7237_v49 }
 0x2ce   : > { %v1076_v1 = vpop.f32.mrf.mxu0  ;;  %5223 = vmatpush3.msra.mxu1 %v6859_v54  ;;  %v7141_v54 = vmul.f32 0.125, %v6956_v44  ;;  %v7171_v44 = vmul.f32 0.125, %v7031_v47 }
 0x2cf   : > { %v1077_v21 = vadd.f32 %v1076_v1, %v6809_v27  ;;  %5224 = vmatprep.subr.mxu1 %v6828_v46  ;;  %v7111_v27 = vmul.f32 0.125, %v6848_v48  ;;  %v7131_v48 = vmul.f32 0.125, %v6920_v20  ;;  %v7161_v20 = vmul.f32 0.125, %v7011_v9 }
 0x2d0   : > { %5225 = vmatpush3.msra.mxu1 %v6828_v46  ;;  %v7118_v46 = vmul.f32 0.125, %v6866_v57  ;;  %9372 = vst [vmem:[#allocation37_spill] sm:$0xff] %v7141_v54  ;;  %v7148_v57 = vmul.f32 0.125, %v6976_v59  ;;  %9375 = vst [vmem:[#allocation40_spill] sm:$0xff] %v7171_v44  ;;  %v7178_v59 = vmul.f32 0.125, %v7041_v61  ;;  %v7248_v61 = vadd.s32 48, %v6793_v13 }
 0x2d1   : > { %1255 = vst [vmem:[%s6820_s25 + $0x78] sm:$0xff] %v1077_v21  ;;  %5226 = vmatprep.subr.mxu1 %v6841_v43  ;;  %1916 = vrot.lane.b32.xlu0 %v1077_v21, %s6291_s17  ;;  %9369 = vst [vmem:[#allocation34_spill] sm:$0xff] %v7111_v27  ;;  %s6149_s25 = scalar_lea.vmem %s6148_s9, 4096 }
 0x2d2   : > { %5140 = vmatprep.subr.msk.mxu0 %vm1307_vm0, %v1077_v21  ;;  %5227 = vmatpush3.msra.mxu1 %v6841_v43  ;;  %v7121_v43 = vmul.f32 0.125, %v6884_v62  ;;  %9371 = vst [vmem:[#allocation36_spill] sm:$0xff] %v7131_v48  ;;  %v7151_v62 = vmul.f32 0.125, %v6988_v0  ;;  %9374 = vst [vmem:[#allocation39_spill] sm:$0xff] %v7161_v20 }
 0x2d3   : > { %5141 = vmatpush3.xpose.msk.msra.mxu0 %vm1307_vm0, %v1077_v21  ;;  %9383 = vst [vmem:[#allocation48_spill] sm:$0xff] %v7248_v61 }
 0x2d4   : > { %5142 = vmatprep.subr.msk.mxu0 %vm1307_vm0, %v1071_v15  ;;  %9370 = vst [vmem:[#allocation35_spill] sm:$0xff] %v7121_v43  ;;  %9373 = vst [vmem:[#allocation38_spill] sm:$0xff] %v7151_v62 }
 0x2d7   : > { %5143 = vmatpush3.xpose.msk.msra.mxu0 %vm1307_vm0, %v1071_v15 }
 0x2d8   : > { %5144 = vmatprep.subr.msk.mxu0 %vm1307_vm0, %v1065_v40 }
 0x2db   : > { %5145 = vmatpush3.xpose.msk.msra.mxu0 %vm1307_vm0, %v1065_v40  ;;  %v7226_v40 = vadd.s32 32, %v6793_v13 }
 0x2dc   : > { %5146 = vmatprep.subr.msk.mxu0 %vm1307_vm0, %v1059_v23 }
 0x2dd   : > { %9381 = vst [vmem:[#allocation46_spill] sm:$0xff] %v7226_v40 }
 0x2df   : > { %5147 = vmatpush3.xpose.msk.msra.mxu0 %vm1307_vm0, %v1059_v23 }
 0x2e0   : > { %5148 = vmatprep.subr.msk.mxu0 %vm1307_vm0, %v1053_v19 }
 0x2e3   : > { %5149 = vmatpush3.xpose.msk.msra.mxu0 %vm1307_vm0, %v1053_v19  ;;  %v7194_v19 = vand.u32 127, %v903_v51 }
 0x2e4   : > { %5150 = vmatprep.subr.msk.mxu0 %vm1307_vm0, %v6993_v5 }
 0x2e5   : > { %9377 = vst [vmem:[#allocation42_spill] sm:$0xff] %v7194_v19  ;;  %vm1292_vm1 = vcmp.le.s32.totalorder %v7194_v19, %v7191_v16  ;;  %vm1291_vm2 = vcmp.le.s32.totalorder %v7194_v19, %v6793_v13  ;;  %vm1294_vm3 = vcmp.le.s32.totalorder %v7194_v19, %v7199_v35  ;;  %vm1293_vm4 = vcmp.le.s32.totalorder %v7194_v19, %v7204_v38 }
 0x2e6   : > { %vm1296_vm5 = vcmp.le.s32.totalorder %v7194_v19, %v7215_v31  ;;  %vm1295_vm6 = vcmp.le.s32.totalorder %v7194_v19, %v7226_v40  ;;  %vm1298_vm7 = vcmp.le.s32.totalorder %v7194_v19, %v7237_v49  ;;  %vm1297_vm8 = vcmp.le.s32.totalorder %v7194_v19, %v7248_v61 }
 0x2e7   : > { %5151 = vmatpush3.xpose.msk.msra.mxu0 %vm1307_vm0, %v6993_v5 }
 0x2e8   : > { %5152 = vmatprep.subr.msk.mxu0 %vm1307_vm0, %v6981_v32 }
 0x2eb   : > { %5153 = vmatpush3.xpose.msk.msra.mxu0 %vm1307_vm0, %v6981_v32 }
 0x2ec   : > { %5154 = vmatprep.subr.msk.mxu0 %vm1307_vm0, %v6964_v53 }
 0x2ef   : > { %5155 = vmatpush3.xpose.msk.msra.mxu0 %vm1307_vm0, %v6964_v53 }
 0x2f0   : > { %5156 = vmatprep.subr.msk.mxu0 %vm1307_vm0, %v6946_v11 }
 0x2f3   : > { %5157 = vmatpush3.xpose.msk.msra.mxu0 %vm1307_vm0, %v6946_v11 }
 0x2f4   : > { %5158 = vmatprep.subr.msk.mxu0 %vm1307_vm0, %v6928_v36 }
 0x2f7   : > { %5159 = vmatpush3.xpose.msk.msra.mxu0 %vm1307_vm0, %v6928_v36 }
 0x2f8   : > { %5160 = vmatprep.subr.msk.mxu0 %vm1307_vm0, %v6910_v18 }
 0x2fb   : > { %5161 = vmatpush3.xpose.msk.msra.mxu0 %vm1307_vm0, %v6910_v18 }
 0x2fc   : > { %5162 = vmatprep.subr.msk.mxu0 %vm1307_vm0, %v6892_v2 }
 0x2ff   : > { %5163 = vmatpush3.xpose.msk.msra.mxu0 %vm1307_vm0, %v6892_v2 }
 0x300   : > { %5164 = vmatprep.subr.msk.mxu0 %vm1307_vm0, %v6874_v55 }
 0x303   : > { %5165 = vmatpush3.xpose.msk.msra.mxu0 %vm1307_vm0, %v6874_v55 }
 0x304   : > { %5166 = vmatprep.subr.msk.mxu0 %vm1307_vm0, %v6856_v52 }
 0x307   : > { %5167 = vmatpush3.xpose.msk.msra.mxu0 %vm1307_vm0, %v6856_v52 }
 0x308   : > { %5168 = vmatprep.subr.msk.mxu0 %vm1307_vm0, %v6838_v42 }
 0x30b   : > { %5169 = vmatpush3.xpose.msk.msra.mxu0 %vm1307_vm0, %v6838_v42 }
 0x30c   : > { %5170 = vmatprep.subr.msk.mxu0 %vm1307_vm0, %v6817_v10 }
 0x30f   : > { %5171 = vmatpush3.xpose.msk.msra.mxu0 %vm1307_vm0, %v6817_v10 }
 0x312   : > { %5173 = vmatmul.mubr.msk.f32.vlgmr.msra.gmra.mxu0 %vm1307_vm0, %v7108_v25 }
 0x313   : > { %5175 = vmatprep.mubr.msk.f32.mxu0 %vm1307_vm0, %v7111_v27 }
 0x316   : > { %5176 = vmatmul.mubr.msk.f32.gmra.mxu0 %vm1307_vm0, %v7118_v46 }
 0x317   : > { %5178 = vmatprep.mubr.msk.f32.mxu0 %vm1307_vm0, %v7121_v43 }
 0x31a   : > { %5179 = vmatmul.mubr.msk.f32.gmra.mxu0 %vm1307_vm0, %v7128_v37 }
 0x31b   : > { %5181 = vmatprep.mubr.msk.f32.mxu0 %vm1307_vm0, %v7131_v48 }
 0x31e   : > { %5182 = vmatmul.mubr.msk.f32.gmra.mxu0 %vm1307_vm0, %v7138_v12 }
 0x31f   : > { %5184 = vmatprep.mubr.msk.f32.mxu0 %vm1307_vm0, %v7141_v54 }
 0x322   : > { %5185 = vmatmul.mubr.msk.f32.gmra.mxu0 %vm1307_vm0, %v7148_v57 }
 0x323   : > { %5187 = vmatprep.mubr.msk.f32.mxu0 %vm1307_vm0, %v7151_v62 }
 0x326   : > { %5188 = vmatmul.mubr.msk.f32.gmra.mxu0 %vm1307_vm0, %v7158_v30 }
 0x327   : > { %5190 = vmatprep.mubr.msk.f32.mxu0 %vm1307_vm0, %v7161_v20 }
 0x32a   : > { %5191 = vmatmul.mubr.msk.f32.gmra.mxu0 %vm1307_vm0, %v7168_v26 }
 0x32b   : > { %5193 = vmatprep.mubr.msk.f32.mxu0 %vm1307_vm0, %v7171_v44 }
 0x32e   : > { %5194 = vmatmul.mubr.msk.f32.gmra.mxu0 %vm1307_vm0, %v7178_v59 }
 0x333   : > { %v7182_v0 = vpop.permute.xlu0 %1908 }
 0x33b   : > { %v7184_v5 = vpop.permute.xlu0 %1912 }
 0x343   : > { %v7186_v7 = vpop.permute.xlu0 %1916 }
 0x344   : > { %5252 = vmatprep.subr.msk.mxu1 %vm1307_vm0, %v7186_v7 }
 0x3d2   : > { %v5174_v9 = vpop.f32.mrf.mxu0 }
 0x3d3   : > { %v7209_v23 = vsel %vm1292_vm1, %v5174_v9, -3.4028235e+38  ;;  %v7259_v9 = vadd.s32 72, %v6793_v13 }
 0x3d4   : > { %1567 = vmax.xlane.f32.xlu1 %v7209_v23  ;;  %v1470_v51 = vpop.f32.mrf.mxu0 }
 0x3d5   : > { %v7220_v29 = vsel %vm1291_vm2, %v1470_v51, -3.4028235e+38  ;;  %9384 = vst [vmem:[#allocation49_spill] sm:$0xff] %v7259_v9  ;;  %vm1300_vm9 = vcmp.le.s32.totalorder %v7194_v19, %v7259_v9 }
 0x3d6   : > { %1565 = vmax.xlane.f32.xlu0 %v7220_v29  ;;  %v5177_v33 = vpop.f32.mrf.mxu0 }
 0x3d7   : > { %v7231_v41 = vsel %vm1294_vm3, %v5177_v33, -3.4028235e+38 }
 0x3d8   : > { %1571 = vmax.xlane.f32.xlu1 %v7231_v41  ;;  %v1480_v47 = vpop.f32.mrf.mxu0 }
 0x3d9   : > { %v7242_v15 = vsel %vm1293_vm4, %v1480_v47, -3.4028235e+38  ;;  %v7270_v47 = vadd.s32 64, %v6793_v13 }
 0x3da   : > { %1569 = vmax.xlane.f32.xlu0 %v7242_v15  ;;  %v5180_v3 = vpop.f32.mrf.mxu0 }
 0x3db   : > { %v7253_v1 = vsel %vm1296_vm5, %v5180_v3, -3.4028235e+38  ;;  %9385 = vst [vmem:[#allocation50_spill] sm:$0xff] %v7270_v47  ;;  %vm1299_vm10 = vcmp.le.s32.totalorder %v7194_v19, %v7270_v47 }
 0x3dc   : > { %1575 = vmax.xlane.f32.xlu1 %v7253_v1  ;;  %v1490_v21 = vpop.f32.mrf.mxu0 }
 0x3dd   : > { %v7264_v51 = vsel %vm1295_vm6, %v1490_v21, -3.4028235e+38  ;;  %v7281_v21 = vadd.s32 88, %v6793_v13 }
 0x3de   : > { %1573 = vmax.xlane.f32.xlu0 %v7264_v51  ;;  %v5183_v33 = vpop.f32.mrf.mxu0 }
 0x3df   : > { %v7275_v3 = vsel %vm1298_vm7, %v5183_v33, -3.4028235e+38  ;;  %9386 = vst [vmem:[#allocation51_spill] sm:$0xff] %v7281_v21  ;;  %v7292_v33 = vadd.s32 80, %v6793_v13  ;;  %vm1302_vm11 = vcmp.le.s32.totalorder %v7194_v19, %v7281_v21 }
 0x3e0   : > { %1579 = vmax.xlane.f32.xlu1 %v7275_v3  ;;  %v1500_v17 = vpop.f32.mrf.mxu0 }
 0x3e1   : > { %v7286_v24 = vsel %vm1297_vm8, %v1500_v17, -3.4028235e+38  ;;  %9387 = vst [vmem:[#allocation52_spill] sm:$0xff] %v7292_v33  ;;  %v7303_v17 = vadd.s32 104, %v6793_v13  ;;  %vm9233_vm12 = vcmp.le.s32.totalorder %v7194_v19, %v7292_v33 }
 0x3e2   : > { %1577 = vmax.xlane.f32.xlu0 %v7286_v24  ;;  %v5186_v14 = vpop.f32.mrf.mxu0 }
 0x3e3   : > { %v7297_v49 = vsel %vm1300_vm9, %v5186_v14, -3.4028235e+38  ;;  %9388 = vst [vmem:[#allocation53_spill] sm:$0xff] %v7303_v17  ;;  %v7314_v14 = vadd.s32 96, %v6793_v13  ;;  %vm1304_vm13 = vcmp.le.s32.totalorder %v7194_v19, %v7303_v17 }
 0x3e4   : > { %1583 = vmax.xlane.f32.xlu1 %v7297_v49  ;;  %v1510_v40 = vpop.f32.mrf.mxu0 }
 0x3e5   : > { %v7308_v61 = vsel %vm1299_vm10, %v1510_v40, -3.4028235e+38  ;;  %9389 = vst [vmem:[#allocation54_spill] sm:$0xff] %v7314_v14  ;;  %v7325_v40 = vadd.s32 120, %v6793_v13  ;;  %vm1303_vm14 = vcmp.le.s32.totalorder %v7194_v19, %v7314_v14 }
 0x3e6   : > { %1581 = vmax.xlane.f32.xlu0 %v7308_v61  ;;  %v5189_v31 = vpop.f32.mrf.mxu0 }
 0x3e7   : > { %v7319_v9 = vsel %vm1302_vm11, %v5189_v31, -3.4028235e+38  ;;  %9390 = vst [vmem:[#allocation55_spill] sm:$0xff] %v7325_v40  ;;  %v7333_v31 = vadd.s32 112, %v6793_v13  ;;  %vm1306_vm15 = vcmp.le.s32.totalorder %v7194_v19, %v7325_v40 }
 0x3e8   : > { %1587 = vmax.xlane.f32.xlu1 %v7319_v9  ;;  %v1520_v38 = vpop.f32.mrf.mxu0 }
 0x3e9   : > { %v1559_v47 = vsel %vm9233_vm12, %v1520_v38, -3.4028235e+38  ;;  %9391 = vst [vmem:[#allocation56_spill] sm:$0xff] %v7333_v31  ;;  %vm1305_vm12 = vcmp.le.s32.totalorder %v7194_v19, %v7333_v31 }
 0x3ea   : > { %1585 = vmax.xlane.f32.xlu0 %v1559_v47  ;;  %v5192_v35 = vpop.f32.mrf.mxu0 }
 0x3eb   : > { %v7338_v21 = vsel %vm1304_vm13, %v5192_v35, -3.4028235e+38 }
 0x3ec   : > { %1591 = vmax.xlane.f32.xlu1 %v7338_v21  ;;  %v1530_v16 = vpop.f32.mrf.mxu0 }
 0x3ed   : > { %v7346_v38 = vsel %vm1303_vm14, %v1530_v16, -3.4028235e+38  ;;  %v7362_v16 = vpop.permute.xlu1 %1906 }
 0x3ee   : > { %1589 = vmax.xlane.f32.xlu0 %v7346_v38  ;;  %v5195_v33 = vpop.f32.mrf.mxu0 }
 0x3ef   : > { %v1564_v35 = vsel %vm1306_vm15, %v5195_v33, -3.4028235e+38 }
 0x3f0   : > { %1595 = vmax.xlane.f32.xlu1 %v1564_v35  ;;  %v1540_v17 = vpop.f32.mrf.mxu0 }
 0x3f1   : > { %v7357_v13 = vsel %vm1305_vm12, %v1540_v17, -3.4028235e+38  ;;  %v7364_v14 = vpop.permute.xlu1 %1910 }
 0x3f2   : > { %1593 = vmax.xlane.f32.xlu0 %v7357_v13 }
 0x3f5   : > { %v7366_v60 = vpop.permute.xlu1 %1914 }
 0x408   : > { %1904 = vrot.lane.b32.xlu0 %v6981_v32, %s6291_s17 }
 0x45d   : > { %v1568_v40 = vpop.xlane.xlu1 %1567 }
 0x45e   : > { %v1598_v33 = vsub.f32 %v7209_v23, %v1568_v40 }
 0x45f   : > { %v1566_v63 = vpop.xlane.xlu0 %1565 }
 0x460   : > { %v1615_v22 = vmul.f32 1.442695, %v1598_v33  ;;  %v1597_v31 = vsub.f32 %v7220_v29, %v1566_v63 }
 0x461   : > { %v1572_v8 = vpop.xlane.xlu1 %1571 }
 0x462   : > { %5651 = vpow2.f32 %v1615_v22  ;;  %v1613_v17 = vmul.f32 1.442695, %v1597_v31 }
 0x463   : > { %v1570_v56 = vpop.xlane.xlu0 %1569 }
 0x464   : > { %5653 = vpow2.f32 %v1613_v17  ;;  %v1599_v54 = vsub.f32 %v7242_v15, %v1570_v56 }
 0x465   : > { %v1576_v34 = vpop.xlane.xlu1 %1575 }
 0x466   : > { %v1617_v43 = vmul.f32 1.442695, %v1599_v54 }
 0x467   : > { %v1574_v40 = vpop.xlane.xlu0 %1573 }
 0x469   : > { %v1580_v23 = vpop.xlane.xlu1 %1579 }
 0x46b   : > { %v1578_v22 = vpop.xlane.xlu0 %1577 }
 0x46c   : > { %v1603_v44 = vsub.f32 %v7286_v24, %v1578_v22 }
 0x46d   : > { %v1584_v63 = vpop.xlane.xlu1 %1583 }
 0x46e   : > { %v1625_v20 = vmul.f32 1.442695, %v1603_v44 }
 0x46f   : > { %v7370_v19 = vpop.eup %5651  ;;  %v1582_v31 = vpop.xlane.xlu0 %1581 }
 0x470   : > { %1647 = vadd.xlane.f32.xlu1 %v7370_v19 }
 0x471   : > { %v7373_v32 = vpop.eup %5653  ;;  %v1588_v29 = vpop.xlane.xlu1 %1587 }
 0x472   : > { %1645 = vadd.xlane.f32.xlu0 %v7373_v32 }
 0x475   : > { %v1592_v33 = vpop.xlane.xlu1 %1591 }
 0x481   : > { %1900 = vrot.lane.b32.xlu1 %v6946_v11, %s6291_s17  ;;  %v1600_v11 = vsub.f32 %v7231_v41, %v1572_v8  ;;  %v1601_v41 = vsub.f32 %v7264_v51, %v1574_v40  ;;  %v1610_v51 = vsub.f32 %v7338_v21, %v1592_v33 }
 0x483   : > { %v1619_v17 = vmul.f32 1.442695, %v1600_v11  ;;  %v1621_v44 = vmul.f32 1.442695, %v1601_v41  ;;  %v9398_v11 = vld [vmem:[#allocation40_spill] sm:$0xff] }
 0x485   : > { %1898 = vrot.lane.b32.xlu1 %v6928_v36, %s6291_s17  ;;  %v1586_v36 = vpop.xlane.xlu0 %1585  ;;  %5655 = vpow2.f32 %v1619_v17 }
 0x486   : > { %v1607_v62 = vsub.f32 %v1559_v47, %v1586_v36  ;;  %5657 = vpow2.f32 %v1625_v20  ;;  %v1604_v47 = vsub.f32 %v7275_v3, %v1580_v23  ;;  %v1639_v23 = vmul.f32 1.442695, %v1610_v51  ;;  %v9399_v36 = vld [vmem:[#allocation33_spill] sm:$0xff]  ;;  %v9402_v51 = vld [vmem:[#allocation30_spill] sm:$0xff] }
 0x488   : > { %1902 = vrot.lane.b32.xlu0 %v6964_v53, %s6291_s17  ;;  %v1596_v53 = vpop.xlane.xlu1 %1595  ;;  %v1627_v54 = vmul.f32 1.442695, %v1604_v47 }
 0x489   : > { %1896 = vrot.lane.b32.xlu1 %v6910_v18, %s6291_s17  ;;  %v1633_v18 = vmul.f32 1.442695, %v1607_v62  ;;  %v1612_v48 = vsub.f32 %v1564_v35, %v1596_v53  ;;  %v1590_v35 = vpop.xlane.xlu0 %1589 }
 0x48a   : > { %v1609_v40 = vsub.f32 %v7346_v38, %v1590_v35 }
 0x48b   : > { %5659 = vpow2.f32 %v1633_v18  ;;  %v1643_v27 = vmul.f32 1.442695, %v1612_v48  ;;  %v1605_v48 = vsub.f32 %v7308_v61, %v1582_v31 }
 0x48c   : > { %5661 = vpow2.f32 %v1617_v43 }
 0x48d   : > { %1894 = vrot.lane.b32.xlu1 %v6892_v2, %s6291_s17  ;;  %v1602_v2 = vsub.f32 %v7253_v1, %v1576_v34  ;;  %5663 = vpow2.f32 %v1643_v27  ;;  %v1606_v34 = vsub.f32 %v7297_v49, %v1584_v63  ;;  %v1629_v15 = vmul.f32 1.442695, %v1605_v48 }
 0x48e   : > { %v1608_v49 = vsub.f32 %v7319_v9, %v1588_v29  ;;  %v1637_v63 = vmul.f32 1.442695, %v1609_v40 }
 0x48f   : > { %v1623_v8 = vmul.f32 1.442695, %v1602_v2  ;;  %v1631_v27 = vmul.f32 1.442695, %v1606_v34 }
 0x490   : > { %v1635_v61 = vmul.f32 1.442695, %v1608_v49 }
 0x491   : > { %5665 = vpow2.f32 %v1623_v8  ;;  %v9400_v8 = vld [vmem:[#allocation32_spill] sm:$0xff] }
 0x492   : > { %v7391_v24 = vpop.eup %5655  ;;  %5667 = vpow2.f32 %v1621_v44 }
 0x493   : > { %v7395_v56 = vpop.eup %5657  ;;  %5669 = vpow2.f32 %v1627_v54 }
 0x494   : > { %5671 = vpow2.f32 %v1631_v27  ;;  %v9401_v27 = vld [vmem:[#allocation31_spill] sm:$0xff] }
 0x495   : > { %5673 = vpow2.f32 %v1629_v15 }
 0x496   : > { %5675 = vpow2.f32 %v1635_v61 }
 0x497   : > { %5677 = vpow2.f32 %v1639_v23 }
 0x498   : > { %v7399_v43 = vpop.eup %5659  ;;  %5679 = vpow2.f32 %v1637_v63  ;;  %v9403_v63 = vld [vmem:[#allocation29_spill] sm:$0xff] }
 0x499   : > { %v7403_v62 = vpop.eup %5661 }
 0x49a   : > { %v7406_v20 = vpop.eup %5663 }
 0x49e   : > { %v7410_v1 = vpop.eup %5665 }
 0x49f   : > { %v7414_v3 = vpop.eup %5667 }
 0x4a0   : > { %v7418_v9 = vpop.eup %5669 }
 0x4a1   : > { %v7421_v22 = vpop.eup %5671 }
 0x4a2   : > { %v7424_v21 = vpop.eup %5673 }
 0x4a3   : > { %v7427_v29 = vpop.eup %5675 }
 0x4a4   : > { %v7432_v38 = vpop.eup %5677 }
 0x4a5   : > { %v7437_v31 = vpop.eup %5679 }
 0x4a7   : > { %1651 = vadd.xlane.f32.xlu0 %v7391_v24 }
 0x4ab   : > { %1657 = vadd.xlane.f32.xlu0 %v7395_v56 }
 0x4af   : > { %1665 = vadd.xlane.f32.xlu0 %v7399_v43 }
 0x4b1   : > { %1649 = vadd.xlane.f32.xlu1 %v7403_v62 }
 0x4b3   : > { %1675 = vadd.xlane.f32.xlu0 %v7406_v20 }
 0x4b5   : > { %1655 = vadd.xlane.f32.xlu1 %v7410_v1 }
 0x4b9   : > { %1653 = vadd.xlane.f32.xlu1 %v7414_v3 }
 0x4bd   : > { %1659 = vadd.xlane.f32.xlu1 %v7418_v9 }
 0x4c1   : > { %1663 = vadd.xlane.f32.xlu1 %v7421_v22 }
 0x4c5   : > { %1661 = vadd.xlane.f32.xlu1 %v7424_v21 }
 0x4c9   : > { %1667 = vadd.xlane.f32.xlu1 %v7427_v29  ;;  %1892 = vrot.lane.b32.xlu0 %v6874_v55, %s6291_s17  ;;  %v1594_v55 = vpop.xlane.xlu0 %1593 }
 0x4cd   : > { %1671 = vadd.xlane.f32.xlu1 %v7432_v38  ;;  %1860 = vrot.lane.b32.xlu0 %v7118_v46, %s6291_s17 }
 0x4d1   : > { %1864 = vrot.lane.b32.xlu0 %v7128_v37, %s6291_s17  ;;  %1669 = vadd.xlane.f32.xlu1 %v7437_v31 }
 0x4d5   : > { %1868 = vrot.lane.b32.xlu0 %v7138_v12, %s6291_s17  ;;  %v9393_v12 = vld [vmem:[#allocation35_spill] sm:$0xff] }
 0x4d9   : > { %1872 = vrot.lane.b32.xlu0 %v7148_v57, %s6291_s17 }
 0x4dd   : > { %1876 = vrot.lane.b32.xlu0 %v7158_v30, %s6291_s17 }
 0x4e1   : > { %1880 = vrot.lane.b32.xlu0 %v7168_v26, %s6291_s17  ;;  %v9395_v26 = vld [vmem:[#allocation37_spill] sm:$0xff] }
 0x4e2   : > { %1890 = vrot.lane.b32.xlu1 %v6856_v52, %s6291_s17 }
 0x4e5   : > { %1884 = vrot.lane.b32.xlu0 %v7178_v59, %s6291_s17 }
 0x4e6   : > { %1888 = vrot.lane.b32.xlu1 %v6838_v42, %s6291_s17  ;;  %v1905_v42 = vpop.permute.xlu0 %1904 }
 0x4e9   : > { %2333 = vrot.lane.b32.xlu0 %v6959_v45, %s6291_s17  ;;  %v1611_v45 = vsub.f32 %v7357_v13, %v1594_v55 }
 0x4ea   : > { %1886 = vrot.lane.b32.xlu1 %v6817_v10, %s6291_s17 }
 0x4ed   : > { %2329 = vrot.lane.b32.xlu0 %v6941_v28, %s6291_s17 }
 0x4ee   : > { %1854 = vrot.lane.b32.xlu1 %v6814_v39, %s6291_s17  ;;  %v1641_v39 = vmul.f32 1.442695, %v1611_v45 }
 0x4f1   : > { %2323 = vrot.lane.b32.xlu0 %v6931_v50, %s6291_s17 }
 0x4f5   : > { %2321 = vrot.lane.b32.xlu0 %v6905_v6, %s6291_s17 }
 0x4f9   : > { %v1648_v52 = vpop.xlane.xlu1 %1647  ;;  %2315 = vrot.lane.b32.xlu0 %v6895_v4, %s6291_s17  ;;  %v9392_v4 = vld [vmem:[#allocation34_spill] sm:$0xff] }
 0x4fa   : > { %5681 = vrcp.f32 %v1648_v52 }
 0x4fb   : > { %v1646_v10 = vpop.xlane.xlu0 %1645 }
 0x4fc   : > { %5683 = vrcp.f32 %v1646_v10 }
 0x4fd   : > { %2313 = vrot.lane.b32.xlu0 %v6869_v58, %s6291_s17  ;;  %5685 = vpow2.f32 %v1641_v39  ;;  %v1901_v58 = vpop.permute.xlu1 %1900 }
 0x501   : > { %v1899_v37 = vpop.permute.xlu1 %1898 }
 0x505   : > { %v1897_v57 = vpop.permute.xlu1 %1896 }
 0x507   : > { %v5682_v28 = vpop.eup %5681 }
 0x508   : > { %v1694_v6 = vmul.f32 %v5682_v28, %v7370_v19 }
 0x509   : > { %v5684_v50 = vpop.eup %5683 }
 0x50a   : > { %v1693_v46 = vmul.f32 %v5684_v50, %v7373_v32  ;;  %v7479_v13 = vpop.eup %5685 }
 0x50c   : > { %5228 = vmatprep.mubr.f32.mxu1 %v1693_v46 }
 0x50d   : > { %5229 = vmatmul.mubr.f32.vlgmr.msra.gmra.mxu1 %v1694_v6 }
 0x50e   : > { %5253 = vmatpush3.xpose.msk.msra.mxu1 %vm1307_vm0, %v7186_v7 }
 0x50f   : > { %5254 = vmatprep.subr.msk.mxu1 %vm1307_vm0, %v7366_v60 }
 0x512   : > { %5255 = vmatpush3.xpose.msk.msra.mxu1 %vm1307_vm0, %v7366_v60  ;;  %1673 = vadd.xlane.f32.xlu1 %v7479_v13  ;;  %v1903_v60 = vpop.permute.xlu0 %1902 }
 0x513   : > { %5256 = vmatprep.subr.msk.mxu1 %vm1307_vm0, %v7184_v5 }
 0x516   : > { %5257 = vmatpush3.xpose.msk.msra.mxu1 %vm1307_vm0, %v7184_v5  ;;  %v9396_v5 = vld [vmem:[#allocation38_spill] sm:$0xff] }
 0x517   : > { %5258 = vmatprep.subr.msk.mxu1 %vm1307_vm0, %v7364_v14 }
 0x51a   : > { %5259 = vmatpush3.xpose.msk.msra.mxu1 %vm1307_vm0, %v7364_v14  ;;  %v9397_v14 = vld [vmem:[#allocation39_spill] sm:$0xff] }
 0x51b   : > { %5260 = vmatprep.subr.msk.mxu1 %vm1307_vm0, %v7182_v0 }
 0x51e   : > { %5261 = vmatpush3.xpose.msk.msra.mxu1 %vm1307_vm0, %v7182_v0  ;;  %v1895_v0 = vpop.permute.xlu1 %1894 }
 0x51f   : > { %5262 = vmatprep.subr.msk.mxu1 %vm1307_vm0, %v7362_v16 }
 0x522   : > { %5263 = vmatpush3.xpose.msk.msra.mxu1 %vm1307_vm0, %v7362_v16 }
 0x523   : > { %5264 = vmatprep.subr.msk.mxu1 %vm1307_vm0, %v1905_v42  ;;  %1856 = vrot.lane.b32.xlu1 %v7108_v25, %s6291_s17  ;;  %v9394_v25 = vld [vmem:[#allocation36_spill] sm:$0xff] }
 0x526   : > { %5265 = vmatpush3.xpose.msk.msra.mxu1 %vm1307_vm0, %v1905_v42 }
 0x527   : > { %5266 = vmatprep.subr.msk.mxu1 %vm1307_vm0, %v1903_v60  ;;  %1858 = vrot.lane.b32.xlu1 %v9392_v4, %s6291_s17 }
 0x52a   : > { %5267 = vmatpush3.xpose.msk.msra.mxu1 %vm1307_vm0, %v1903_v60 }
 0x52b   : > { %5268 = vmatprep.subr.msk.mxu1 %vm1307_vm0, %v1901_v58  ;;  %1862 = vrot.lane.b32.xlu1 %v9393_v12, %s6291_s17 }
 0x52e   : > { %5269 = vmatpush3.xpose.msk.msra.mxu1 %vm1307_vm0, %v1901_v58 }
 0x52f   : > { %5270 = vmatprep.subr.msk.mxu1 %vm1307_vm0, %v1899_v37  ;;  %1866 = vrot.lane.b32.xlu1 %v9394_v25, %s6291_s17 }
 0x530   : > { %v1652_v30 = vpop.xlane.xlu0 %1651 }
 0x531   : > { %5687 = vrcp.f32 %v1652_v30 }
 0x532   : > { %5271 = vmatpush3.xpose.msk.msra.mxu1 %vm1307_vm0, %v1899_v37 }
 0x533   : > { %5272 = vmatprep.subr.msk.mxu1 %vm1307_vm0, %v1897_v57  ;;  %1870 = vrot.lane.b32.xlu1 %v9395_v26, %s6291_s17 }
 0x534   : > { %v1658_v59 = vpop.xlane.xlu0 %1657 }
 0x536   : > { %5273 = vmatpush3.xpose.msk.msra.mxu1 %vm1307_vm0, %v1897_v57 }
 0x537   : > { %5274 = vmatprep.subr.msk.mxu1 %vm1307_vm0, %v1895_v0  ;;  %1874 = vrot.lane.b32.xlu1 %v9396_v5, %s6291_s17 }
 0x538   : > { %v1666_v7 = vpop.xlane.xlu0 %1665 }
 0x53a   : > { %5275 = vmatpush3.xpose.msk.msra.mxu1 %vm1307_vm0, %v1895_v0  ;;  %v1650_v19 = vpop.xlane.xlu1 %1649 }
 0x53b   : > { %5689 = vrcp.f32 %v1650_v19  ;;  %1878 = vrot.lane.b32.xlu1 %v9397_v14, %s6291_s17 }
 0x53c   : > { %v7526_v16 = vpop.xlane.xlu0 %1675  ;;  %5691 = vrcp.f32 %v1658_v59 }
 0x53e   : > { %v1656_v32 = vpop.xlane.xlu1 %1655  ;;  %v5688_v2 = vpop.eup %5687 }
 0x53f   : > { %1882 = vrot.lane.b32.xlu1 %v9398_v11, %s6291_s17  ;;  %5693 = vrcp.f32 %v1656_v32  ;;  %v1696_v34 = vmul.f32 %v5688_v2, %v7391_v24 }
 0x540   : > { %v1893_v33 = vpop.permute.xlu0 %1892 }
 0x541   : > { %5276 = vmatprep.subr.msk.mxu1 %vm1307_vm0, %v1893_v33 }
 0x542   : > { %v1654_v17 = vpop.xlane.xlu1 %1653  ;;  %5277 = vmatpush3.xpose.msk.msra.mxu1 %vm1307_vm0, %v1893_v33 }
 0x543   : > { %5695 = vrcp.f32 %v1654_v17  ;;  %2331 = vrot.lane.b32.xlu1 %v9399_v36, %s6291_s17 }
 0x544   : > { %v7534_v53 = vpop.permute.xlu0 %1860 }
 0x546   : > { %v1660_v18 = vpop.xlane.xlu1 %1659 }
 0x547   : > { %5697 = vrcp.f32 %v1660_v18  ;;  %2327 = vrot.lane.b32.xlu1 %v9400_v8, %s6291_s17 }
 0x548   : > { %v5690_v41 = vpop.eup %5689  ;;  %v7538_v44 = vpop.permute.xlu0 %1864  ;;  %5699 = vrcp.f32 %v1666_v7 }
 0x549   : > { %v1695_v47 = vmul.f32 %v5690_v41, %v7403_v62  ;;  %v5692_v15 = vpop.eup %5691  ;;  %v9405_v41 = vmov 0.0  }
 0x54a   : > { %v1664_v54 = vpop.xlane.xlu1 %1663  ;;  %v1699_v55 = vmul.f32 %v5692_v15, %v7395_v56 }
 0x54b   : > { %2325 = vrot.lane.b32.xlu1 %v9401_v27, %s6291_s17  ;;  %5231 = vmatprep.mubr.f32.mxu1 %v1695_v47  ;;  %5701 = vrcp.f32 %v1664_v54 }
 0x54c   : > { %5232 = vmatmul.mubr.f32.gmra.mxu1 %v1696_v34  ;;  %v7544_v48 = vpop.permute.xlu0 %1868  ;;  %v5694_v61 = vpop.eup %5693 }
 0x54d   : > { %v1698_v40 = vmul.f32 %v5694_v61, %v7410_v1 }
 0x54e   : > { %v1662_v49 = vpop.xlane.xlu1 %1661 }
 0x54f   : > { %5703 = vrcp.f32 %v1662_v49  ;;  %2319 = vrot.lane.b32.xlu1 %v9402_v51, %s6291_s17 }
 0x550   : > { %v5696_v62 = vpop.eup %5695  ;;  %v7548_v35 = vpop.permute.xlu0 %1872 }
 0x551   : > { %v1697_v24 = vmul.f32 %v5696_v62, %v7414_v3  ;;  %v9404_v3 = vld [vmem:[#allocation28_spill] sm:$0xff] }
 0x552   : > { %v1668_v23 = vpop.xlane.xlu1 %1667 }
 0x553   : > { %5705 = vrcp.f32 %v1668_v23  ;;  %2317 = vrot.lane.b32.xlu1 %v9403_v63, %s6291_s17  ;;  %5234 = vmatprep.mubr.f32.mxu1 %v1697_v24 }
 0x554   : > { %v5698_v42 = vpop.eup %5697  ;;  %5235 = vmatmul.mubr.f32.gmra.mxu1 %v1698_v40  ;;  %v7555_v52 = vpop.permute.xlu0 %1876 }
 0x555   : > { %5237 = vmatprep.mubr.f32.mxu1 %v1699_v55  ;;  %v1700_v10 = vmul.f32 %v5698_v42, %v7418_v9  ;;  %v5700_v39 = vpop.eup %5699 }
 0x556   : > { %v1672_v45 = vpop.xlane.xlu1 %1671  ;;  %v1703_v60 = vmul.f32 %v5700_v39, %v7399_v43 }
 0x557   : > { %2311 = vrot.lane.b32.xlu1 %v9404_v3, %s6291_s17  ;;  %5707 = vrcp.f32 %v1672_v45  ;;  %v9406_v45 = vld [vmem:[#allocation42_spill] sm:$0xff] }
 0x558   : > { %5238 = vmatmul.mubr.f32.gmra.mxu1 %v1700_v10  ;;  %v7560_v1 = vpop.permute.xlu0 %1880  ;;  %v5702_v50 = vpop.eup %5701 }
 0x559   : > { %v1702_v9 = vmul.f32 %v5702_v50, %v7421_v22 }
 0x55a   : > { %v1670_v28 = vpop.xlane.xlu1 %1669 }
 0x55b   : > { %5709 = vrcp.f32 %v1670_v28 }
 0x55c   : > { %v5704_v56 = vpop.eup %5703  ;;  %v7562_v46 = vpop.permute.xlu0 %1884  ;;  %5711 = vrcp.f32 %v7526_v16 }
 0x55d   : > { %v1701_v6 = vmul.f32 %v5704_v56, %v7424_v21 }
 0x55e   : > { %v1891_v58 = vpop.permute.xlu1 %1890 }
 0x55f   : > { %5240 = vmatprep.mubr.f32.mxu1 %v1701_v6  ;;  %5278 = vmatprep.subr.msk.mxu1 %vm1307_vm0, %v1891_v58 }
 0x560   : > { %v5706_v4 = vpop.eup %5705  ;;  %5241 = vmatmul.mubr.f32.gmra.mxu1 %v1702_v9  ;;  %v2334_v37 = vpop.permute.xlu0 %2333 }
 0x561   : > { %5279 = vmatpush3.xpose.msk.msra.mxu1 %vm1307_vm0, %v1891_v58  ;;  %5243 = vmatprep.mubr.f32.mxu1 %v1703_v60  ;;  %v1704_v12 = vmul.f32 %v5706_v4, %v7427_v29 }
 0x562   : > { %5308 = vmatprep.subr.mxu0 %v2334_v37  ;;  %v1889_v25 = vpop.permute.xlu1 %1888 }
 0x563   : > { %5309 = vmatpush3.msra.mxu0 %v2334_v37  ;;  %5280 = vmatprep.subr.msk.mxu1 %vm1307_vm0, %v1889_v25 }
 0x564   : > { %5244 = vmatmul.mubr.f32.gmra.mxu1 %v1704_v12  ;;  %v5708_v21 = vpop.eup %5707 }
 0x565   : > { %5281 = vmatpush3.xpose.msk.msra.mxu1 %vm1307_vm0, %v1889_v25  ;;  %v1706_v30 = vmul.f32 %v5708_v21, %v7432_v38 }
 0x566   : > { %v1887_v22 = vpop.permute.xlu1 %1886 }
 0x567   : > { %5282 = vmatprep.subr.msk.mxu1 %vm1307_vm0, %v1887_v22 }
 0x568   : > { %v5710_v43 = vpop.eup %5709 }
 0x569   : > { %5283 = vmatpush3.xpose.msk.msra.mxu1 %vm1307_vm0, %v1887_v22  ;;  %v1705_v57 = vmul.f32 %v5710_v43, %v7437_v31  ;;  %v5712_v7 = vpop.eup %5711 }
 0x56a   : > { %v1855_v29 = vpop.permute.xlu1 %1854  ;;  %v1708_v11 = vmul.f32 %v5712_v7, %v7406_v20  ;;  %v2330_v20 = vpop.permute.xlu0 %2329 }
 0x56b   : > { %5246 = vmatprep.mubr.f32.mxu1 %v1705_v57 }
 0x56c   : > { %5247 = vmatmul.mubr.f32.gmra.mxu1 %v1706_v30 }
 0x56e   : > { %v2324_v17 = vpop.permute.xlu0 %2323 }
 0x59b   : > { %v1674_v26 = vpop.xlane.xlu1 %1673 }
 0x59c   : > { %5713 = vrcp.f32 %v1674_v26 }
 0x59f   : > { %v1857_v59 = vpop.permute.xlu1 %1856 }
 0x5a3   : > { %v1859_v0 = vpop.permute.xlu1 %1858 }
 0x5a7   : > { %v1863_v5 = vpop.permute.xlu1 %1862 }
 0x5a9   : > { %v5714_v19 = vpop.eup %5713 }
 0x5aa   : > { %v1707_v14 = vmul.f32 %v5714_v19, %v7479_v13 }
 0x5ab   : > { %v1867_v32 = vpop.permute.xlu1 %1866 }
 0x5ac   : > { %5249 = vmatprep.mubr.f32.mxu1 %v1707_v14 }
 0x5ad   : > { %5250 = vmatmul.mubr.f32.gmra.mxu1 %v1708_v11 }
 0x5ae   : > { %5284 = vmatprep.mubr.msk.f32.mxu1 %vm1307_vm0, %v1855_v29 }
 0x5af   : > { %v1871_v38 = vpop.permute.xlu1 %1870 }
 0x5b1   : > { %5285 = vmatmul.mubr.msk.f32.vlgmr.msra.gmra.mxu1 %vm1307_vm0, %v1857_v59 }
 0x5b2   : > { %5287 = vmatprep.mubr.msk.f32.mxu1 %vm1307_vm0, %v1859_v0 }
 0x5b3   : > { %v1875_v31 = vpop.permute.xlu1 %1874 }
 0x5b5   : > { %5288 = vmatmul.mubr.msk.f32.gmra.mxu1 %vm1307_vm0, %v7534_v53  ;;  %v2322_v53 = vpop.permute.xlu0 %2321 }
 0x5b6   : > { %5290 = vmatprep.mubr.msk.f32.mxu1 %vm1307_vm0, %v1863_v5 }
 0x5b7   : > { %v1879_v16 = vpop.permute.xlu1 %1878 }
 0x5b9   : > { %5291 = vmatmul.mubr.msk.f32.gmra.mxu1 %vm1307_vm0, %v7538_v44  ;;  %v2316_v8 = vpop.permute.xlu0 %2315 }
 0x5ba   : > { %5293 = vmatprep.mubr.msk.f32.mxu1 %vm1307_vm0, %v1867_v32 }
 0x5bb   : > { %v1883_v13 = vpop.permute.xlu1 %1882 }
 0x5bd   : > { %5294 = vmatmul.mubr.msk.f32.gmra.mxu1 %vm1307_vm0, %v7544_v48  ;;  %v2314_v47 = vpop.permute.xlu0 %2313 }
 0x5be   : > { %5296 = vmatprep.mubr.msk.f32.mxu1 %vm1307_vm0, %v1871_v38 }
 0x5bf   : > { %v2332_v33 = vpop.permute.xlu1 %2331 }
 0x5c0   : > { %5310 = vmatprep.subr.mxu0 %v2332_v33 }
 0x5c1   : > { %5297 = vmatmul.mubr.msk.f32.gmra.mxu1 %vm1307_vm0, %v7548_v35  ;;  %5311 = vmatpush3.msra.mxu0 %v2332_v33  ;;  %v5939_v33 = vld [vmem:[%s6833_s13 + $0x18] sm:$0xff] }
 0x5c2   : > { %5299 = vmatprep.mubr.msk.f32.mxu1 %vm1307_vm0, %v1875_v31  ;;  %5312 = vmatprep.subr.mxu0 %v2330_v20 }
 0x5c3   : > { %v2328_v36 = vpop.permute.xlu1 %2327  ;;  %5313 = vmatpush3.msra.mxu0 %v2330_v20  ;;  %v9418_v20 = vld [vmem:[#allocation52_spill] sm:$0xff] }
 0x5c4   : > { %5314 = vmatprep.subr.mxu0 %v2328_v36 }
 0x5c5   : > { %5300 = vmatmul.mubr.msk.f32.gmra.mxu1 %vm1307_vm0, %v7555_v52  ;;  %5315 = vmatpush3.msra.mxu0 %v2328_v36 }
 0x5c6   : > { %5302 = vmatprep.mubr.msk.f32.mxu1 %vm1307_vm0, %v1879_v16 }
 0x5c7   : > { %v2326_v18 = vpop.permute.xlu1 %2325 }
 0x5c8   : > { %5316 = vmatprep.subr.mxu0 %v2326_v18 }
 0x5c9   : > { %5303 = vmatmul.mubr.msk.f32.gmra.mxu1 %vm1307_vm0, %v7560_v1  ;;  %5317 = vmatpush3.msra.mxu0 %v2326_v18 }
 0x5ca   : > { %5305 = vmatprep.mubr.msk.f32.mxu1 %vm1307_vm0, %v1883_v13  ;;  %5318 = vmatprep.subr.mxu0 %v2324_v17 }
 0x5cb   : > { %v2320_v2 = vpop.permute.xlu1 %2319  ;;  %5319 = vmatpush3.msra.mxu0 %v2324_v17  ;;  %v5940_v17 = vld [vmem:[%s6833_s13 + $0x10] sm:$0xff] }
 0x5cc   : > { %5320 = vmatprep.subr.mxu0 %v2322_v53 }
 0x5cd   : > { %5306 = vmatmul.mubr.msk.f32.gmra.mxu1 %vm1307_vm0, %v7562_v46  ;;  %5321 = vmatpush3.msra.mxu0 %v2322_v53  ;;  %v7603_v34 = vpop.f32.mrf.mxu1 }
 0x5ce   : > { %5322 = vmatprep.subr.mxu0 %v2320_v2  ;;  %3090 = vmatprep.mubr.f32.mxu1 %v9405_v41 }
 0x5cf   : > { %v2318_v44 = vpop.permute.xlu1 %2317  ;;  %5323 = vmatpush3.msra.mxu0 %v2320_v2  ;;  %v7605_v27 = vpop.f32.mrf.mxu1 }
 0x5d0   : > { %5324 = vmatprep.subr.mxu0 %v2318_v44 }
 0x5d1   : > { %5325 = vmatpush3.msra.mxu0 %v2318_v44 }
 0x5d2   : > { %5326 = vmatprep.subr.mxu0 %v2316_v8 }
 0x5d3   : > { %5327 = vmatpush3.msra.mxu0 %v2316_v8  ;;  %v2312_v54 = vpop.permute.xlu1 %2311 }
 0x5d4   : > { %5328 = vmatprep.subr.mxu0 %v2314_v47 }
 0x5d5   : > { %5329 = vmatpush3.msra.mxu0 %v2314_v47 }
 0x5d6   : > { %5330 = vmatprep.subr.mxu0 %v2312_v54 }
 0x5d7   : > { %5331 = vmatpush3.msra.mxu0 %v2312_v54 }
 0x60c   : > { %v7607_v48 = vpop.f32.mrf.mxu1 }
 0x60e   : > { %v7609_v15 = vpop.f32.mrf.mxu1 }
 0x614   : > { %v7611_v49 = vpop.f32.mrf.mxu1 }
 0x616   : > { %v7613_v61 = vpop.f32.mrf.mxu1 }
 0x618   : > { %v7615_v51 = vpop.f32.mrf.mxu1 }
 0x61a   : > { %v7617_v62 = vpop.f32.mrf.mxu1 }
 0x620   : > { %v7619_v35 = vpop.f32.mrf.mxu1 }
 0x622   : > { %v7621_v24 = vpop.f32.mrf.mxu1 }
 0x624   : > { %v7623_v23 = vpop.f32.mrf.mxu1 }
 0x626   : > { %v7625_v40 = vpop.f32.mrf.mxu1 }
 0x62c   : > { %v7627_v63 = vpop.f32.mrf.mxu1 }
 0x62e   : > { %v7629_v55 = vpop.f32.mrf.mxu1 }
 0x66d   : > { %v7631_v42 = vpop.f32.mrf.mxu1 }
 0x66f   : > { %v7633_v52 = vpop.f32.mrf.mxu1 }
 0x671   : > { %v5286_v10 = vpop.f32.mrf.mxu1 }
 0x672   : > { %v2128_v1 = vsel %vm1292_vm1, %v5286_v10, -3.4028235e+38  ;;  %vm9419_vm1 = vcmp.le.s32.totalorder %v9406_v45, %v9418_v20 }
 0x673   : > { %2145 = vmax.xlane.f32.xlu0 %v2128_v1  ;;  %v2048_v39 = vpop.f32.mrf.mxu1 }
 0x674   : > { %v2127_v50 = vsel %vm1291_vm2, %v2048_v39, -3.4028235e+38  ;;  %v5941_v39 = vld [vmem:[%s6833_s13] sm:$0xff] }
 0x675   : > { %2143 = vmax.xlane.f32.xlu1 %v2127_v50  ;;  %v5289_v56 = vpop.f32.mrf.mxu1 }
 0x676   : > { %v2130_v58 = vsel %vm1294_vm3, %v5289_v56, -3.4028235e+38 }
 0x677   : > { %v2058_v46 = vpop.f32.mrf.mxu1 }
 0x678   : > { %v2129_v60 = vsel %vm1293_vm4, %v2058_v46, -3.4028235e+38 }
 0x679   : > { %2149 = vmax.xlane.f32.xlu1 %v2130_v58  ;;  %2147 = vmax.xlane.f32.xlu0 %v2129_v60  ;;  %v5292_v4 = vpop.f32.mrf.mxu1 }
 0x67a   : > { %v2132_v25 = vsel %vm1296_vm5, %v5292_v4, -3.4028235e+38 }
 0x67b   : > { %v2068_v37 = vpop.f32.mrf.mxu1 }
 0x67c   : > { %v2131_v21 = vsel %vm1295_vm6, %v2068_v37, -3.4028235e+38 }
 0x67d   : > { %2153 = vmax.xlane.f32.xlu1 %v2132_v25  ;;  %2151 = vmax.xlane.f32.xlu0 %v2131_v21  ;;  %v5295_v43 = vpop.f32.mrf.mxu1 }
 0x67e   : > { %v2134_v29 = vsel %vm1298_vm7, %v5295_v43, -3.4028235e+38 }
 0x67f   : > { %v2078_v57 = vpop.f32.mrf.mxu1 }
 0x680   : > { %v2133_v59 = vsel %vm1297_vm8, %v2078_v57, -3.4028235e+38 }
 0x681   : > { %2157 = vmax.xlane.f32.xlu1 %v2134_v29  ;;  %2155 = vmax.xlane.f32.xlu0 %v2133_v59  ;;  %v5298_v0 = vpop.f32.mrf.mxu1 }
 0x682   : > { %v7662_v19 = vsel %vm1300_vm9, %v5298_v0, -3.4028235e+38 }
 0x683   : > { %v2088_v5 = vpop.f32.mrf.mxu1 }
 0x684   : > { %v7667_v32 = vsel %vm1299_vm10, %v2088_v5, -3.4028235e+38 }
 0x685   : > { %2161 = vmax.xlane.f32.xlu1 %v7662_v19  ;;  %2159 = vmax.xlane.f32.xlu0 %v7667_v32  ;;  %v5301_v11 = vpop.f32.mrf.mxu1 }
 0x686   : > { %v7674_v16 = vsel %vm1302_vm11, %v5301_v11, -3.4028235e+38 }
 0x687   : > { %v2098_v38 = vpop.f32.mrf.mxu1 }
 0x688   : > { %v7679_v13 = vsel %vm9419_vm1, %v2098_v38, -3.4028235e+38 }
 0x689   : > { %2165 = vmax.xlane.f32.xlu1 %v7674_v16  ;;  %2163 = vmax.xlane.f32.xlu0 %v7679_v13  ;;  %v5304_v36 = vpop.f32.mrf.mxu1 }
 0x68a   : > { %v7690_v8 = vsel %vm1304_vm13, %v5304_v36, -3.4028235e+38 }
 0x68b   : > { %v2108_v53 = vpop.f32.mrf.mxu1 }
 0x68c   : > { %v7695_v47 = vsel %vm1303_vm14, %v2108_v53, -3.4028235e+38 }
 0x68d   : > { %v5307_v18 = vpop.f32.mrf.mxu1 }
 0x68e   : > { %v7702_v3 = vsel %vm1306_vm15, %v5307_v18, -3.4028235e+38 }
 0x68f   : > { %v2118_v54 = vpop.f32.mrf.mxu1 }
 0x690   : > { %v7707_v28 = vsel %vm1305_vm12, %v2118_v54, -3.4028235e+38 }
 0x69a   : > { %2309 = vrot.lane.b32.xlu1 %v5939_v33, %s6291_s17 }
 0x69f   : > { %2307 = vrot.lane.b32.xlu0 %v5940_v17, %s6291_s17 }
 0x6be   : > { %2169 = vmax.xlane.f32.xlu1 %v7690_v8  ;;  %2167 = vmax.xlane.f32.xlu0 %v7695_v47 }
 0x6c2   : > { %2173 = vmax.xlane.f32.xlu1 %v7702_v3  ;;  %2171 = vmax.xlane.f32.xlu0 %v7707_v28 }
 0x6fc   : > { %v2146_v56 = vpop.xlane.xlu0 %2145 }
 0x6fd   : > { %v2176_v46 = vsub.f32 %v2128_v1, %v2146_v56  ;;  %v5942_v56 = vld [vmem:[%s6833_s13 + $0x8] sm:$0xff] }
 0x6fe   : > { %v2144_v6 = vpop.xlane.xlu1 %2143 }
 0x6ff   : > { %v2193_v9 = vmul.f32 1.442695, %v2176_v46  ;;  %v2175_v4 = vsub.f32 %v2127_v50, %v2144_v6 }
 0x701   : > { %5715 = vpow2.f32 %v2193_v9  ;;  %v2191_v37 = vmul.f32 1.442695, %v2175_v4 }
 0x702   : > { %v2150_v12 = vpop.xlane.xlu1 %2149  ;;  %v2148_v22 = vpop.xlane.xlu0 %2147 }
 0x703   : > { %5717 = vpow2.f32 %v2191_v37  ;;  %v2178_v43 = vsub.f32 %v2130_v58, %v2150_v12  ;;  %v2177_v57 = vsub.f32 %v2129_v60, %v2148_v22 }
 0x705   : > { %v2197_v30 = vmul.f32 1.442695, %v2178_v43  ;;  %v2195_v45 = vmul.f32 1.442695, %v2177_v57 }
 0x706   : > { %v2154_v26 = vpop.xlane.xlu1 %2153  ;;  %v2152_v0 = vpop.xlane.xlu0 %2151 }
 0x707   : > { %5719 = vpow2.f32 %v2197_v30  ;;  %v2180_v5 = vsub.f32 %v2132_v25, %v2154_v26  ;;  %v2179_v7 = vsub.f32 %v2131_v21, %v2152_v0 }
 0x708   : > { %5721 = vpow2.f32 %v2195_v45 }
 0x709   : > { %v2201_v14 = vmul.f32 1.442695, %v2180_v5  ;;  %v2199_v1 = vmul.f32 1.442695, %v2179_v7 }
 0x70a   : > { %v2158_v11 = vpop.xlane.xlu1 %2157  ;;  %v2156_v38 = vpop.xlane.xlu0 %2155 }
 0x70b   : > { %5723 = vpow2.f32 %v2201_v14  ;;  %v2182_v50 = vsub.f32 %v2134_v29, %v2158_v11  ;;  %v2181_v31 = vsub.f32 %v2133_v59, %v2156_v38 }
 0x70c   : > { %5725 = vpow2.f32 %v2199_v1 }
 0x70d   : > { %v2205_v20 = vmul.f32 1.442695, %v2182_v50  ;;  %v2203_v33 = vmul.f32 1.442695, %v2181_v31 }
 0x70e   : > { %v7711_v58 = vpop.eup %5715  ;;  %v2162_v60 = vpop.xlane.xlu1 %2161 }
 0x70f   : > { %v2160_v17 = vpop.xlane.xlu0 %2159  ;;  %5727 = vpow2.f32 %v2205_v20  ;;  %2225 = vadd.xlane.f32.xlu0 %v7711_v58  ;;  %v2184_v46 = vsub.f32 %v7662_v19, %v2162_v60 }
 0x710   : > { %v7714_v25 = vpop.eup %5717  ;;  %5729 = vpow2.f32 %v2203_v33  ;;  %v2183_v6 = vsub.f32 %v7667_v32, %v2160_v17 }
 0x711   : > { %2223 = vadd.xlane.f32.xlu1 %v7714_v25  ;;  %v2209_v9 = vmul.f32 1.442695, %v2184_v46 }
 0x712   : > { %v2166_v21 = vpop.xlane.xlu1 %2165  ;;  %v2207_v37 = vmul.f32 1.442695, %v2183_v6 }
 0x713   : > { %v2164_v36 = vpop.xlane.xlu0 %2163  ;;  %v2186_v12 = vsub.f32 %v7674_v16, %v2166_v21  ;;  %5731 = vpow2.f32 %v2209_v9 }
 0x714   : > { %v7717_v53 = vpop.eup %5719  ;;  %v2185_v4 = vsub.f32 %v7679_v13, %v2164_v36  ;;  %5733 = vpow2.f32 %v2207_v37 }
 0x715   : > { %v7719_v29 = vpop.eup %5721  ;;  %2229 = vadd.xlane.f32.xlu0 %v7717_v53  ;;  %v2213_v43 = vmul.f32 1.442695, %v2186_v12 }
 0x716   : > { %2227 = vadd.xlane.f32.xlu1 %v7719_v29  ;;  %v2310_v59 = vpop.permute.xlu1 %2309  ;;  %v2211_v22 = vmul.f32 1.442695, %v2185_v4 }
 0x717   : > { %5332 = vmatprep.subr.mxu0 %v2310_v59  ;;  %v2308_v2 = vpop.permute.xlu0 %2307 }
 0x718   : > { %v7723_v18 = vpop.eup %5723  ;;  %5333 = vmatpush3.msra.mxu0 %v2310_v59  ;;  %5735 = vpow2.f32 %v2211_v22 }
 0x719   : > { %v7725_v44 = vpop.eup %5725  ;;  %2233 = vadd.xlane.f32.xlu0 %v7723_v18  ;;  %5334 = vmatprep.subr.mxu0 %v2308_v2  ;;  %5737 = vpow2.f32 %v2213_v43 }
 0x71a   : > { %2231 = vadd.xlane.f32.xlu1 %v7725_v44  ;;  %5335 = vmatpush3.msra.mxu0 %v2308_v2 }
 0x71c   : > { %v7729_v54 = vpop.eup %5727 }
 0x71d   : > { %v7731_v10 = vpop.eup %5729  ;;  %2237 = vadd.xlane.f32.xlu0 %v7729_v54 }
 0x71e   : > { %2235 = vadd.xlane.f32.xlu1 %v7731_v10 }
 0x720   : > { %v7747_v1 = vpop.eup %5731 }
 0x72f   : > { %2303 = vrot.lane.b32.xlu1 %v5941_v39, %s6291_s17 }
 0x733   : > { %2305 = vrot.lane.b32.xlu0 %v5942_v56, %s6291_s17 }
 0x747   : > { %v2170_v57 = vpop.xlane.xlu1 %2169  ;;  %v2168_v30 = vpop.xlane.xlu0 %2167 }
 0x748   : > { %v2188_v45 = vsub.f32 %v7690_v8, %v2170_v57  ;;  %v2187_v26 = vsub.f32 %v7695_v47, %v2168_v30  ;;  %v7749_v8 = vpop.eup %5733 }
 0x749   : > { %v7753_v47 = vpop.eup %5735 }
 0x74a   : > { %v2217_v19 = vmul.f32 1.442695, %v2188_v45  ;;  %v2215_v32 = vmul.f32 1.442695, %v2187_v26  ;;  %v7755_v11 = vpop.eup %5737 }
 0x74b   : > { %v2174_v0 = vpop.xlane.xlu1 %2173  ;;  %v2172_v5 = vpop.xlane.xlu0 %2171 }
 0x74c   : > { %5739 = vpow2.f32 %v2217_v19  ;;  %v2190_v13 = vsub.f32 %v7702_v3, %v2174_v0  ;;  %v2189_v16 = vsub.f32 %v7707_v28, %v2172_v5 }
 0x74d   : > { %5741 = vpow2.f32 %v2215_v32 }
 0x74e   : > { %v2221_v7 = vmul.f32 1.442695, %v2190_v13  ;;  %v2219_v14 = vmul.f32 1.442695, %v2189_v16 }
 0x750   : > { %5743 = vpow2.f32 %v2221_v7 }
 0x751   : > { %5745 = vpow2.f32 %v2219_v14 }
 0x752   : > { %2241 = vadd.xlane.f32.xlu0 %v7747_v1 }
 0x753   : > { %2239 = vadd.xlane.f32.xlu1 %v7749_v8 }
 0x756   : > { %2243 = vadd.xlane.f32.xlu0 %v7753_v47 }
 0x757   : > { %2245 = vadd.xlane.f32.xlu1 %v7755_v11 }
 0x759   : > { %v7759_v3 = vpop.eup %5739 }
 0x75a   : > { %v7761_v28 = vpop.eup %5741 }
 0x75b   : > { %2249 = vadd.xlane.f32.xlu1 %v7759_v3  ;;  %2247 = vadd.xlane.f32.xlu0 %v7761_v28 }
 0x75d   : > { %v7765_v38 = vpop.eup %5743 }
 0x75e   : > { %v7767_v50 = vpop.eup %5745 }
 0x75f   : > { %2253 = vadd.xlane.f32.xlu1 %v7765_v38  ;;  %2251 = vadd.xlane.f32.xlu0 %v7767_v50 }
 0x798   : > { %v2226_v31 = vpop.xlane.xlu0 %2225 }
 0x79a   : > { %v2224_v20 = vpop.xlane.xlu1 %2223 }
 0x79b   : > { %5747 = vrcp.f32 %v2224_v20 }
 0x79c   : > { %5749 = vrcp.f32 %v2226_v31 }
 0x79e   : > { %v2230_v33 = vpop.xlane.xlu0 %2229 }
 0x79f   : > { %v2228_v60 = vpop.xlane.xlu1 %2227 }
 0x7a0   : > { %5751 = vrcp.f32 %v2228_v60 }
 0x7a1   : > { %5753 = vrcp.f32 %v2230_v33 }
 0x7a2   : > { %v2234_v17 = vpop.xlane.xlu0 %2233 }
 0x7a3   : > { %v2232_v21 = vpop.xlane.xlu1 %2231 }
 0x7a4   : > { %5755 = vrcp.f32 %v2232_v21 }
 0x7a5   : > { %5757 = vrcp.f32 %v2234_v17 }
 0x7a6   : > { %v2238_v36 = vpop.xlane.xlu0 %2237 }
 0x7a7   : > { %v2236_v59 = vpop.xlane.xlu1 %2235 }
 0x7a8   : > { %v5748_v2 = vpop.eup %5747  ;;  %5759 = vrcp.f32 %v2236_v59 }
 0x7a9   : > { %5761 = vrcp.f32 %v2238_v36  ;;  %v2271_v39 = vmul.f32 %v5748_v2, %v7714_v25  ;;  %v5750_v56 = vpop.eup %5749 }
 0x7aa   : > { %v2306_v46 = vpop.permute.xlu0 %2305  ;;  %v2272_v4 = vmul.f32 %v5750_v56, %v7711_v58  ;;  %v2586_v56 = vld [vmem:[#allocation10 + $0x50] sm:$0xff] }
 0x7ab   : > { %5336 = vmatprep.subr.mxu0 %v2306_v46  ;;  %5340 = vmatprep.mubr.f32.mxu0 %v2271_v39  ;;  %v2304_v6 = vpop.permute.xlu1 %2303  ;;  %v2589_v39 = vld [vmem:[#allocation10 + $0x68] sm:$0xff] }
 0x7ac   : > { %5337 = vmatpush3.msra.mxu0 %v2306_v46  ;;  %v2583_v46 = vld [vmem:[#allocation10 + $0x38] sm:$0xff] }
 0x7ad   : > { %v5752_v9 = vpop.eup %5751  ;;  %5338 = vmatprep.subr.mxu0 %v2304_v6 }
 0x7ae   : > { %v5754_v37 = vpop.eup %5753  ;;  %5339 = vmatpush3.msra.mxu0 %v2304_v6  ;;  %v2273_v12 = vmul.f32 %v5752_v9, %v7719_v29  ;;  %v2582_v6 = vld [vmem:[#allocation10 + $0x30] sm:$0xff]  ;;  %v2581_v9 = vld [vmem:[#allocation10 + $0x28] sm:$0xff] }
 0x7af   : > { %5341 = vmatmul.mubr.f32.vlgmr.msra.gmra.mxu0 %v2272_v4  ;;  %v2274_v43 = vmul.f32 %v5754_v37, %v7717_v53  ;;  %v2580_v4 = vld [vmem:[#allocation10 + $0x20] sm:$0xff]  ;;  %v2579_v37 = vld [vmem:[#allocation10 + $0x18] sm:$0xff] }
 0x7b0   : > { %5343 = vmatprep.mubr.f32.mxu0 %v2273_v12  ;;  %v2578_v12 = vld [vmem:[#allocation10 + $0x10] sm:$0xff] }
 0x7b1   : > { %v5756_v22 = vpop.eup %5755 }
 0x7b2   : > { %v5758_v25 = vpop.eup %5757  ;;  %v2275_v57 = vmul.f32 %v5756_v22, %v7725_v44  ;;  %v2577_v22 = vld [vmem:[#allocation10 + $0x8] sm:$0xff] }
 0x7b3   : > { %5344 = vmatmul.mubr.f32.gmra.mxu0 %v2274_v43  ;;  %v2276_v45 = vmul.f32 %v5758_v25, %v7723_v18  ;;  %v2576_v43 = vld [vmem:[#allocation10] sm:$0xff] }
 0x7b4   : > { %5346 = vmatprep.mubr.f32.mxu0 %v2275_v57 }
 0x7b5   : > { %v5760_v30 = vpop.eup %5759 }
 0x7b6   : > { %v5762_v26 = vpop.eup %5761  ;;  %v2277_v58 = vmul.f32 %v5760_v30, %v7731_v10 }
 0x7b7   : > { %5347 = vmatmul.mubr.f32.gmra.mxu0 %v2276_v45  ;;  %v2278_v29 = vmul.f32 %v5762_v26, %v7729_v54 }
 0x7b8   : > { %5349 = vmatprep.mubr.f32.mxu0 %v2277_v58 }
 0x7bb   : > { %5350 = vmatmul.mubr.f32.gmra.mxu0 %v2278_v29 }
 0x7db   : > { %v2242_v19 = vpop.xlane.xlu0 %2241 }
 0x7dc   : > { %v2240_v32 = vpop.xlane.xlu1 %2239  ;;  %5763 = vrcp.f32 %v2242_v19 }
 0x7dd   : > { %5765 = vrcp.f32 %v2240_v32 }
 0x7df   : > { %v2244_v53 = vpop.xlane.xlu0 %2243 }
 0x7e0   : > { %v2246_v0 = vpop.xlane.xlu1 %2245  ;;  %5767 = vrcp.f32 %v2244_v53 }
 0x7e1   : > { %5769 = vrcp.f32 %v2246_v0 }
 0x7e4   : > { %v2250_v44 = vpop.xlane.xlu1 %2249  ;;  %v2248_v5 = vpop.xlane.xlu0 %2247 }
 0x7e5   : > { %5771 = vrcp.f32 %v2250_v44 }
 0x7e6   : > { %5773 = vrcp.f32 %v2248_v5 }
 0x7e8   : > { %v2254_v18 = vpop.xlane.xlu1 %2253  ;;  %v2252_v13 = vpop.xlane.xlu0 %2251 }
 0x7e9   : > { %v5764_v10 = vpop.eup %5763  ;;  %5775 = vrcp.f32 %v2254_v18 }
 0x7ea   : > { %v5766_v16 = vpop.eup %5765  ;;  %5777 = vrcp.f32 %v2252_v13  ;;  %v2280_v54 = vmul.f32 %v5764_v10, %v7747_v1 }
 0x7eb   : > { %v2279_v7 = vmul.f32 %v5766_v16, %v7749_v8 }
 0x7ed   : > { %v5768_v14 = vpop.eup %5767  ;;  %5352 = vmatprep.mubr.f32.mxu0 %v2279_v7 }
 0x7ee   : > { %v5770_v31 = vpop.eup %5769  ;;  %5353 = vmatmul.mubr.f32.gmra.mxu0 %v2280_v54  ;;  %v2281_v20 = vmul.f32 %v5768_v14, %v7753_v47  ;;  %v2591_v47 = vld [vmem:[#allocation10 + $0x78] sm:$0xff] }
 0x7ef   : > { %v2282_v33 = vmul.f32 %v5770_v31, %v7755_v11  ;;  %v2590_v11 = vld [vmem:[#allocation10 + $0x70] sm:$0xff]  ;;  %5364 = vmatprep.subr.mxu0 %v2591_v47 }
 0x7f0   : > { %5355 = vmatprep.mubr.f32.mxu0 %v2281_v20  ;;  %5365 = vmatpush3.msra.mxu0 %v2591_v47 }
 0x7f1   : > { %5366 = vmatprep.subr.mxu0 %v2590_v11 }
 0x7f2   : > { %v5772_v60 = vpop.eup %5771  ;;  %5356 = vmatmul.mubr.f32.gmra.mxu0 %v2282_v33 }
 0x7f3   : > { %v5774_v17 = vpop.eup %5773  ;;  %v2284_v21 = vmul.f32 %v5772_v60, %v7759_v3  ;;  %5367 = vmatpush3.msra.mxu0 %v2590_v11  ;;  %v2588_v3 = vld [vmem:[#allocation10 + $0x60] sm:$0xff] }
 0x7f4   : > { %v2283_v36 = vmul.f32 %v5774_v17, %v7761_v28  ;;  %5368 = vmatprep.subr.mxu0 %v2589_v39  ;;  %v2587_v28 = vld [vmem:[#allocation10 + $0x58] sm:$0xff] }
 0x7f5   : > { %5369 = vmatpush3.msra.mxu0 %v2589_v39 }
 0x7f6   : > { %v5776_v59 = vpop.eup %5775  ;;  %5358 = vmatprep.mubr.f32.mxu0 %v2283_v36  ;;  %5370 = vmatprep.subr.mxu0 %v2588_v3 }
 0x7f7   : > { %v5778_v1 = vpop.eup %5777  ;;  %5359 = vmatmul.mubr.f32.gmra.mxu0 %v2284_v21  ;;  %v2286_v8 = vmul.f32 %v5776_v59, %v7765_v38  ;;  %v2585_v38 = vld [vmem:[#allocation10 + $0x48] sm:$0xff] }
 0x7f8   : > { %v2285_v2 = vmul.f32 %v5778_v1, %v7767_v50  ;;  %5371 = vmatpush3.msra.mxu0 %v2588_v3  ;;  %v2584_v50 = vld [vmem:[#allocation10 + $0x40] sm:$0xff] }
 0x7f9   : > { %5372 = vmatprep.subr.mxu0 %v2587_v28 }
 0x7fa   : > { %5361 = vmatprep.mubr.f32.mxu0 %v2285_v2  ;;  %5373 = vmatpush3.msra.mxu0 %v2587_v28 }
 0x7fb   : > { %5362 = vmatmul.mubr.f32.gmra.mxu0 %v2286_v8  ;;  %5374 = vmatprep.subr.mxu0 %v2586_v56 }
 0x7fc   : > { %5375 = vmatpush3.msra.mxu0 %v2586_v56 }
 0x7fd   : > { %5376 = vmatprep.subr.mxu0 %v2585_v38 }
 0x7fe   : > { %5377 = vmatpush3.msra.mxu0 %v2585_v38 }
 0x7ff   : > { %5378 = vmatprep.subr.mxu0 %v2584_v50 }
 0x800   : > { %5379 = vmatpush3.msra.mxu0 %v2584_v50 }
 0x801   : > { %5380 = vmatprep.subr.mxu0 %v2583_v46 }
 0x802   : > { %5381 = vmatpush3.msra.mxu0 %v2583_v46 }
 0x803   : > { %5382 = vmatprep.subr.mxu0 %v2582_v6 }
 0x804   : > { %5383 = vmatpush3.msra.mxu0 %v2582_v6 }
 0x805   : > { %5384 = vmatprep.subr.mxu0 %v2581_v9 }
 0x806   : > { %5385 = vmatpush3.msra.mxu0 %v2581_v9 }
 0x807   : > { %5386 = vmatprep.subr.mxu0 %v2580_v4 }
 0x808   : > { %5387 = vmatpush3.msra.mxu0 %v2580_v4 }
 0x809   : > { %5388 = vmatprep.subr.mxu0 %v2579_v37 }
 0x80a   : > { %5389 = vmatpush3.msra.mxu0 %v2579_v37 }
 0x80b   : > { %5390 = vmatprep.subr.mxu0 %v2578_v12 }
 0x80c   : > { %5391 = vmatpush3.msra.mxu0 %v2578_v12 }
 0x80d   : > { %5392 = vmatprep.subr.mxu0 %v2577_v22 }
 0x80e   : > { %5393 = vmatpush3.msra.mxu0 %v2577_v22 }
 0x80f   : > { %5394 = vmatprep.subr.mxu0 %v2576_v43 }
 0x810   : > { %5395 = vmatpush3.msra.mxu0 %v2576_v43 }
 0x86f   : > { %v5342_v25 = vpop.f32.mrf.mxu0 }
 0x871   : > { %v2417_v57 = vpop.f32.mrf.mxu0 }
 0x872   : > { %v5579_v30 = vpack.i.bf16 %v5342_v25, %v2417_v57 }
 0x873   : > { %v5345_v45 = vpop.f32.mrf.mxu0 }
 0x874   : > { %5580 = vrot.lane.b32.xlu0 %v5579_v30, %s6291_s17 }
 0x875   : > { %v2427_v26 = vpop.f32.mrf.mxu0 }
 0x876   : > { %v5584_v58 = vpack.i.bf16 %v5345_v45, %v2427_v26 }
 0x877   : > { %v5348_v29 = vpop.f32.mrf.mxu0 }
 0x878   : > { %5585 = vrot.lane.b32.xlu1 %v5584_v58, %s6291_s17 }
 0x879   : > { %v2437_v19 = vpop.f32.mrf.mxu0 }
 0x87a   : > { %v5589_v32 = vpack.i.bf16 %v5348_v29, %v2437_v19  ;;  %v5943_v19 = vld [vmem:[%s6570_s26 + $0x8] sm:$0xff] }
 0x87b   : > { %v5351_v53 = vpop.f32.mrf.mxu0 }
 0x87c   : > { %5590 = vrot.lane.b32.xlu1 %v5589_v32, %s6291_s17 }
 0x87d   : > { %v2447_v0 = vpop.f32.mrf.mxu0 }
 0x87e   : > { %v5594_v44 = vpack.i.bf16 %v5351_v53, %v2447_v0  ;;  %v5944_v53 = vld [vmem:[%s6570_s26] sm:$0xff] }
 0x880   : > { %5595 = vrot.lane.b32.xlu0 %v5594_v44, %s6291_s17 }
 0x8ae   : > { %v5354_v5 = vpop.f32.mrf.mxu0 }
 0x8b0   : > { %v2457_v18 = vpop.f32.mrf.mxu0 }
 0x8b1   : > { %v5599_v13 = vpack.i.bf16 %v5354_v5, %v2457_v18 }
 0x8b2   : > { %v5357_v10 = vpop.f32.mrf.mxu0 }
 0x8b3   : > { %5600 = vrot.lane.b32.xlu1 %v5599_v13, %s6291_s17 }
 0x8b4   : > { %v2467_v16 = vpop.f32.mrf.mxu0 }
 0x8b5   : > { %v5604_v54 = vpack.i.bf16 %v5357_v10, %v2467_v16  ;;  %v5945_v10 = vld [vmem:[%s6570_s26 + $0x18] sm:$0xff] }
 0x8b7   : > { %v5360_v7 = vpop.f32.mrf.mxu0  ;;  %5605 = vrot.lane.b32.xlu0 %v5604_v54, %s6291_s17  ;;  %v5946_v54 = vld [vmem:[%s6570_s26 + $0x10] sm:$0xff] }
 0x8b9   : > { %v2477_v14 = vpop.f32.mrf.mxu0 }
 0x8ba   : > { %v5609_v31 = vpack.i.bf16 %v5360_v7, %v2477_v14 }
 0x8bb   : > { %v5363_v20 = vpop.f32.mrf.mxu0 }
 0x8bc   : > { %5610 = vrot.lane.b32.xlu1 %v5609_v31, %s6291_s17 }
 0x8bd   : > { %v2487_v33 = vpop.f32.mrf.mxu0 }
 0x8be   : > { %v5614_v60 = vpack.i.bf16 %v5363_v20, %v2487_v33 }
 0x8c0   : > { %5615 = vrot.lane.b32.xlu0 %v5614_v60, %s6291_s17  ;;  %v5947_v60 = vld [vmem:[%s6570_s26 + $0x28] sm:$0xff] }
 0x8e6   : > { %v5581_v17 = vpop.permute.xlu0 %5580 }
 0x8e7   : > { %v5583_v21 = vunpack.i.h.bf16 %v5581_v17  ;;  %v5582_v36 = vunpack.i.l.bf16 %v5581_v17 }
 0x8e9   : > { %v2560_v59 = vsel %vm1307_vm0, %v7605_v27, %v5582_v36  ;;  %v2561_v1 = vsel %vm1307_vm0, %v7603_v34, %v5583_v21  ;;  %v5948_v21 = vld [vmem:[%s6570_s26 + $0x20] sm:$0xff] }
 0x8ea   : > { %v5586_v8 = vpop.permute.xlu1 %5585  ;;  %5396 = vmatprep.mubr.f32.mxu0 %v2560_v59 }
 0x8eb   : > { %v5588_v2 = vunpack.i.h.bf16 %v5586_v8  ;;  %v5587_v47 = vunpack.i.l.bf16 %v5586_v8  ;;  %5397 = vmatmul.mubr.f32.vlgmr.msra.gmra.mxu0 %v2561_v1 }
 0x8ed   : > { %v2562_v11 = vsel %vm1307_vm0, %v7609_v15, %v5587_v47  ;;  %v2563_v39 = vsel %vm1307_vm0, %v7607_v48, %v5588_v2  ;;  %v5949_v2 = vld [vmem:[%s6570_s26 + $0x38] sm:$0xff] }
 0x8ee   : > { %v5591_v3 = vpop.permute.xlu1 %5590  ;;  %5399 = vmatprep.mubr.f32.mxu0 %v2562_v11  ;;  %v5950_v11 = vld [vmem:[%s6570_s26 + $0x30] sm:$0xff] }
 0x8ef   : > { %v5593_v28 = vunpack.i.h.bf16 %v5591_v3  ;;  %v5592_v56 = vunpack.i.l.bf16 %v5591_v3  ;;  %5400 = vmatmul.mubr.f32.gmra.mxu0 %v2563_v39 }
 0x8f1   : > { %v2564_v27 = vsel %vm1307_vm0, %v7613_v61, %v5592_v56  ;;  %v2565_v34 = vsel %vm1307_vm0, %v7611_v49, %v5593_v28 }
 0x8f2   : > { %v5596_v38 = vpop.permute.xlu0 %5595  ;;  %5402 = vmatprep.mubr.f32.mxu0 %v2564_v27  ;;  %v5951_v27 = vld [vmem:[%s6570_s26 + $0x48] sm:$0xff] }
 0x8f3   : > { %v5598_v50 = vunpack.i.h.bf16 %v5596_v38  ;;  %v5597_v46 = vunpack.i.l.bf16 %v5596_v38  ;;  %5403 = vmatmul.mubr.f32.gmra.mxu0 %v2565_v34 }
 0x8f5   : > { %v2566_v15 = vsel %vm1307_vm0, %v7617_v62, %v5597_v46  ;;  %v2567_v48 = vsel %vm1307_vm0, %v7615_v51, %v5598_v50  ;;  %v5952_v46 = vld [vmem:[%s6570_s26 + $0x40] sm:$0xff] }
 0x8f6   : > { %5405 = vmatprep.mubr.f32.mxu0 %v2566_v15 }
 0x8f7   : > { %5406 = vmatmul.mubr.f32.gmra.mxu0 %v2567_v48 }
 0x925   : > { %v5601_v6 = vpop.permute.xlu1 %5600 }
 0x926   : > { %v5603_v9 = vunpack.i.h.bf16 %v5601_v6  ;;  %v5602_v4 = vunpack.i.l.bf16 %v5601_v6 }
 0x928   : > { %v2568_v61 = vsel %vm1307_vm0, %v7621_v24, %v5602_v4  ;;  %v2569_v49 = vsel %vm1307_vm0, %v7619_v35, %v5603_v9  ;;  %v5953_v9 = vld [vmem:[%s6570_s26 + $0x58] sm:$0xff] }
 0x929   : > { %v5606_v37 = vpop.permute.xlu0 %5605  ;;  %5408 = vmatprep.mubr.f32.mxu0 %v2568_v61 }
 0x92a   : > { %v5608_v12 = vunpack.i.h.bf16 %v5606_v37  ;;  %v5607_v22 = vunpack.i.l.bf16 %v5606_v37  ;;  %5409 = vmatmul.mubr.f32.gmra.mxu0 %v2569_v49  ;;  %v5954_v49 = vld [vmem:[%s6570_s26 + $0x50] sm:$0xff] }
 0x92c   : > { %v2570_v62 = vsel %vm1307_vm0, %v7625_v40, %v5607_v22  ;;  %v2571_v51 = vsel %vm1307_vm0, %v7623_v23, %v5608_v12 }
 0x92d   : > { %5411 = vmatprep.mubr.f32.mxu0 %v2570_v62 }
 0x92e   : > { %v5611_v43 = vpop.permute.xlu1 %5610  ;;  %5412 = vmatmul.mubr.f32.gmra.mxu0 %v2571_v51  ;;  %v5955_v51 = vld [vmem:[%s6570_s26 + $0x68] sm:$0xff] }
 0x92f   : > { %v5613_v25 = vunpack.i.h.bf16 %v5611_v43  ;;  %v5612_v57 = vunpack.i.l.bf16 %v5611_v43 }
 0x931   : > { %v2572_v24 = vsel %vm1307_vm0, %v7629_v55, %v5612_v57  ;;  %v2573_v35 = vsel %vm1307_vm0, %v7627_v63, %v5613_v25  ;;  %v7831_v63 = vld [vmem:[%s9197_s6] ss:$0 sm:$0xff] }
 0x932   : > { %v5616_v30 = vpop.permute.xlu0 %5615  ;;  %5414 = vmatprep.mubr.f32.mxu0 %v2572_v24  ;;  %v5956_v24 = vld [vmem:[%s6570_s26 + $0x60] sm:$0xff] }
 0x933   : > { %v5618_v45 = vunpack.i.h.bf16 %v5616_v30  ;;  %v5617_v40 = vunpack.i.l.bf16 %v5616_v30  ;;  %5415 = vmatmul.mubr.f32.gmra.mxu0 %v2573_v35 }
 0x935   : > { %v2574_v23 = vsel %vm1307_vm0, %v7633_v52, %v5617_v40  ;;  %v2575_v26 = vsel %vm1307_vm0, %v7631_v42, %v5618_v45  ;;  %v5957_v40 = vld [vmem:[%s6570_s26 + $0x78] sm:$0xff] }
 0x936   : > { %5417 = vmatprep.mubr.f32.mxu0 %v2574_v23 }
 0x937   : > { %5418 = vmatmul.mubr.f32.gmra.mxu0 %v2575_v26 }
 0x938   : > { %3615 = vmatprep.mubr.f32.mxu0 %v9405_v41 }
 0x9ab   : > { %v5398_v55 = vpop.f32.mrf.mxu0 }
 0x9ac   : > { %v2671_v58 = vadd.f32 %v5398_v55, %v7831_v63  ;;  %v5958_v55 = vld [vmem:[%s6570_s26 + $0x70] sm:$0xff]  ;;  %s6143_s26 = scalar_lea.vmem %s9036_s5, 2048 }
 0x9ad   : > { %v2665_v29 = vpop.f32.mrf.mxu0  ;;  %p6144_p12 = scmp.ne.s32.totalorder %s9036_s5, %s6143_s26  ;;  %p6151_p8 = scmp.lt.s32.totalorder %s6149_s25, %s6143_s26 }
 0x9ae   : > { %v7835_v52 = vadd.f32 %v5943_v19, %v2671_v58  ;;  %v2666_v42 = vadd.f32 %v7831_v63, %v2665_v29  ;;  %v3013_v29 = vld [vmem:[#allocation11 + $0x1e8] sm:$0xff]  ;;  %v3538_v19 = vld [vmem:[#allocation11 + $0x1f8] sm:$0xff] }
 0x9af   : > { %v5401_v32 = vpop.f32.mrf.mxu0  ;;  %3026 = vmatprep.subr.mxu1 %v3013_v29  ;;  %3551 = vmatprep.subr.mxu0 %v3538_v19  ;;  %v3531_v29 = vld [vmem:[#allocation11 + $0x190] sm:$0xff]  ;;  %v3005_v19 = vld [vmem:[#allocation11 + $0x168] sm:$0xff]  ;;  %p6145_p1 = pnand %p6144_p12, %p9548_p13  ;;  %p6152_p7 = por %p6151_p8, %p6150_p5 }
 0x9b0   : > { %9424 = vst [vmem:[#allocation34_spill] sm:$0xff] %v7835_v52  ;;  %v7839_v0 = vadd.f32 %v5944_v53, %v2666_v42  ;;  %v2681_v44 = vadd.f32 %v5401_v32, %v7831_v63  ;;  %2764 = vadd.xlane.f32.xlu0 %v7835_v52  ;;  %v3012_v42 = vld [vmem:[#allocation11 + $0x1e0] sm:$0xff]  ;;  %v3537_v32 = vld [vmem:[#allocation11 + $0x1f0] sm:$0xff]  ;;  %v3011_v53 = vld [vmem:[#allocation11 + $0x1c8] sm:$0xff] }
 0x9b1   : > { %v2675_v5 = vpop.f32.mrf.mxu0  ;;  %3027 = vmatpush1.msra.mxu1 %v3012_v42  ;;  %3552 = vmatpush1.msra.mxu0 %v3537_v32  ;;  %v3530_v42 = vld [vmem:[#allocation11 + $0x178] sm:$0xff]  ;;  %v3004_v32 = vld [vmem:[#allocation11 + $0x160] sm:$0xff]  ;;  %p6146_p3 = pneg %p6145_p1 }
 0x9b2   : > { %9425 = vst [vmem:[#allocation35_spill] sm:$0xff] %v7839_v0  ;;  %v2676_v18 = vadd.f32 %v7831_v63, %v2675_v5  ;;  %2762 = vadd.xlane.f32.xlu1 %v7839_v0  ;;  %v7846_v16 = vadd.f32 %v5945_v10, %v2681_v44  ;;  %v3536_v44 = vld [vmem:[#allocation11 + $0x1d8] sm:$0xff]  ;;  %v3535_v5 = vld [vmem:[#allocation11 + $0x1d0] sm:$0xff]  ;;  %3028 = vmatprep.subr.mxu1 %v3011_v53  ;;  %v3008_v10 = vld [vmem:[#allocation11 + $0x1a0] sm:$0xff] }
 0x9b3   : > { %v5404_v13 = vpop.f32.mrf.mxu0  ;;  %3553 = vmatprep.subr.mxu0 %v3536_v44  ;;  %v3529_v53 = vld [vmem:[#allocation11 + $0x170] sm:$0xff]  ;;  %v3003_v44 = vld [vmem:[#allocation11 + $0x148] sm:$0xff]  ;;  %p6153_p6 = pnand %p6152_p7, %p6146_p3 }
 0x9b4   : > { %9426 = vst [vmem:[#allocation36_spill] sm:$0xff] %v7846_v16  ;;  %v7849_v7 = vadd.f32 %v5946_v54, %v2676_v18  ;;  %v2691_v14 = vadd.f32 %v5404_v13, %v7831_v63  ;;  %v3009_v18 = vld [vmem:[#allocation11 + $0x1a8] sm:$0xff]  ;;  %v3534_v13 = vld [vmem:[#allocation11 + $0x1b8] sm:$0xff]  ;;  %v3533_v54 = vld [vmem:[#allocation11 + $0x1b0] sm:$0xff]  ;;  %3554 = vmatpush1.msra.mxu0 %v3535_v5 }
 0x9b5   : > { %v2685_v31 = vpop.f32.mrf.mxu0  ;;  %3555 = vmatprep.subr.mxu0 %v3534_v13  ;;  %v3002_v5 = vld [vmem:[#allocation11 + $0x140] sm:$0xff]  ;;  %v3001_v13 = vld [vmem:[#allocation11 + $0x128] sm:$0xff] }
 0x9b6   : > { %9427 = vst [vmem:[#allocation37_spill] sm:$0xff] %v7849_v7  ;;  %v2686_v20 = vadd.f32 %v7831_v63, %v2685_v31  ;;  %2766 = vadd.xlane.f32.xlu0 %v7849_v7  ;;  %2768 = vadd.xlane.f32.xlu1 %v7846_v16  ;;  %v7856_v17 = vadd.f32 %v5947_v60, %v2691_v14 }
 0x9b7   : > { %v5407_v33 = vpop.f32.mrf.mxu0  ;;  %3556 = vmatpush1.msra.mxu0 %v3533_v54  ;;  %v3000_v54 = vld [vmem:[#allocation11 + $0x120] sm:$0xff] }
 0x9b8   : > { %9428 = vst [vmem:[#allocation38_spill] sm:$0xff] %v7856_v17  ;;  %v7859_v36 = vadd.f32 %v5948_v21, %v2686_v20  ;;  %v2701_v59 = vadd.f32 %v5407_v33, %v7831_v63 }
 0x9b9   : > { %v2695_v1 = vpop.f32.mrf.mxu0 }
 0x9ba   : > { %9429 = vst [vmem:[#allocation39_spill] sm:$0xff] %v7859_v36  ;;  %v2696_v8 = vadd.f32 %v7831_v63, %v2695_v1  ;;  %2770 = vadd.xlane.f32.xlu0 %v7859_v36  ;;  %2772 = vadd.xlane.f32.xlu1 %v7856_v17  ;;  %v7866_v47 = vadd.f32 %v5949_v2, %v2701_v59 }
 0x9bc   : > { %9430 = vst [vmem:[#allocation40_spill] sm:$0xff] %v7866_v47  ;;  %v7869_v39 = vadd.f32 %v5950_v11, %v2696_v8 }
 0x9be   : > { %9431 = vst [vmem:[#allocation33_spill] sm:$0xff] %v7869_v39  ;;  %2774 = vadd.xlane.f32.xlu0 %v7869_v39  ;;  %2776 = vadd.xlane.f32.xlu1 %v7866_v47 }
 0x9ea   : > { %v5410_v3 = vpop.f32.mrf.mxu0 }
 0x9eb   : > { %v2711_v28 = vadd.f32 %v5410_v3, %v7831_v63 }
 0x9ec   : > { %v2705_v56 = vpop.f32.mrf.mxu0 }
 0x9ed   : > { %v7875_v34 = vadd.f32 %v5951_v27, %v2711_v28  ;;  %v2706_v38 = vadd.f32 %v7831_v63, %v2705_v56 }
 0x9ee   : > { %v5413_v50 = vpop.f32.mrf.mxu0 }
 0x9ef   : > { %9432 = vst [vmem:[#allocation32_spill] sm:$0xff] %v7875_v34  ;;  %v7879_v15 = vadd.f32 %v5952_v46, %v2706_v38  ;;  %v2721_v48 = vadd.f32 %v5413_v50, %v7831_v63  ;;  %2780 = vadd.xlane.f32.xlu1 %v7875_v34 }
 0x9f0   : > { %v2715_v6 = vpop.f32.mrf.mxu0 }
 0x9f1   : > { %9433 = vst [vmem:[#allocation31_spill] sm:$0xff] %v7879_v15  ;;  %v7884_v4 = vadd.f32 %v5953_v9, %v2721_v48  ;;  %v2716_v61 = vadd.f32 %v7831_v63, %v2715_v6  ;;  %2778 = vadd.xlane.f32.xlu0 %v7879_v15 }
 0x9f3   : > { %9434 = vst [vmem:[#allocation30_spill] sm:$0xff] %v7884_v4  ;;  %v7889_v37 = vadd.f32 %v5954_v49, %v2716_v61  ;;  %v5416_v12 = vpop.f32.mrf.mxu0  ;;  %2784 = vadd.xlane.f32.xlu1 %v7884_v4 }
 0x9f4   : > { %v2731_v22 = vadd.f32 %v5416_v12, %v7831_v63 }
 0x9f5   : > { %9435 = vst [vmem:[#allocation29_spill] sm:$0xff] %v7889_v37  ;;  %v2725_v62 = vpop.f32.mrf.mxu0  ;;  %2782 = vadd.xlane.f32.xlu0 %v7889_v37 }
 0x9f6   : > { %v7895_v43 = vadd.f32 %v5955_v51, %v2731_v22  ;;  %v2726_v25 = vadd.f32 %v7831_v63, %v2725_v62 }
 0x9f7   : > { %v5419_v57 = vpop.f32.mrf.mxu0 }
 0x9f8   : > { %9436 = vst [vmem:[#allocation28_spill] sm:$0xff] %v7895_v43  ;;  %v7899_v35 = vadd.f32 %v5956_v24, %v2726_v25  ;;  %v2741_v30 = vadd.f32 %v5419_v57, %v7831_v63  ;;  %2788 = vadd.xlane.f32.xlu1 %v7895_v43 }
 0x9f9   : > { %v2735_v45 = vpop.f32.mrf.mxu0 }
 0x9fa   : > { %9437 = vst [vmem:[#allocation42_spill] sm:$0xff] %v7899_v35  ;;  %v7904_v23 = vadd.f32 %v5957_v40, %v2741_v30  ;;  %v2736_v26 = vadd.f32 %v7831_v63, %v2735_v45  ;;  %2786 = vadd.xlane.f32.xlu0 %v7899_v35  ;;  %v3010_v63 = vld [vmem:[#allocation11 + $0x1c0] sm:$0xff]  ;;  %v3007_v30 = vld [vmem:[#allocation11 + $0x188] sm:$0xff]  ;;  %v3532_v45 = vld [vmem:[#allocation11 + $0x198] sm:$0xff] }
 0x9fb   : > { %3029 = vmatpush1.msra.mxu1 %v3010_v63  ;;  %3557 = vmatprep.subr.mxu0 %v3532_v45  ;;  %v3528_v63 = vld [vmem:[#allocation11 + $0x158] sm:$0xff]  ;;  %v2988_v45 = vld [vmem:[#allocation11 + $0x60] sm:$0xff] }
 0x9fc   : > { %9438 = vst [vmem:[#allocation41_spill] sm:$0xff] %v7904_v23  ;;  %v7909_v58 = vadd.f32 %v5958_v55, %v2736_v26  ;;  %2792 = vadd.xlane.f32.xlu1 %v7904_v23  ;;  %3030 = vmatprep.subr.mxu1 %v3009_v18  ;;  %v3006_v55 = vld [vmem:[#allocation11 + $0x180] sm:$0xff]  ;;  %v3527_v18 = vld [vmem:[#allocation11 + $0x150] sm:$0xff] }
 0x9fd   : > { %3031 = vmatpush1.msra.mxu1 %v3008_v10  ;;  %3558 = vmatpush1.msra.mxu0 %v3531_v29  ;;  %v3526_v10 = vld [vmem:[#allocation11 + $0x138] sm:$0xff]  ;;  %v2986_v29 = vld [vmem:[#allocation11 + $0x40] sm:$0xff] }
 0x9fe   : > { %9439 = vst [vmem:[#allocation25_spill] sm:$0xff] %v7909_v58  ;;  %2790 = vadd.xlane.f32.xlu0 %v7909_v58  ;;  %3032 = vmatprep.subr.mxu1 %v3007_v30  ;;  %v3514_v30 = vld [vmem:[#allocation11 + $0x78] sm:$0xff] }
 0x9ff   : > { %3033 = vmatpush1.msra.mxu1 %v3006_v55  ;;  %3559 = vmatprep.subr.mxu0 %v3530_v42  ;;  %v3512_v55 = vld [vmem:[#allocation11 + $0x58] sm:$0xff]  ;;  %v2985_v42 = vld [vmem:[#allocation11 + $0x28] sm:$0xff] }
 0xa00   : > { %3034 = vmatprep.subr.mxu1 %v3005_v19  ;;  %3560 = vmatpush1.msra.mxu0 %v3529_v53  ;;  %v3511_v19 = vld [vmem:[#allocation11 + $0x50] sm:$0xff]  ;;  %v2984_v53 = vld [vmem:[#allocation11 + $0x20] sm:$0xff] }
 0xa01   : > { %3035 = vmatpush1.msra.mxu1 %v3004_v32  ;;  %3561 = vmatprep.subr.mxu0 %v3528_v63  ;;  %v3510_v32 = vld [vmem:[#allocation11 + $0x38] sm:$0xff]  ;;  %v2983_v63 = vld [vmem:[#allocation11 + $0x8] sm:$0xff] }
 0xa02   : > { %3036 = vmatprep.subr.mxu1 %v3003_v44  ;;  %3562 = vmatpush1.msra.mxu0 %v3527_v18  ;;  %v3509_v44 = vld [vmem:[#allocation11 + $0x30] sm:$0xff]  ;;  %v2982_v18 = vld [vmem:[#allocation11] sm:$0xff] }
 0xa03   : > { %3037 = vmatpush1.msra.mxu1 %v3002_v5  ;;  %3563 = vmatprep.subr.mxu0 %v3526_v10  ;;  %v3508_v5 = vld [vmem:[#allocation11 + $0x18] sm:$0xff] }
 0xa04   : > { %3038 = vmatprep.subr.mxu1 %v3001_v13  ;;  %v3507_v13 = vld [vmem:[#allocation11 + $0x10] sm:$0xff] }
 0xa05   : > { %3039 = vmatpush1.msra.mxu1 %v3000_v54 }
 0xa39   : > { %v2765_v14 = vpop.xlane.xlu0 %2764 }
 0xa3a   : > { %v2795_v31 = vmul.f32 0.0078125, %v2765_v14  ;;  %v3525_v14 = vld [vmem:[#allocation11 + $0x130] sm:$0xff] }
 0xa3b   : > { %v2763_v20 = vpop.xlane.xlu1 %2762  ;;  %3564 = vmatpush1.msra.mxu0 %v3525_v14 }
 0xa3c   : > { %v7914_v33 = vsub.f32 %v7835_v52, %v2795_v31  ;;  %v2794_v60 = vmul.f32 0.0078125, %v2763_v20  ;;  %v2999_v31 = vld [vmem:[#allocation11 + $0x108] sm:$0xff]  ;;  %v3524_v20 = vld [vmem:[#allocation11 + $0x118] sm:$0xff] }
 0xa3d   : > { %3040 = vmatprep.subr.mxu1 %v2999_v31  ;;  %3565 = vmatprep.subr.mxu0 %v3524_v20 }
 0xa3e   : > { %v7917_v21 = vsub.f32 %v7839_v0, %v2794_v60  ;;  %v2827_v59 = vmul.f32 %v7914_v33, %v7914_v33  ;;  %v2998_v60 = vld [vmem:[#allocation11 + $0x100] sm:$0xff] }
 0xa3f   : > { %v2767_v1 = vpop.xlane.xlu0 %2766  ;;  %v2769_v8 = vpop.xlane.xlu1 %2768  ;;  %3041 = vmatpush1.msra.mxu1 %v2998_v60 }
 0xa40   : > { %v2796_v2 = vmul.f32 0.0078125, %v2767_v1  ;;  %v2797_v11 = vmul.f32 0.0078125, %v2769_v8  ;;  %2844 = vadd.xlane.f32.xlu1 %v2827_v59  ;;  %v2826_v3 = vmul.f32 %v7917_v21, %v7917_v21  ;;  %v3523_v59 = vld [vmem:[#allocation11 + $0x110] sm:$0xff]  ;;  %v2997_v1 = vld [vmem:[#allocation11 + $0xe8] sm:$0xff]  ;;  %v3522_v8 = vld [vmem:[#allocation11 + $0xf8] sm:$0xff] }
 0xa41   : > { %3566 = vmatpush1.msra.mxu0 %v3523_v59  ;;  %3042 = vmatprep.subr.mxu1 %v2997_v1 }
 0xa42   : > { %v7924_v28 = vsub.f32 %v7849_v7, %v2796_v2  ;;  %v7927_v56 = vsub.f32 %v7846_v16, %v2797_v11  ;;  %2842 = vadd.xlane.f32.xlu0 %v2826_v3  ;;  %v2996_v2 = vld [vmem:[#allocation11 + $0xe0] sm:$0xff]  ;;  %v3521_v11 = vld [vmem:[#allocation11 + $0xf0] sm:$0xff]  ;;  %3567 = vmatprep.subr.mxu0 %v3522_v8  ;;  %v2995_v3 = vld [vmem:[#allocation11 + $0xc8] sm:$0xff] }
 0xa43   : > { %v2771_v27 = vpop.xlane.xlu0 %2770  ;;  %v2773_v38 = vpop.xlane.xlu1 %2772  ;;  %3043 = vmatpush1.msra.mxu1 %v2996_v2  ;;  %3568 = vmatpush1.msra.mxu0 %v3521_v11 }
 0xa44   : > { %v2798_v50 = vmul.f32 0.0078125, %v2771_v27  ;;  %v2799_v46 = vmul.f32 0.0078125, %v2773_v38  ;;  %v2828_v48 = vmul.f32 %v7924_v28, %v7924_v28  ;;  %v2829_v6 = vmul.f32 %v7927_v56, %v7927_v56  ;;  %v3520_v27 = vld [vmem:[#allocation11 + $0xd8] sm:$0xff]  ;;  %v2994_v38 = vld [vmem:[#allocation11 + $0xc0] sm:$0xff]  ;;  %3044 = vmatprep.subr.mxu1 %v2995_v3 }
 0xa45   : > { %3569 = vmatprep.subr.mxu0 %v3520_v27  ;;  %3045 = vmatpush1.msra.mxu1 %v2994_v38 }
 0xa46   : > { %v7934_v9 = vsub.f32 %v7859_v36, %v2798_v50  ;;  %v7937_v61 = vsub.f32 %v7856_v17, %v2799_v46  ;;  %2846 = vadd.xlane.f32.xlu0 %v2828_v48  ;;  %2848 = vadd.xlane.f32.xlu1 %v2829_v6  ;;  %v3519_v50 = vld [vmem:[#allocation11 + $0xd0] sm:$0xff]  ;;  %v2993_v46 = vld [vmem:[#allocation11 + $0xa8] sm:$0xff]  ;;  %v3518_v48 = vld [vmem:[#allocation11 + $0xb8] sm:$0xff] }
 0xa47   : > { %v2775_v49 = vpop.xlane.xlu0 %2774  ;;  %v2777_v12 = vpop.xlane.xlu1 %2776  ;;  %3570 = vmatpush1.msra.mxu0 %v3519_v50  ;;  %v2992_v6 = vld [vmem:[#allocation11 + $0xa0] sm:$0xff]  ;;  %3046 = vmatprep.subr.mxu1 %v2993_v46 }
 0xa48   : > { %v2800_v22 = vmul.f32 0.0078125, %v2775_v49  ;;  %v2801_v62 = vmul.f32 0.0078125, %v2777_v12  ;;  %v2830_v51 = vmul.f32 %v7934_v9, %v7934_v9  ;;  %v2831_v25 = vmul.f32 %v7937_v61, %v7937_v61  ;;  %v3517_v49 = vld [vmem:[#allocation11 + $0xb0] sm:$0xff]  ;;  %3571 = vmatprep.subr.mxu0 %v3518_v48  ;;  %v2991_v12 = vld [vmem:[#allocation11 + $0x88] sm:$0xff]  ;;  %3047 = vmatpush1.msra.mxu1 %v2992_v6 }
 0xa49   : > { %3572 = vmatpush1.msra.mxu0 %v3517_v49  ;;  %3048 = vmatprep.subr.mxu1 %v2991_v12 }
 0xa4a   : > { %v7944_v57 = vsub.f32 %v7869_v39, %v2800_v22  ;;  %v7947_v24 = vsub.f32 %v7866_v47, %v2801_v62  ;;  %2850 = vadd.xlane.f32.xlu0 %v2830_v51  ;;  %2852 = vadd.xlane.f32.xlu1 %v2831_v25  ;;  %v3516_v22 = vld [vmem:[#allocation11 + $0x98] sm:$0xff]  ;;  %v2990_v62 = vld [vmem:[#allocation11 + $0x80] sm:$0xff]  ;;  %v3515_v51 = vld [vmem:[#allocation11 + $0x90] sm:$0xff] }
 0xa4b   : > { %3573 = vmatprep.subr.mxu0 %v3516_v22  ;;  %v2989_v25 = vld [vmem:[#allocation11 + $0x68] sm:$0xff]  ;;  %3049 = vmatpush1.msra.mxu1 %v2990_v62 }
 0xa4c   : > { %v2832_v40 = vmul.f32 %v7944_v57, %v7944_v57  ;;  %v2833_v26 = vmul.f32 %v7947_v24, %v7947_v24  ;;  %3574 = vmatpush1.msra.mxu0 %v3515_v51  ;;  %3050 = vmatprep.subr.mxu1 %v2989_v25 }
 0xa4d   : > { %3575 = vmatprep.subr.mxu0 %v3514_v30  ;;  %3051 = vmatpush1.msra.mxu1 %v2988_v45 }
 0xa4e   : > { %2854 = vadd.xlane.f32.xlu0 %v2832_v40  ;;  %2856 = vadd.xlane.f32.xlu1 %v2833_v26  ;;  %v3513_v40 = vld [vmem:[#allocation11 + $0x70] sm:$0xff]  ;;  %v2987_v26 = vld [vmem:[#allocation11 + $0x48] sm:$0xff] }
 0xa4f   : > { %3576 = vmatpush1.msra.mxu0 %v3513_v40  ;;  %3052 = vmatprep.subr.mxu1 %v2987_v26 }
 0xa50   : > { %3577 = vmatprep.subr.mxu0 %v3512_v55  ;;  %3053 = vmatpush1.msra.mxu1 %v2986_v29 }
 0xa51   : > { %3578 = vmatpush1.msra.mxu0 %v3511_v19  ;;  %3054 = vmatprep.subr.mxu1 %v2985_v42 }
 0xa52   : > { %3579 = vmatprep.subr.mxu0 %v3510_v32  ;;  %3055 = vmatpush1.msra.mxu1 %v2984_v53 }
 0xa53   : > { %3580 = vmatpush1.msra.mxu0 %v3509_v44  ;;  %3056 = vmatprep.subr.mxu1 %v2983_v63 }
 0xa54   : > { %3581 = vmatprep.subr.mxu0 %v3508_v5  ;;  %3057 = vmatpush1.msra.mxu1 %v2982_v18 }
 0xa55   : > { %3582 = vmatpush1.msra.mxu0 %v3507_v13 }
 0xa78   : > { %v2781_v10 = vpop.xlane.xlu1 %2780 }
 0xa79   : > { %v2803_v54 = vmul.f32 0.0078125, %v2781_v10 }
 0xa7a   : > { %v2779_v14 = vpop.xlane.xlu0 %2778 }
 0xa7b   : > { %v7954_v31 = vsub.f32 %v7875_v34, %v2803_v54  ;;  %v2802_v20 = vmul.f32 0.0078125, %v2779_v14 }
 0xa7c   : > { %v2785_v60 = vpop.xlane.xlu1 %2784 }
 0xa7d   : > { %v7957_v59 = vsub.f32 %v7879_v15, %v2802_v20  ;;  %v2805_v1 = vmul.f32 0.0078125, %v2785_v60  ;;  %v2835_v8 = vmul.f32 %v7954_v31, %v7954_v31 }
 0xa7e   : > { %v2783_v2 = vpop.xlane.xlu0 %2782 }
 0xa7f   : > { %v7962_v11 = vsub.f32 %v7884_v4, %v2805_v1  ;;  %v2804_v3 = vmul.f32 0.0078125, %v2783_v2  ;;  %2860 = vadd.xlane.f32.xlu1 %v2835_v8  ;;  %v2834_v27 = vmul.f32 %v7957_v59, %v7957_v59 }
 0xa81   : > { %v7967_v38 = vsub.f32 %v7889_v37, %v2804_v3  ;;  %v2789_v50 = vpop.xlane.xlu1 %2788  ;;  %2858 = vadd.xlane.f32.xlu0 %v2834_v27  ;;  %v2837_v46 = vmul.f32 %v7962_v11, %v7962_v11 }
 0xa82   : > { %v2807_v48 = vmul.f32 0.0078125, %v2789_v50 }
 0xa83   : > { %v2787_v6 = vpop.xlane.xlu0 %2786  ;;  %2864 = vadd.xlane.f32.xlu1 %v2837_v46  ;;  %v2836_v49 = vmul.f32 %v7967_v38, %v7967_v38 }
 0xa84   : > { %v7974_v12 = vsub.f32 %v7895_v43, %v2807_v48  ;;  %v2806_v22 = vmul.f32 0.0078125, %v2787_v6 }
 0xa85   : > { %v2793_v62 = vpop.xlane.xlu1 %2792  ;;  %2862 = vadd.xlane.f32.xlu0 %v2836_v49 }
 0xa86   : > { %v7977_v51 = vsub.f32 %v7899_v35, %v2806_v22  ;;  %v2809_v25 = vmul.f32 0.0078125, %v2793_v62  ;;  %v2839_v30 = vmul.f32 %v7974_v12, %v7974_v12 }
 0xa87   : > { %v2791_v45 = vpop.xlane.xlu0 %2790 }
 0xa88   : > { %v7982_v40 = vsub.f32 %v7904_v23, %v2809_v25  ;;  %v2808_v26 = vmul.f32 0.0078125, %v2791_v45  ;;  %2868 = vadd.xlane.f32.xlu1 %v2839_v30  ;;  %v2838_v55 = vmul.f32 %v7977_v51, %v7977_v51 }
 0xa8a   : > { %v7987_v29 = vsub.f32 %v7909_v58, %v2808_v26  ;;  %2866 = vadd.xlane.f32.xlu0 %v2838_v55  ;;  %v2841_v19 = vmul.f32 %v7982_v40, %v7982_v40  ;;  %v7998_v26 = vld [vmem:[%s9198_s7] ss:$0 sm:$0xff] }
 0xa8c   : > { %2872 = vadd.xlane.f32.xlu1 %v2841_v19  ;;  %v2840_v42 = vmul.f32 %v7987_v29, %v7987_v29 }
 0xa8e   : > { %2870 = vadd.xlane.f32.xlu0 %v2840_v42 }
 0xac9   : > { %v2845_v32 = vpop.xlane.xlu1 %2844 }
 0xaca   : > { %v2875_v53 = vmul.f32 0.0078125, %v2845_v32  ;;  %v8004_v32 = vld [vmem:[%s9199_s8] ss:$0 sm:$0xff] }
 0xacb   : > { %v2843_v44 = vpop.xlane.xlu0 %2842 }
 0xacc   : > { %v2891_v63 = vadd.f32 1e-05, %v2875_v53  ;;  %v2874_v5 = vmul.f32 0.0078125, %v2843_v44 }
 0xace   : > { %5779 = vrsqrt.f32 %v2891_v63  ;;  %v2890_v18 = vadd.f32 1e-05, %v2874_v5 }
 0xacf   : > { %v2847_v13 = vpop.xlane.xlu0 %2846  ;;  %v2849_v10 = vpop.xlane.xlu1 %2848 }
 0xad0   : > { %5781 = vrsqrt.f32 %v2890_v18  ;;  %v2876_v54 = vmul.f32 0.0078125, %v2847_v13  ;;  %v2877_v14 = vmul.f32 0.0078125, %v2849_v10 }
 0xad2   : > { %v2892_v20 = vadd.f32 1e-05, %v2876_v54  ;;  %v2893_v60 = vadd.f32 1e-05, %v2877_v14 }
 0xad3   : > { %v2851_v1 = vpop.xlane.xlu0 %2850  ;;  %v2853_v8 = vpop.xlane.xlu1 %2852 }
 0xad4   : > { %5783 = vrsqrt.f32 %v2892_v20  ;;  %v2878_v2 = vmul.f32 0.0078125, %v2851_v1  ;;  %v2879_v27 = vmul.f32 0.0078125, %v2853_v8 }
 0xad5   : > { %5785 = vrsqrt.f32 %v2893_v60 }
 0xad6   : > { %v2894_v3 = vadd.f32 1e-05, %v2878_v2  ;;  %v2895_v46 = vadd.f32 1e-05, %v2879_v27 }
 0xad7   : > { %v2855_v50 = vpop.xlane.xlu0 %2854  ;;  %v2857_v6 = vpop.xlane.xlu1 %2856 }
 0xad8   : > { %5787 = vrsqrt.f32 %v2894_v3  ;;  %v2880_v48 = vmul.f32 0.0078125, %v2855_v50  ;;  %v2881_v62 = vmul.f32 0.0078125, %v2857_v6 }
 0xad9   : > { %5789 = vrsqrt.f32 %v2895_v46 }
 0xada   : > { %v2896_v30 = vadd.f32 1e-05, %v2880_v48  ;;  %v2897_v42 = vadd.f32 1e-05, %v2881_v62 }
 0xadb   : > { %v5780_v49 = vpop.eup %5779 }
 0xadc   : > { %v2923_v45 = vmul.f32 %v5780_v49, %v7914_v33  ;;  %5791 = vrsqrt.f32 %v2896_v30 }
 0xadd   : > { %v5782_v22 = vpop.eup %5781  ;;  %5793 = vrsqrt.f32 %v2897_v42 }
 0xade   : > { %v2922_v25 = vmul.f32 %v5782_v22, %v7917_v21  ;;  %v2945_v53 = vmul.f32 %v7998_v26, %v2923_v45 }
 0xae0   : > { %v2944_v55 = vmul.f32 %v7998_v26, %v2922_v25  ;;  %v2967_v63 = vadd.f32 %v8004_v32, %v2945_v53 }
 0xae1   : > { %v5784_v19 = vpop.eup %5783 }
 0xae2   : > { %v2966_v21 = vadd.f32 %v8004_v32, %v2944_v55  ;;  %v2924_v33 = vmul.f32 %v5784_v19, %v7924_v28  ;;  %v5786_v44 = vpop.eup %5785 }
 0xae3   : > { %v2925_v18 = vmul.f32 %v5786_v44, %v7927_v56 }
 0xae4   : > { %3091 = vmatmul.mubr.f32.vlgmr.msra.gmra.mxu1 %v2966_v21  ;;  %3616 = vmatmul.mubr.f32.vlgmr.msra.gmra.mxu0 %v2966_v21  ;;  %v2946_v5 = vmul.f32 %v7998_v26, %v2924_v33 }
 0xae5   : > { %3096 = vmatprep.mubr.f32.mxu1 %v9405_v41  ;;  %3621 = vmatprep.mubr.f32.mxu0 %v9405_v41  ;;  %v5788_v13 = vpop.eup %5787  ;;  %v2947_v10 = vmul.f32 %v7998_v26, %v2925_v18 }
 0xae6   : > { %v2968_v28 = vadd.f32 %v8004_v32, %v2946_v5  ;;  %v2926_v54 = vmul.f32 %v5788_v13, %v7934_v9  ;;  %v5790_v14 = vpop.eup %5789 }
 0xae7   : > { %v2969_v56 = vadd.f32 %v8004_v32, %v2947_v10  ;;  %v2927_v60 = vmul.f32 %v5790_v14, %v7937_v61 }
 0xae8   : > { %3097 = vmatmul.mubr.f32.gmra.mxu1 %v2967_v63  ;;  %3622 = vmatmul.mubr.f32.gmra.mxu0 %v2967_v63  ;;  %v2948_v20 = vmul.f32 %v7998_v26, %v2926_v54 }
 0xae9   : > { %3102 = vmatprep.mubr.f32.mxu1 %v9405_v41  ;;  %3627 = vmatprep.mubr.f32.mxu0 %v9405_v41  ;;  %v5792_v1 = vpop.eup %5791  ;;  %v2949_v8 = vmul.f32 %v7998_v26, %v2927_v60 }
 0xaea   : > { %v2970_v9 = vadd.f32 %v8004_v32, %v2948_v20  ;;  %v2928_v2 = vmul.f32 %v5792_v1, %v7944_v57  ;;  %v5794_v3 = vpop.eup %5793 }
 0xaeb   : > { %v2971_v61 = vadd.f32 %v8004_v32, %v2949_v8  ;;  %v2929_v50 = vmul.f32 %v5794_v3, %v7947_v24 }
 0xaec   : > { %3103 = vmatmul.mubr.f32.gmra.mxu1 %v2968_v28  ;;  %3628 = vmatmul.mubr.f32.gmra.mxu0 %v2968_v28  ;;  %v2950_v27 = vmul.f32 %v7998_v26, %v2928_v2 }
 0xaed   : > { %3108 = vmatprep.mubr.f32.mxu1 %v9405_v41  ;;  %3633 = vmatprep.mubr.f32.mxu0 %v9405_v41  ;;  %v2951_v46 = vmul.f32 %v7998_v26, %v2929_v50 }
 0xaee   : > { %v2972_v57 = vadd.f32 %v8004_v32, %v2950_v27 }
 0xaef   : > { %v2973_v48 = vadd.f32 %v8004_v32, %v2951_v46 }
 0xaf0   : > { %3109 = vmatmul.mubr.f32.gmra.mxu1 %v2969_v56  ;;  %3634 = vmatmul.mubr.f32.gmra.mxu0 %v2969_v56 }
 0xaf1   : > { %3114 = vmatprep.mubr.f32.mxu1 %v9405_v41  ;;  %3639 = vmatprep.mubr.f32.mxu0 %v9405_v41 }
 0xaf4   : > { %3115 = vmatmul.mubr.f32.gmra.mxu1 %v2970_v9  ;;  %3640 = vmatmul.mubr.f32.gmra.mxu0 %v2970_v9 }
 0xaf5   : > { %3120 = vmatprep.mubr.f32.mxu1 %v9405_v41  ;;  %3645 = vmatprep.mubr.f32.mxu0 %v9405_v41 }
 0xaf8   : > { %3121 = vmatmul.mubr.f32.gmra.mxu1 %v2971_v61  ;;  %3646 = vmatmul.mubr.f32.gmra.mxu0 %v2971_v61 }
 0xaf9   : > { %3126 = vmatprep.mubr.f32.mxu1 %v9405_v41  ;;  %3651 = vmatprep.mubr.f32.mxu0 %v9405_v41 }
 0xafc   : > { %3127 = vmatmul.mubr.f32.gmra.mxu1 %v2972_v57  ;;  %3652 = vmatmul.mubr.f32.gmra.mxu0 %v2972_v57 }
 0xafd   : > { %3132 = vmatprep.mubr.f32.mxu1 %v9405_v41  ;;  %3657 = vmatprep.mubr.f32.mxu0 %v9405_v41 }
 0xb00   : > { %3133 = vmatmul.mubr.f32.gmra.mxu1 %v2973_v48  ;;  %3658 = vmatmul.mubr.f32.gmra.mxu0 %v2973_v48  ;;  %v4031_v48 = vld [vmem:[#allocation13 + $0x1f8] sm:$0xff] }
 0xb01   : > { %3138 = vmatprep.mubr.f32.mxu1 %v9405_v41  ;;  %3663 = vmatprep.mubr.f32.mxu0 %v9405_v41 }
 0xb02   : > { %4924 = vmatprep.subr.mxu1 %v4031_v48  ;;  %v4024_v48 = vld [vmem:[#allocation13 + $0x1c0] sm:$0xff] }
 0xb08   : > { %v2861_v24 = vpop.xlane.xlu1 %2860 }
 0xb09   : > { %v2883_v6 = vmul.f32 0.0078125, %v2861_v24  ;;  %v8054_v24 = vld [vmem:[#allocation13 + $0xf8] sm:$0xff] }
 0xb0a   : > { %v2859_v49 = vpop.xlane.xlu0 %2858  ;;  %5004 = vmatprep.subr.mxu0 %v8054_v24 }
 0xb0b   : > { %v2899_v22 = vadd.f32 1e-05, %v2883_v6  ;;  %v2882_v62 = vmul.f32 0.0078125, %v2859_v49  ;;  %v8058_v6 = vld [vmem:[#allocation13 + $0x78] sm:$0xff] }
 0xb0c   : > { %v2865_v25 = vpop.xlane.xlu1 %2864  ;;  %5005 = vmatpush3.msra.mxu0 %v8058_v6 }
 0xb0d   : > { %5795 = vrsqrt.f32 %v2899_v22  ;;  %v2898_v30 = vadd.f32 1e-05, %v2882_v62  ;;  %v2885_v45 = vmul.f32 0.0078125, %v2865_v25  ;;  %v4030_v25 = vld [vmem:[#allocation13 + $0x1f0] sm:$0xff] }
 0xb0e   : > { %v2863_v55 = vpop.xlane.xlu0 %2862 }
 0xb0f   : > { %5797 = vrsqrt.f32 %v2898_v30  ;;  %v2884_v19 = vmul.f32 0.0078125, %v2863_v55  ;;  %v2901_v42 = vadd.f32 1e-05, %v2885_v45  ;;  %v8065_v30 = vld [vmem:[#allocation13 + $0xf0] sm:$0xff] }
 0xb10   : > { %v4014_v45 = vld [vmem:[#allocation13 + $0x170] sm:$0xff]  ;;  %5006 = vmatprep.subr.mxu0 %v8065_v30 }
 0xb11   : > { %v2900_v21 = vadd.f32 1e-05, %v2884_v19  ;;  %v2869_v53 = vpop.xlane.xlu1 %2868  ;;  %v8067_v55 = vld [vmem:[#allocation13 + $0x70] sm:$0xff] }
 0xb12   : > { %v2887_v63 = vmul.f32 0.0078125, %v2869_v53  ;;  %5007 = vmatpush3.msra.mxu0 %v8067_v55  ;;  %v4029_v53 = vld [vmem:[#allocation13 + $0x1e8] sm:$0xff] }
 0xb13   : > { %5799 = vrsqrt.f32 %v2900_v21  ;;  %v2867_v33 = vpop.xlane.xlu0 %2866 }
 0xb14   : > { %v2886_v44 = vmul.f32 0.0078125, %v2867_v33  ;;  %5801 = vrsqrt.f32 %v2901_v42  ;;  %v2903_v13 = vadd.f32 1e-05, %v2887_v63  ;;  %v8076_v33 = vld [vmem:[#allocation13 + $0xe8] sm:$0xff] }
 0xb15   : > { %v2873_v28 = vpop.xlane.xlu1 %2872  ;;  %9440 = vst [vmem:[#allocation43_spill] sm:$0xff] %v8076_v33  ;;  %v8078_v63 = vld [vmem:[#allocation13 + $0x68] sm:$0xff]  ;;  %5008 = vmatprep.subr.mxu0 %v8076_v33 }
 0xb16   : > { %v2902_v5 = vadd.f32 1e-05, %v2886_v44  ;;  %v2889_v56 = vmul.f32 0.0078125, %v2873_v28  ;;  %v4013_v44 = vld [vmem:[#allocation13 + $0x168] sm:$0xff]  ;;  %9441 = vst [vmem:[#allocation44_spill] sm:$0xff] %v8078_v63  ;;  %5009 = vmatpush3.msra.mxu0 %v8078_v63  ;;  %v4028_v28 = vld [vmem:[#allocation13 + $0x1e0] sm:$0xff] }
 0xb17   : > { %v2871_v18 = vpop.xlane.xlu0 %2870 }
 0xb18   : > { %5803 = vrsqrt.f32 %v2902_v5  ;;  %v2888_v10 = vmul.f32 0.0078125, %v2871_v18  ;;  %v2905_v2 = vadd.f32 1e-05, %v2889_v56 }
 0xb19   : > { %5805 = vrsqrt.f32 %v2903_v13 }
 0xb1a   : > { %v5796_v54 = vpop.eup %5795  ;;  %v2904_v20 = vadd.f32 1e-05, %v2888_v10  ;;  %v8087_v10 = vld [vmem:[#allocation13 + $0xe0] sm:$0xff] }
 0xb1b   : > { %v2931_v1 = vmul.f32 %v5796_v54, %v7954_v31  ;;  %9442 = vst [vmem:[#allocation45_spill] sm:$0xff] %v8087_v10  ;;  %v4012_v54 = vld [vmem:[#allocation13 + $0x160] sm:$0xff]  ;;  %5010 = vmatprep.subr.mxu0 %v8087_v10 }
 0xb1c   : > { %v5798_v14 = vpop.eup %5797  ;;  %5807 = vrsqrt.f32 %v2904_v20 }
 0xb1d   : > { %v2930_v60 = vmul.f32 %v5798_v14, %v7957_v59  ;;  %v2953_v61 = vmul.f32 %v7998_v26, %v2931_v1  ;;  %5809 = vrsqrt.f32 %v2905_v2  ;;  %v8089_v14 = vld [vmem:[#allocation13 + $0x60] sm:$0xff]  ;;  %v8098_v1 = vld [vmem:[#allocation13 + $0xd8] sm:$0xff] }
 0xb1e   : > { %9443 = vst [vmem:[#allocation46_spill] sm:$0xff] %v8089_v14  ;;  %5011 = vmatpush3.msra.mxu0 %v8089_v14  ;;  %9444 = vst [vmem:[#allocation47_spill] sm:$0xff] %v8098_v1 }
 0xb1f   : > { %v2952_v9 = vmul.f32 %v7998_v26, %v2930_v60  ;;  %v2975_v31 = vadd.f32 %v8004_v32, %v2953_v61  ;;  %v4027_v60 = vld [vmem:[#allocation13 + $0x1d8] sm:$0xff]  ;;  %5012 = vmatprep.subr.mxu0 %v8098_v1  ;;  %v8108_v61 = vld [vmem:[#allocation13 + $0xd0] sm:$0xff] }
 0xb20   : > { %v5800_v8 = vpop.eup %5799  ;;  %9446 = vst [vmem:[#allocation49_spill] sm:$0xff] %v8108_v61 }
 0xb21   : > { %v2974_v3 = vadd.f32 %v8004_v32, %v2952_v9  ;;  %v2932_v27 = vmul.f32 %v5800_v8, %v7967_v38  ;;  %v5802_v50 = vpop.eup %5801  ;;  %v4015_v38 = vld [vmem:[#allocation13 + $0x178] sm:$0xff] }
 0xb22   : > { %v2933_v57 = vmul.f32 %v5802_v50, %v7962_v11  ;;  %4925 = vmatpush3.msra.mxu1 %v4015_v38  ;;  %v4011_v9 = vld [vmem:[#allocation13 + $0x158] sm:$0xff]  ;;  %v8110_v50 = vld [vmem:[#allocation13 + $0x50] sm:$0xff]  ;;  %v8121_v38 = vld [vmem:[#allocation13 + $0xc0] sm:$0xff] }
 0xb23   : > { %3139 = vmatmul.mubr.f32.gmra.mxu1 %v2974_v3  ;;  %3664 = vmatmul.mubr.f32.gmra.mxu0 %v2974_v3  ;;  %v2954_v59 = vmul.f32 %v7998_v26, %v2932_v27  ;;  %v8100_v8 = vld [vmem:[#allocation13 + $0x58] sm:$0xff]  ;;  %v4026_v3 = vld [vmem:[#allocation13 + $0x1d0] sm:$0xff]  ;;  %9447 = vst [vmem:[#allocation50_spill] sm:$0xff] %v8110_v50  ;;  %9450 = vst [vmem:[#allocation53_spill] sm:$0xff] %v8121_v38 }
 0xb24   : > { %3144 = vmatprep.mubr.f32.mxu1 %v9405_v41  ;;  %3669 = vmatprep.mubr.f32.mxu0 %v9405_v41  ;;  %v2955_v22 = vmul.f32 %v7998_v26, %v2933_v57  ;;  %9445 = vst [vmem:[#allocation48_spill] sm:$0xff] %v8100_v8  ;;  %v4010_v27 = vld [vmem:[#allocation13 + $0x150] sm:$0xff]  ;;  %v4009_v57 = vld [vmem:[#allocation13 + $0x148] sm:$0xff] }
 0xb25   : > { %v5804_v46 = vpop.eup %5803  ;;  %v2976_v49 = vadd.f32 %v8004_v32, %v2954_v59  ;;  %4926 = vmatprep.subr.mxu1 %v4030_v25  ;;  %5013 = vmatpush3.msra.mxu0 %v8100_v8  ;;  %v8116_v59 = vld [vmem:[#allocation13 + $0xc8] sm:$0xff]  ;;  %v4022_v25 = vld [vmem:[#allocation13 + $0x1b0] sm:$0xff] }
 0xb26   : > { %v2934_v62 = vmul.f32 %v5804_v46, %v7977_v51  ;;  %v5806_v11 = vpop.eup %5805  ;;  %v2977_v51 = vadd.f32 %v8004_v32, %v2955_v22  ;;  %4927 = vmatpush3.msra.mxu1 %v4014_v45  ;;  %5014 = vmatprep.subr.mxu0 %v8108_v61  ;;  %9448 = vst [vmem:[#allocation51_spill] sm:$0xff] %v8116_v59  ;;  %v8119_v46 = vld [vmem:[#allocation13 + $0x48] sm:$0xff]  ;;  %v8127_v22 = vld [vmem:[#allocation13 + $0xb8] sm:$0xff]  ;;  %v8133_v45 = vld [vmem:[#allocation13 + $0xb0] sm:$0xff] }
 0xb27   : > { %3145 = vmatmul.mubr.f32.gmra.mxu1 %v2975_v31  ;;  %3670 = vmatmul.mubr.f32.gmra.mxu0 %v2975_v31  ;;  %v2935_v42 = vmul.f32 %v5806_v11, %v7974_v12  ;;  %v4025_v31 = vld [vmem:[#allocation13 + $0x1c8] sm:$0xff]  ;;  %9449 = vst [vmem:[#allocation52_spill] sm:$0xff] %v8119_v46  ;;  %9452 = vst [vmem:[#allocation55_spill] sm:$0xff] %v8127_v22  ;;  %v8130_v11 = vld [vmem:[#allocation13 + $0x38] sm:$0xff] }
 0xb28   : > { %3150 = vmatprep.mubr.f32.mxu1 %v9405_v41  ;;  %3675 = vmatprep.mubr.f32.mxu0 %v9405_v41  ;;  %v2956_v19 = vmul.f32 %v7998_v26, %v2934_v62  ;;  %v4007_v62 = vld [vmem:[#allocation13 + $0x138] sm:$0xff]  ;;  %9453 = vst [vmem:[#allocation56_spill] sm:$0xff] %v8130_v11  ;;  %9454 = vst [vmem:[#allocation57_spill] sm:$0xff] %v8133_v45 }
 0xb29   : > { %v5808_v21 = vpop.eup %5807  ;;  %v2957_v5 = vmul.f32 %v7998_v26, %v2935_v42  ;;  %4928 = vmatprep.subr.mxu1 %v4029_v53  ;;  %5015 = vmatpush3.msra.mxu0 %v8110_v50  ;;  %v4021_v42 = vld [vmem:[#allocation13 + $0x1a8] sm:$0xff] }
 0xb2a   : > { %v2978_v12 = vadd.f32 %v8004_v32, %v2956_v19  ;;  %v2936_v18 = vmul.f32 %v5808_v21, %v7987_v29  ;;  %v5810_v13 = vpop.eup %5809  ;;  %4929 = vmatpush3.msra.mxu1 %v4013_v44  ;;  %5016 = vmatprep.subr.mxu0 %v8116_v59  ;;  %v8136_v19 = vld [vmem:[#allocation13 + $0x30] sm:$0xff]  ;;  %v8139_v21 = vld [vmem:[#allocation13 + $0xa8] sm:$0xff] }
 0xb2b   : > { %3151 = vmatmul.mubr.f32.gmra.mxu1 %v2976_v49  ;;  %3676 = vmatmul.mubr.f32.gmra.mxu0 %v2976_v49  ;;  %v2979_v29 = vadd.f32 %v8004_v32, %v2957_v5  ;;  %v2937_v20 = vmul.f32 %v5810_v13, %v7982_v40  ;;  %v4023_v49 = vld [vmem:[#allocation13 + $0x1b8] sm:$0xff]  ;;  %9455 = vst [vmem:[#allocation58_spill] sm:$0xff] %v8136_v19  ;;  %9456 = vst [vmem:[#allocation59_spill] sm:$0xff] %v8139_v21  ;;  %v4005_v53 = vld [vmem:[#allocation13 + $0x128] sm:$0xff] }
 0xb2c   : > { %3156 = vmatprep.mubr.f32.mxu1 %v9405_v41  ;;  %3681 = vmatprep.mubr.f32.mxu0 %v9405_v41  ;;  %v2958_v56 = vmul.f32 %v7998_v26, %v2936_v18  ;;  %v8142_v44 = vld [vmem:[#allocation13 + $0x28] sm:$0xff]  ;;  %v8145_v5 = vld [vmem:[#allocation13 + $0xa0] sm:$0xff] }
 0xb2d   : > { %4930 = vmatprep.subr.mxu1 %v4028_v28  ;;  %v2959_v2 = vmul.f32 %v7998_v26, %v2937_v20  ;;  %5017 = vmatpush3.msra.mxu0 %v8119_v46  ;;  %9457 = vst [vmem:[#allocation60_spill] sm:$0xff] %v8142_v44  ;;  %9458 = vst [vmem:[#allocation61_spill] sm:$0xff] %v8145_v5  ;;  %v4004_v18 = vld [vmem:[#allocation13 + $0x120] sm:$0xff]  ;;  %v4019_v28 = vld [vmem:[#allocation13 + $0x198] sm:$0xff] }
 0xb2e   : > { %4931 = vmatpush3.msra.mxu1 %v4012_v54  ;;  %v2980_v40 = vadd.f32 %v8004_v32, %v2958_v56  ;;  %5018 = vmatprep.subr.mxu0 %v8121_v38  ;;  %v8148_v13 = vld [vmem:[#allocation13 + $0x20] sm:$0xff]  ;;  %v8151_v54 = vld [vmem:[#allocation13 + $0x98] sm:$0xff]  ;;  %v4018_v20 = vld [vmem:[#allocation13 + $0x190] sm:$0xff] }
 0xb2f   : > { %3157 = vmatmul.mubr.f32.gmra.mxu1 %v2977_v51  ;;  %3682 = vmatmul.mubr.f32.gmra.mxu0 %v2977_v51  ;;  %v2981_v26 = vadd.f32 %v8004_v32, %v2959_v2  ;;  %v8124_v32 = vld [vmem:[#allocation13 + $0x40] sm:$0xff]  ;;  %v4006_v51 = vld [vmem:[#allocation13 + $0x130] sm:$0xff]  ;;  %9459 = vst [vmem:[#allocation62_spill] sm:$0xff] %v8148_v13  ;;  %9460 = vst [vmem:[#allocation63_spill] sm:$0xff] %v8151_v54 }
 0xb30   : > { %3162 = vmatprep.mubr.f32.mxu1 %v9405_v41  ;;  %3687 = vmatprep.mubr.f32.mxu0 %v9405_v41  ;;  %9451 = vst [vmem:[#allocation54_spill] sm:$0xff] %v8124_v32  ;;  %v8154_v56 = vld [vmem:[#allocation13 + $0x18] sm:$0xff]  ;;  %v4017_v2 = vld [vmem:[#allocation13 + $0x188] sm:$0xff] }
 0xb31   : > { %4932 = vmatprep.subr.mxu1 %v4027_v60  ;;  %5019 = vmatpush3.msra.mxu0 %v8124_v32  ;;  %9461 = vst [vmem:[#allocation64_spill] sm:$0xff] %v8154_v56  ;;  %v8157_v60 = vld [vmem:[#allocation13 + $0x90] sm:$0xff] }
 0xb32   : > { %4933 = vmatpush3.msra.mxu1 %v4011_v9  ;;  %5020 = vmatprep.subr.mxu0 %v8127_v22  ;;  %9462 = vst [vmem:[#allocation65_spill] sm:$0xff] %v8157_v60  ;;  %v4002_v9 = vld [vmem:[#allocation13 + $0x110] sm:$0xff] }
 0xb33   : > { %3163 = vmatmul.mubr.f32.gmra.mxu1 %v2978_v12  ;;  %3688 = vmatmul.mubr.f32.gmra.mxu0 %v2978_v12  ;;  %v4020_v12 = vld [vmem:[#allocation13 + $0x1a0] sm:$0xff] }
 0xb34   : > { %3168 = vmatprep.mubr.f32.mxu1 %v9405_v41  ;;  %3693 = vmatprep.mubr.f32.mxu0 %v9405_v41 }
 0xb35   : > { %4934 = vmatprep.subr.mxu1 %v4026_v3  ;;  %5021 = vmatpush3.msra.mxu0 %v8130_v11  ;;  %v8163_v3 = vld [vmem:[#allocation13 + $0x88] sm:$0xff] }
 0xb36   : > { %4935 = vmatpush3.msra.mxu1 %v4010_v27  ;;  %5022 = vmatprep.subr.mxu0 %v8133_v45  ;;  %9464 = vst [vmem:[#allocation67_spill] sm:$0xff] %v8163_v3  ;;  %v4001_v27 = vld [vmem:[#allocation13 + $0x108] sm:$0xff] }
 0xb37   : > { %3169 = vmatmul.mubr.f32.gmra.mxu1 %v2979_v29  ;;  %3694 = vmatmul.mubr.f32.gmra.mxu0 %v2979_v29  ;;  %v4003_v29 = vld [vmem:[#allocation13 + $0x118] sm:$0xff] }
 0xb38   : > { %3174 = vmatprep.mubr.f32.mxu1 %v9405_v41  ;;  %3699 = vmatprep.mubr.f32.mxu0 %v9405_v41 }
 0xb39   : > { %4936 = vmatprep.subr.mxu1 %v4025_v31  ;;  %5023 = vmatpush3.msra.mxu0 %v8136_v19  ;;  %v4016_v31 = vld [vmem:[#allocation13 + $0x180] sm:$0xff] }
 0xb3a   : > { %4937 = vmatpush3.msra.mxu1 %v4009_v57  ;;  %5024 = vmatprep.subr.mxu0 %v8139_v21  ;;  %v8169_v57 = vld [vmem:[#allocation13 + $0x80] sm:$0xff] }
 0xb3b   : > { %3175 = vmatmul.mubr.f32.gmra.mxu1 %v2980_v40  ;;  %3700 = vmatmul.mubr.f32.gmra.mxu0 %v2980_v40  ;;  %v8160_v40 = vld [vmem:[#allocation13 + $0x10] sm:$0xff]  ;;  %9466 = vst [vmem:[#allocation69_spill] sm:$0xff] %v8169_v57 }
 0xb3c   : > { %3180 = vmatprep.mubr.f32.mxu1 %v9405_v41  ;;  %3705 = vmatprep.mubr.f32.mxu0 %v9405_v41  ;;  %v4008_v41 = vld [vmem:[#allocation13 + $0x140] sm:$0xff]  ;;  %9463 = vst [vmem:[#allocation66_spill] sm:$0xff] %v8160_v40 }
 0xb3d   : > { %4938 = vmatprep.subr.mxu1 %v4024_v48  ;;  %5025 = vmatpush3.msra.mxu0 %v8142_v44  ;;  %v4000_v48 = vld [vmem:[#allocation13 + $0x100] sm:$0xff] }
 0xb3e   : > { %4939 = vmatpush3.msra.mxu1 %v4008_v41  ;;  %5026 = vmatprep.subr.mxu0 %v8145_v5  ;;  %v8172_v41 = vld [vmem:[#allocation13] sm:$0xff] }
 0xb3f   : > { %3181 = vmatmul.mubr.f32.gmra.mxu1 %v2981_v26  ;;  %3706 = vmatmul.mubr.f32.gmra.mxu0 %v2981_v26  ;;  %v8166_v26 = vld [vmem:[#allocation13 + $0x8] sm:$0xff]  ;;  %9467 = vst [vmem:[#allocation70_spill] sm:$0xff] %v8172_v41 }
 0xb40   : > { %4940 = vmatprep.subr.mxu1 %v4023_v49  ;;  %5027 = vmatpush3.msra.mxu0 %v8148_v13  ;;  %9465 = vst [vmem:[#allocation68_spill] sm:$0xff] %v8166_v26  ;;  %v3014_v49 = vld [vmem:[%s9201_s10] sm:$0x3] }
 0xb41   : > { %4941 = vmatpush3.msra.mxu1 %v4007_v62  ;;  %5028 = vmatprep.subr.mxu0 %v8151_v54  ;;  %v3539_v62 = vld [vmem:[%s9201_s10 + $0x2] sm:$0x3] }
 0xb42   : > { %4942 = vmatprep.subr.mxu1 %v4022_v25  ;;  %5029 = vmatpush3.msra.mxu0 %v8154_v56  ;;  %v9468_v25 = vld [vmem:[#allocation26_spill] sm:$0xff] }
 0xb43   : > { %4943 = vmatpush3.msra.mxu1 %v4006_v51  ;;  %5030 = vmatprep.subr.mxu0 %v8157_v60  ;;  %v8185_v51 = vrot.slane %v3014_v49, %v9468_v25 }
 0xb44   : > { %4944 = vmatprep.subr.mxu1 %v4021_v42  ;;  %5031 = vmatpush3.msra.mxu0 %v8160_v40  ;;  %v8188_v42 = vrot.slane %v3539_v62, %v9468_v25 }
 0xb45   : > { %4945 = vmatpush3.msra.mxu1 %v4005_v53  ;;  %5032 = vmatprep.subr.mxu0 %v8163_v3  ;;  %9469 = vst [vmem:[#allocation26_spill] sm:$0xff] %v8185_v51 }
 0xb46   : > { %4946 = vmatprep.subr.mxu1 %v4020_v12  ;;  %5033 = vmatpush3.msra.mxu0 %v8166_v26  ;;  %9470 = vst [vmem:[#allocation71_spill] sm:$0xff] %v8188_v42 }
 0xb47   : > { %4947 = vmatpush3.msra.mxu1 %v4004_v18  ;;  %5034 = vmatprep.subr.mxu0 %v8169_v57 }
 0xb48   : > { %4948 = vmatprep.subr.mxu1 %v4019_v28  ;;  %5035 = vmatpush3.msra.mxu0 %v8172_v41  ;;  %v9471_v28 = vld [vmem:[#allocation27_spill] sm:$0xff] }
 0xb49   : > { %4949 = vmatpush3.msra.mxu1 %v4003_v29  ;;  %v8193_v29 = vrot.slane %v3539_v62, %v9471_v28 }
 0xb4a   : > { %4950 = vmatprep.subr.mxu1 %v4018_v20  ;;  %v8196_v20 = vrot.slane %v3014_v49, %v9471_v28 }
 0xb4b   : > { %4951 = vmatpush3.msra.mxu1 %v4002_v9  ;;  %9472 = vst [vmem:[#allocation27_spill] sm:$0xff] %v8193_v29 }
 0xb4c   : > { %4952 = vmatprep.subr.mxu1 %v4017_v2  ;;  %9473 = vst [vmem:[#allocation72_spill] sm:$0xff] %v8196_v20 }
 0xb4d   : > { %4953 = vmatpush3.msra.mxu1 %v4001_v27 }
 0xb4e   : > { %4954 = vmatprep.subr.mxu1 %v4016_v31 }
 0xb4f   : > { %4955 = vmatpush3.msra.mxu1 %v4000_v48 }
 0xb50   : > { %5420 = vmatprep.subr.mxu1 %v8054_v24 }
 0xba4   : > { %v3092_v53 = vpop.f32.mrf.mxu1  ;;  %v3617_v12 = vpop.f32.mrf.mxu0 }
 0xba5   : > { %v3093_v18 = vadd.f32 %v3092_v53, %v8185_v51  ;;  %v3618_v24 = vadd.f32 %v3617_v12, %v8188_v42 }
 0xba6   : > { %v3094_v9 = vpop.f32.mrf.mxu1  ;;  %v3619_v2 = vpop.f32.mrf.mxu0 }
 0xba7   : > { %v3219_v27 = vmul.f32 0.044715, %v3093_v18  ;;  %v3744_v31 = vmul.f32 0.044715, %v3618_v24  ;;  %v8199_v43 = vadd.f32 %v3619_v2, %v8193_v29  ;;  %v8205_v62 = vadd.f32 %v3094_v9, %v8196_v20 }
 0xba8   : > { %v3098_v48 = vpop.f32.mrf.mxu1  ;;  %v3623_v23 = vpop.f32.mrf.mxu0  ;;  %v8211_v34 = vmul.f32 0.5, %v3093_v18  ;;  %v8217_v9 = vmul.f32 0.5, %v3618_v24 }
 0xba9   : > { %v3251_v25 = vmul.f32 %v3219_v27, %v3093_v18  ;;  %v3776_v58 = vmul.f32 %v3744_v31, %v3618_v24  ;;  %v8202_v53 = vadd.f32 %v3098_v48, %v8185_v51  ;;  %v8209_v37 = vadd.f32 %v3623_v23, %v8188_v42 }
 0xbaa   : > { %v3100_v12 = vpop.f32.mrf.mxu1  ;;  %v3625_v49 = vpop.f32.mrf.mxu0  ;;  %v3745_v48 = vmul.f32 0.044715, %v8199_v43 }
 0xbab   : > { %9474 = vst [vmem:[#allocation73_spill] sm:$0xff] %v8202_v53  ;;  %v3283_v28 = vmul.f32 %v3251_v25, %v3093_v18  ;;  %v3221_v35 = vmul.f32 0.044715, %v8202_v53  ;;  %v3808_v4 = vmul.f32 %v3776_v58, %v3618_v24  ;;  %v8215_v15 = vadd.f32 %v3100_v12, %v8196_v20 }
 0xbac   : > { %v3104_v27 = vpop.f32.mrf.mxu1  ;;  %v3629_v31 = vpop.f32.mrf.mxu0  ;;  %v3220_v25 = vmul.f32 0.044715, %v8205_v62  ;;  %v8221_v47 = vadd.f32 %v3625_v49, %v8193_v29  ;;  %v8231_v12 = vmul.f32 0.5, %v8205_v62  ;;  %v3746_v16 = vmul.f32 0.044715, %v8209_v37 }
 0xbad   : > { %v3315_v2 = vadd.f32 %v3283_v28, %v3093_v18  ;;  %v8224_v23 = vadd.f32 %v3104_v27, %v8185_v51  ;;  %v3253_v18 = vmul.f32 %v3221_v35, %v8202_v53  ;;  %v8228_v28 = vmul.f32 0.5, %v8199_v43 }
 0xbae   : > { %v3106_v58 = vpop.f32.mrf.mxu1  ;;  %v3631_v39 = vpop.f32.mrf.mxu0  ;;  %9476 = vst [vmem:[#allocation75_spill] sm:$0xff] %v8231_v12  ;;  %v3840_v36 = vadd.f32 %v3808_v4, %v3618_v24  ;;  %v8236_v7 = vadd.f32 %v3629_v31, %v8188_v42  ;;  %v3222_v35 = vmul.f32 0.044715, %v8215_v15  ;;  %v3747_v4 = vmul.f32 0.044715, %v8221_v47 }
 0xbaf   : > { %9475 = vst [vmem:[#allocation74_spill] sm:$0xff] %v8224_v23  ;;  %v3347_v17 = vmul.f32 0.7978846, %v3315_v2  ;;  %v3223_v49 = vmul.f32 0.044715, %v8224_v23  ;;  %v3777_v2 = vmul.f32 %v3745_v48, %v8199_v43  ;;  %v8241_v0 = vadd.f32 %v3106_v58, %v8196_v20 }
 0xbb0   : > { %v3110_v27 = vpop.f32.mrf.mxu1  ;;  %v3635_v52 = vpop.f32.mrf.mxu0  ;;  %v8244_v41 = vadd.f32 %v3631_v39, %v8193_v29  ;;  %v8252_v48 = vmul.f32 %v3220_v25, %v8205_v62  ;;  %v3285_v3 = vmul.f32 %v3253_v18, %v8202_v53  ;;  %v8262_v40 = vmul.f32 %v3746_v16, %v8209_v37 }
 0xbb1   : > { %5811 = vtanh.f32 %v3347_v17  ;;  %v3255_v24 = vmul.f32 %v3223_v49, %v8224_v23  ;;  %v8249_v31 = vadd.f32 %v3110_v27, %v8185_v51  ;;  %v8256_v58 = vadd.f32 %v3635_v52, %v8188_v42 }
 0xbb2   : > { %v3112_v57 = vpop.f32.mrf.mxu1  ;;  %v3637_v26 = vpop.f32.mrf.mxu0  ;;  %v3872_v17 = vmul.f32 0.7978846, %v3840_v36  ;;  %v3748_v49 = vmul.f32 0.044715, %v8236_v7  ;;  %v8267_v25 = vmul.f32 %v3222_v35, %v8215_v15  ;;  %v3224_v18 = vmul.f32 0.044715, %v8241_v0 }
 0xbb3   : > { %9477 = vst [vmem:[#allocation76_spill] sm:$0xff] %v8249_v31  ;;  %v8259_v39 = vadd.f32 %v3112_v57, %v8196_v20  ;;  %v3225_v27 = vmul.f32 0.044715, %v8249_v31  ;;  %v3749_v52 = vmul.f32 0.044715, %v8244_v41  ;;  %v8275_v36 = vmul.f32 %v3747_v4, %v8221_v47 }
 0xbb4   : > { %v3116_v60 = vpop.f32.mrf.mxu1  ;;  %v3641_v56 = vpop.f32.mrf.mxu0  ;;  %v3287_v16 = vmul.f32 %v3255_v24, %v8224_v23  ;;  %v8279_v54 = vadd.f32 %v3637_v26, %v8193_v29  ;;  %v3809_v35 = vmul.f32 %v3777_v2, %v8199_v43  ;;  %v8283_v44 = vadd.f32 %v3285_v3, %v8202_v53 }
 0xbb5   : > { %v8272_v57 = vadd.f32 %v3116_v60, %v8185_v51  ;;  %v3750_v21 = vmul.f32 0.044715, %v8256_v58  ;;  %v3226_v60 = vmul.f32 0.044715, %v8259_v39  ;;  %5813 = vtanh.f32 %v3872_v17 }
 0xbb6   : > { %v3118_v13 = vpop.f32.mrf.mxu1  ;;  %v3643_v5 = vpop.f32.mrf.mxu0  ;;  %v8289_v4 = vmul.f32 %v3748_v49, %v8236_v7  ;;  %v3257_v26 = vmul.f32 %v3225_v27, %v8249_v31  ;;  %v8293_v24 = vadd.f32 %v3641_v56, %v8188_v42  ;;  %v8296_v3 = vmul.f32 %v3224_v18, %v8241_v0 }
 0xbb7   : > { %9478 = vst [vmem:[#allocation77_spill] sm:$0xff] %v8272_v57  ;;  %v3227_v19 = vmul.f32 0.044715, %v8272_v57  ;;  %v8299_v11 = vmul.f32 %v3749_v52, %v8244_v41  ;;  %v8302_v22 = vadd.f32 %v3118_v13, %v8196_v20  ;;  %v8308_v49 = vadd.f32 %v3287_v16, %v8224_v23 }
 0xbb8   : > { %9479 = vst [vmem:[#allocation78_spill] sm:$0xff] %v8293_v24  ;;  %v3122_v45 = vpop.f32.mrf.mxu1  ;;  %v3647_v2 = vpop.f32.mrf.mxu0  ;;  %v3751_v56 = vmul.f32 0.044715, %v8279_v54  ;;  %v8312_v27 = vadd.f32 %v3643_v5, %v8193_v29  ;;  %v3841_v38 = vadd.f32 %v3809_v35, %v8199_v43  ;;  %v8316_v52 = vmul.f32 %v3750_v21, %v8256_v58 }
 0xbb9   : > { %9480 = vst [vmem:[#allocation79_spill] sm:$0xff] %v8302_v22  ;;  %v8305_v17 = vadd.f32 %v3122_v45, %v8185_v51  ;;  %v8319_v13 = vmul.f32 %v3226_v60, %v8259_v39  ;;  %v3259_v45 = vmul.f32 %v3227_v19, %v8272_v57  ;;  %v3289_v46 = vmul.f32 %v3257_v26, %v8249_v31 }
 0xbba   : > { %v3124_v32 = vpop.f32.mrf.mxu1  ;;  %v3649_v18 = vpop.f32.mrf.mxu0  ;;  %v3752_v59 = vmul.f32 0.044715, %v8293_v24  ;;  %v8326_v5 = vadd.f32 %v3647_v2, %v8188_v42  ;;  %v3873_v43 = vmul.f32 0.7978846, %v3841_v38  ;;  %v3228_v21 = vmul.f32 0.044715, %v8302_v22 }
 0xbbb   : > { %9481 = vst [vmem:[#allocation80_spill] sm:$0xff] %v8305_v17  ;;  %v3229_v16 = vmul.f32 0.044715, %v8305_v17  ;;  %v8330_v35 = vadd.f32 %v3124_v32, %v8196_v20  ;;  %v8333_v60 = vadd.f32 %v3649_v18, %v8193_v29  ;;  %v3753_v26 = vmul.f32 0.044715, %v8312_v27 }
 0xbbc   : > { %v3128_v50 = vpop.f32.mrf.mxu1  ;;  %v3653_v61 = vpop.f32.mrf.mxu0  ;;  %5815 = vtanh.f32 %v3873_v43  ;;  %v8344_v32 = vmul.f32 %v3751_v56, %v8279_v54  ;;  %v3291_v18 = vmul.f32 %v3259_v45, %v8272_v57  ;;  %v8352_v14 = vadd.f32 %v3289_v46, %v8249_v31 }
 0xbbd   : > { %v8336_v19 = vadd.f32 %v3128_v50, %v8185_v51  ;;  %v3261_v23 = vmul.f32 %v3229_v16, %v8305_v17  ;;  %v8341_v2 = vadd.f32 %v3653_v61, %v8188_v42  ;;  %v8355_v61 = vmul.f32 %v3752_v59, %v8293_v24 }
 0xbbe   : > { %v3130_v8 = vpop.f32.mrf.mxu1  ;;  %v3655_v38 = vpop.f32.mrf.mxu0  ;;  %v3754_v16 = vmul.f32 0.044715, %v8326_v5  ;;  %v8362_v45 = vmul.f32 %v3228_v21, %v8302_v22  ;;  %v3230_v63 = vmul.f32 0.044715, %v8330_v35  ;;  %v8368_v59 = vmul.f32 %v3753_v26, %v8312_v27 }
 0xbbf   : > { %9482 = vst [vmem:[#allocation81_spill] sm:$0xff] %v8336_v19  ;;  %v5812_v12 = vpop.eup %5811  ;;  %v3231_v1 = vmul.f32 0.044715, %v8336_v19  ;;  %v8349_v50 = vadd.f32 %v3130_v8, %v8196_v20  ;;  %9483 = vst [vmem:[#allocation82_spill] sm:$0xff] %v8355_v61  ;;  %v8359_v43 = vadd.f32 %v3655_v38, %v8193_v29  ;;  %v3755_v8 = vmul.f32 0.044715, %v8333_v60 }
 0xbc0   : > { %v3134_v56 = vpop.f32.mrf.mxu1  ;;  %v3659_v10 = vpop.f32.mrf.mxu0  ;;  %9484 = vst [vmem:[#allocation83_spill] sm:$0xff] %v8362_v45  ;;  %v3411_v31 = vadd.f32 1.0, %v5812_v12  ;;  %v3293_v61 = vmul.f32 %v3261_v23, %v8305_v17  ;;  %v3756_v38 = vmul.f32 0.044715, %v8341_v2  ;;  %v8373_v53 = vadd.f32 %v3291_v18, %v8272_v57 }
 0xbc1   : > { %v3263_v46 = vmul.f32 %v3231_v1, %v8336_v19  ;;  %v3232_v21 = vmul.f32 0.044715, %v8349_v50  ;;  %v3757_v45 = vmul.f32 0.044715, %v8359_v43  ;;  %v8378_v22 = vadd.f32 %v3134_v56, %v8185_v51 }
 0xbc2   : > { %v3136_v24 = vpop.f32.mrf.mxu1  ;;  %v3661_v33 = vpop.f32.mrf.mxu0  ;;  %9485 = vst [vmem:[#allocation84_spill] sm:$0xff] %v8373_v53  ;;  %v8381_v1 = vmul.f32 %v3754_v16, %v8326_v5  ;;  %v8385_v23 = vadd.f32 %v3659_v10, %v8188_v42  ;;  %v3284_v26 = vmul.f32 %v8252_v48, %v8205_v62  ;;  %v8390_v57 = vmul.f32 %v3230_v63, %v8330_v35 }
 0xbc3   : > { %v3295_v12 = vmul.f32 %v3263_v46, %v8336_v19  ;;  %v5814_v18 = vpop.eup %5813  ;;  %v8393_v53 = vmul.f32 %v3755_v8, %v8333_v60  ;;  %v8396_v56 = vadd.f32 %v3136_v24, %v8196_v20  ;;  %v8399_v16 = vadd.f32 %v3661_v33, %v8193_v29 }
 0xbc4   : > { %v8402_v46 = vmul.f32 %v3411_v31, %v8211_v34  ;;  %v8405_v10 = vadd.f32 %v3293_v61, %v8305_v17  ;;  %v8408_v48 = vmul.f32 %v3756_v38, %v8341_v2  ;;  %v3316_v63 = vadd.f32 %v3284_v26, %v8205_v62 }
 0xbc5   : > { %v8412_v8 = vmul.f32 %v3232_v21, %v8349_v50  ;;  %v8415_v24 = vmul.f32 %v3757_v45, %v8359_v43  ;;  %v3233_v33 = vmul.f32 0.044715, %v8378_v22  ;;  %v3811_v34 = vmul.f32 %v8275_v36, %v8221_v47 }
 0xbc6   : > { %v8421_v31 = vadd.f32 %v3295_v12, %v8336_v19  ;;  %v3758_v61 = vmul.f32 0.044715, %v8385_v23  ;;  %v3348_v38 = vmul.f32 0.7978846, %v3316_v63  ;;  %v3286_v62 = vmul.f32 %v8267_v25, %v8215_v15 }
 0xbc7   : > { %v3234_v21 = vmul.f32 0.044715, %v8396_v56  ;;  %v3759_v26 = vmul.f32 0.044715, %v8399_v16  ;;  %v3843_v45 = vadd.f32 %v3811_v34, %v8221_v47  ;;  %v3810_v29 = vmul.f32 %v8262_v40, %v8209_v37 }
 0xbc8   : > { %5817 = vtanh.f32 %v3348_v38  ;;  %v3936_v36 = vadd.f32 1.0, %v5814_v18  ;;  %v3318_v12 = vadd.f32 %v3286_v62, %v8215_v15  ;;  %v3349_v19 = vmul.f32 0.7978846, %v8283_v44 }
 0xbc9   : > { %v5816_v20 = vpop.eup %5815  ;;  %v3265_v63 = vmul.f32 %v3233_v33, %v8378_v22  ;;  %v3875_v42 = vmul.f32 0.7978846, %v3843_v45  ;;  %v3842_v25 = vadd.f32 %v3810_v29, %v8209_v37  ;;  %v3813_v17 = vmul.f32 %v8299_v11, %v8244_v41 }
 0xbca   : > { %v8438_v34 = vmul.f32 %v3758_v61, %v8385_v23  ;;  %v3937_v51 = vadd.f32 1.0, %v5816_v20  ;;  %v3350_v40 = vmul.f32 0.7978846, %v3318_v12  ;;  %5819 = vtanh.f32 %v3349_v19 }
 0xbcb   : > { %5821 = vtanh.f32 %v3875_v42  ;;  %v3874_v18 = vmul.f32 0.7978846, %v3842_v25  ;;  %v3845_v38 = vadd.f32 %v3813_v17, %v8244_v41  ;;  %v3288_v44 = vmul.f32 %v8296_v3, %v8241_v0 }
 0xbcc   : > { %v3969_v33 = vmul.f32 %v3937_v51, %v8228_v28  ;;  %v8445_v29 = vmul.f32 0.5, %v8221_v47  ;;  %5823 = vtanh.f32 %v3350_v40  ;;  %v3812_v11 = vmul.f32 %v8289_v4, %v8236_v7  ;;  %v9489_v40 = vld [vmem:[#allocation83_spill] sm:$0xff] }
 0xbcd   : > { %v3968_v20 = vmul.f32 %v3936_v36, %v8217_v9  ;;  %5825 = vtanh.f32 %v3874_v18  ;;  %v3877_v19 = vmul.f32 0.7978846, %v3845_v38  ;;  %v3320_v42 = vadd.f32 %v3288_v44, %v8241_v0  ;;  %v9491_v38 = vld [vmem:[#allocation82_spill] sm:$0xff]  ;;  %v9492_v44 = vld [vmem:[#allocation44_spill] sm:$0xff] }
 0xbce   : > { %v8452_v17 = vmul.f32 %v3234_v21, %v8396_v56  ;;  %4096 = vmatprep.mubr.f32.mxu1 %v3969_v33  ;;  %v3844_v3 = vadd.f32 %v3812_v11, %v8236_v7  ;;  %v3351_v51 = vmul.f32 0.7978846, %v8308_v49  ;;  %v3815_v47 = vmul.f32 %v8344_v32, %v8279_v54 }
 0xbcf   : > { %v8459_v28 = vmul.f32 %v3759_v26, %v8399_v16  ;;  %4097 = vmatmul.mubr.f32.vlgmr.msra.gmra.mxu1 %v3968_v20  ;;  %5827 = vtanh.f32 %v3877_v19  ;;  %v3352_v9 = vmul.f32 0.7978846, %v3320_v42  ;;  %v3290_v4 = vmul.f32 %v8319_v13, %v8259_v39  ;;  %v9493_v19 = vld [vmem:[#allocation45_spill] sm:$0xff] }
 0xbd0   : > { %v8464_v61 = vmul.f32 %v3265_v63, %v8378_v22  ;;  %v3876_v62 = vmul.f32 0.7978846, %v3844_v3  ;;  %5829 = vtanh.f32 %v3351_v51  ;;  %v3847_v21 = vadd.f32 %v3815_v47, %v8279_v54  ;;  %5436 = vmatpush3.msra.mxu1 %v8058_v6  ;;  %v9486_v6 = vld [vmem:[#allocation73_spill] sm:$0xff]  ;;  %v9494_v51 = vld [vmem:[#allocation46_spill] sm:$0xff] }
 0xbd1   : > { %v8469_v49 = vmul.f32 0.5, %v8215_v15  ;;  %5831 = vtanh.f32 %v3352_v9  ;;  %v3322_v32 = vadd.f32 %v3290_v4, %v8259_v39  ;;  %v3814_v26 = vmul.f32 %v8316_v52, %v8256_v58  ;;  %5421 = vmatprep.subr.mxu1 %v8065_v30  ;;  %v9487_v52 = vld [vmem:[#allocation43_spill] sm:$0xff]  ;;  %v9495_v4 = vld [vmem:[#allocation84_spill] sm:$0xff] }
 0xbd2   : > { %v8476_v13 = vmul.f32 0.5, %v8209_v37  ;;  %5833 = vtanh.f32 %v3876_v62  ;;  %v3879_v45 = vmul.f32 0.7978846, %v3847_v21  ;;  %v3353_v36 = vmul.f32 0.7978846, %v8352_v14  ;;  %5437 = vmatpush3.msra.mxu1 %v8067_v55  ;;  %v9488_v37 = vld [vmem:[#allocation79_spill] sm:$0xff] }
 0xbd3   : > { %v3189_v15 = vmul.f32 0.5, %v9486_v6  ;;  %v3354_v12 = vmul.f32 0.7978846, %v3322_v32  ;;  %v3846_v63 = vadd.f32 %v3814_v26, %v8256_v58  ;;  %v3817_v25 = vmul.f32 %v8368_v59, %v8312_v27  ;;  %5422 = vmatprep.subr.mxu1 %v9487_v52  ;;  %v9490_v14 = vld [vmem:[#allocation78_spill] sm:$0xff]  ;;  %v9496_v21 = vld [vmem:[#allocation47_spill] sm:$0xff] }
 0xbd4   : > { %v8486_v30 = vmul.f32 0.5, %v8244_v41  ;;  %5835 = vtanh.f32 %v3879_v45  ;;  %v3292_v18 = vmul.f32 %v9489_v40, %v9488_v37  ;;  %v3816_v55 = vmul.f32 %v9491_v38, %v9490_v14  ;;  %5438 = vmatpush3.msra.mxu1 %v9492_v44  ;;  %v9497_v26 = vld [vmem:[#allocation75_spill] sm:$0xff]  ;;  %v9499_v40 = vld [vmem:[#allocation74_spill] sm:$0xff]  ;;  %v9500_v38 = vld [vmem:[#allocation49_spill] sm:$0xff] }
 0xbd5   : > { %v5818_v33 = vpop.eup %5817  ;;  %v8494_v11 = vmul.f32 0.5, %v8241_v0  ;;  %5837 = vtanh.f32 %v3354_v12  ;;  %v3878_v59 = vmul.f32 0.7978846, %v3846_v63  ;;  %v3849_v20 = vadd.f32 %v3817_v25, %v8312_v27  ;;  %5423 = vmatprep.subr.mxu1 %v9493_v19  ;;  %v9498_v63 = vld [vmem:[#allocation48_spill] sm:$0xff] }
 0xbd6   : > { %v3412_v41 = vadd.f32 1.0, %v5818_v33  ;;  %5839 = vtanh.f32 %v3353_v36  ;;  %v3324_v42 = vadd.f32 %v3292_v18, %v9488_v37  ;;  %v3848_v3 = vadd.f32 %v3816_v55, %v9490_v14  ;;  %5439 = vmatpush3.msra.mxu1 %v9494_v51 }
 0xbd7   : > { %v5820_v47 = vpop.eup %5819  ;;  %v8502_v9 = vmul.f32 0.5, %v8236_v7  ;;  %5841 = vtanh.f32 %v3878_v59  ;;  %v3881_v0 = vmul.f32 0.7978846, %v3849_v20  ;;  %v3355_v62 = vmul.f32 0.7978846, %v9495_v4  ;;  %5424 = vmatprep.subr.mxu1 %v9496_v21  ;;  %v9501_v20 = vld [vmem:[#allocation50_spill] sm:$0xff] }
 0xbd8   : > { %v5822_v32 = vpop.eup %5821  ;;  %v3444_v45 = vmul.f32 %v3412_v41, %v9497_v26  ;;  %v3413_v36 = vadd.f32 1.0, %v5820_v47  ;;  %v3356_v6 = vmul.f32 0.7978846, %v3324_v42  ;;  %v3880_v12 = vmul.f32 0.7978846, %v3848_v3  ;;  %5440 = vmatpush3.msra.mxu1 %v9498_v63  ;;  %v9502_v42 = vld [vmem:[#allocation51_spill] sm:$0xff] }
 0xbd9   : > { %v5824_v25 = vpop.eup %5823  ;;  %v3939_v52 = vadd.f32 1.0, %v5822_v32  ;;  %v3191_v18 = vmul.f32 0.5, %v9499_v40  ;;  %5843 = vtanh.f32 %v3881_v0  ;;  %v3819_v7 = vmul.f32 %v8393_v53, %v8333_v60  ;;  %5425 = vmatprep.subr.mxu1 %v9500_v38  ;;  %v9504_v32 = vld [vmem:[#allocation53_spill] sm:$0xff] }
 0xbda   : > { %v5826_v55 = vpop.eup %5825  ;;  %4241 = vmatprep.mubr.f32.mxu0 %v3444_v45  ;;  %v3414_v44 = vadd.f32 1.0, %v5824_v25  ;;  %v8513_v33 = vmul.f32 0.5, %v8279_v54  ;;  %5845 = vtanh.f32 %v3356_v6  ;;  %v3294_v59 = vmul.f32 %v8390_v57, %v8330_v35  ;;  %5441 = vmatpush3.msra.mxu1 %v9501_v20  ;;  %v9503_v57 = vld [vmem:[#allocation52_spill] sm:$0xff] }
 0xbdb   : > { %4242 = vmatmul.mubr.f32.vlgmr.msra.gmra.mxu0 %v8402_v46  ;;  %v3971_v19 = vmul.f32 %v3939_v52, %v8445_v29  ;;  %v3938_v41 = vadd.f32 1.0, %v5826_v55  ;;  %5847 = vtanh.f32 %v3880_v12  ;;  %v3851_v53 = vadd.f32 %v3819_v7, %v8333_v60  ;;  %5426 = vmatprep.subr.mxu1 %v9502_v42  ;;  %v9506_v52 = vld [vmem:[#allocation76_spill] sm:$0xff] }
 0xbdc   : > { %v5828_v3 = vpop.eup %5827  ;;  %v3446_v54 = vmul.f32 %v3414_v44, %v8469_v49  ;;  %v3445_v51 = vmul.f32 %v3413_v36, %v3189_v15  ;;  %5849 = vtanh.f32 %v3355_v62  ;;  %v3326_v47 = vadd.f32 %v3294_v59, %v8330_v35  ;;  %5442 = vmatpush3.msra.mxu1 %v9503_v57  ;;  %v9505_v36 = vld [vmem:[#allocation54_spill] sm:$0xff]  ;;  %v9508_v59 = vld [vmem:[#allocation56_spill] sm:$0xff] }
 0xbdd   : > { %v5830_v0 = vpop.eup %5829  ;;  %4101 = vmatprep.mubr.f32.mxu1 %v3971_v19  ;;  %v3970_v46 = vmul.f32 %v3938_v41, %v8476_v13  ;;  %v3941_v29 = vadd.f32 1.0, %v5828_v3  ;;  %v3883_v4 = vmul.f32 0.7978846, %v3851_v53  ;;  %v3818_v21 = vmul.f32 %v8381_v1, %v8326_v5  ;;  %5427 = vmatprep.subr.mxu1 %v9504_v32 }
 0xbde   : > { %v5832_v26 = vpop.eup %5831  ;;  %4246 = vmatprep.mubr.f32.mxu0 %v3446_v54  ;;  %v3415_v49 = vadd.f32 1.0, %v5830_v0  ;;  %v3194_v15 = vmul.f32 0.5, %v8259_v39  ;;  %v3358_v62 = vmul.f32 0.7978846, %v3326_v47  ;;  %v3357_v45 = vmul.f32 0.7978846, %v8405_v10  ;;  %5443 = vmatpush3.msra.mxu1 %v9505_v36 }
 0xbdf   : > { %v5834_v6 = vpop.eup %5833  ;;  %4102 = vmatmul.mubr.f32.gmra.mxu1 %v3970_v46  ;;  %4247 = vmatmul.mubr.f32.gmra.mxu0 %v3445_v51  ;;  %v3973_v13 = vmul.f32 %v3941_v29, %v8486_v30  ;;  %v3416_v12 = vadd.f32 1.0, %v5832_v26  ;;  %5851 = vtanh.f32 %v3883_v4  ;;  %v3850_v1 = vadd.f32 %v3818_v21, %v8326_v5  ;;  %v9507_v39 = vld [vmem:[#allocation55_spill] sm:$0xff] }
 0xbe0   : > { %v3940_v63 = vadd.f32 1.0, %v5834_v6  ;;  %v3718_v25 = vmul.f32 0.5, %v8256_v58  ;;  %v3193_v40 = vmul.f32 0.5, %v9506_v52  ;;  %5853 = vtanh.f32 %v3358_v62  ;;  %5428 = vmatprep.subr.mxu1 %v9507_v39  ;;  %v9513_v52 = vld [vmem:[#allocation61_spill] sm:$0xff] }
 0xbe1   : > { %v5836_v10 = vpop.eup %5835  ;;  %4106 = vmatprep.mubr.f32.mxu1 %v3973_v13  ;;  %v3448_v7 = vmul.f32 %v3416_v12, %v8494_v11  ;;  %v3882_v38 = vmul.f32 0.7978846, %v3850_v1  ;;  %5855 = vtanh.f32 %v3357_v45  ;;  %v3821_v30 = vmul.f32 %v8415_v24, %v8359_v43  ;;  %5444 = vmatpush3.msra.mxu1 %v9508_v59  ;;  %v9509_v11 = vld [vmem:[#allocation57_spill] sm:$0xff] }
 0xbe2   : > { %v5838_v58 = vpop.eup %5837  ;;  %v3972_v20 = vmul.f32 %v3940_v63, %v8502_v9  ;;  %v3447_v19 = vmul.f32 %v3415_v49, %v3191_v18  ;;  %v3943_v41 = vadd.f32 1.0, %v5836_v10  ;;  %v3296_v53 = vmul.f32 %v8412_v8, %v8349_v50  ;;  %5429 = vmatprep.subr.mxu1 %v9509_v11  ;;  %v9510_v9 = vld [vmem:[#allocation58_spill] sm:$0xff]  ;;  %v9511_v49 = vld [vmem:[#allocation59_spill] sm:$0xff]  ;;  %v9517_v11 = vld [vmem:[#allocation64_spill] sm:$0xff] }
 0xbe3   : > { %v8540_v55 = vpop.f32.mrf.mxu1  ;;  %v8542_v44 = vpop.f32.mrf.mxu0  ;;  %4251 = vmatprep.mubr.f32.mxu0 %v3448_v7  ;;  %v3418_v3 = vadd.f32 1.0, %v5838_v58  ;;  %v3721_v24 = vmul.f32 0.5, %v8312_v27  ;;  %5857 = vtanh.f32 %v3882_v38  ;;  %v3853_v54 = vadd.f32 %v3821_v30, %v8359_v43  ;;  %5445 = vmatpush3.msra.mxu1 %v9510_v9  ;;  %v9514_v7 = vld [vmem:[#allocation62_spill] sm:$0xff]  ;;  %v9515_v30 = vld [vmem:[#allocation77_spill] sm:$0xff] }
 0xbe4   : > { %v5840_v42 = vpop.eup %5839  ;;  %4107 = vmatmul.mubr.f32.gmra.mxu1 %v3972_v20  ;;  %4252 = vmatmul.mubr.f32.gmra.mxu0 %v3447_v19  ;;  %v3975_v8 = vmul.f32 %v3943_v41, %v8513_v33  ;;  %v3328_v0 = vadd.f32 %v3296_v53, %v8349_v50  ;;  %v3820_v27 = vmul.f32 %v8408_v48, %v8341_v2  ;;  %v3196_v4 = vmul.f32 0.5, %v9488_v37  ;;  %v9512_v48 = vld [vmem:[#allocation60_spill] sm:$0xff]  ;;  %v9516_v19 = vld [vmem:[#allocation63_spill] sm:$0xff] }
 0xbe5   : > { %v8551_v51 = vpop.f32.mrf.mxu1  ;;  %v8553_v47 = vpop.f32.mrf.mxu0  ;;  %v3417_v57 = vadd.f32 1.0, %v5840_v42  ;;  %v3450_v46 = vmul.f32 %v3418_v3, %v3194_v15  ;;  %v3885_v21 = vmul.f32 0.7978846, %v3853_v54  ;;  %5430 = vmatprep.subr.mxu1 %v9511_v49  ;;  %v3359_v6 = vmul.f32 0.7978846, %v8421_v31 }
 0xbe6   : > { %v5842_v18 = vpop.eup %5841  ;;  %4111 = vmatprep.mubr.f32.mxu1 %v3975_v8  ;;  %v3360_v45 = vmul.f32 0.7978846, %v3328_v0  ;;  %v3852_v36 = vadd.f32 %v3820_v27, %v8341_v2  ;;  %5446 = vmatpush3.msra.mxu1 %v9512_v48  ;;  %v3720_v12 = vmul.f32 0.5, %v9490_v14  ;;  %v3823_v10 = vmul.f32 %v8459_v28, %v8399_v16  ;;  %v9518_v0 = vld [vmem:[#allocation26_spill] sm:$0xff]  ;;  %v9521_v48 = vld [vmem:[#allocation80_spill] sm:$0xff] }
 0xbe7   : > { %v3942_v29 = vadd.f32 1.0, %v5842_v18  ;;  %v8561_v32 = vpop.f32.mrf.mxu1  ;;  %v8563_v26 = vpop.f32.mrf.mxu0  ;;  %v3449_v33 = vmul.f32 %v3417_v57, %v3193_v40  ;;  %4256 = vmatprep.mubr.f32.mxu0 %v3450_v46  ;;  %5859 = vtanh.f32 %v3885_v21  ;;  %5431 = vmatprep.subr.mxu1 %v9513_v52  ;;  %v3195_v59 = vmul.f32 0.5, %v9515_v30  ;;  %v9519_v46 = vld [vmem:[#allocation65_spill] sm:$0xff] }
 0xbe8   : > { %v5844_v62 = vpop.eup %5843  ;;  %5861 = vtanh.f32 %v3360_v45  ;;  %v3884_v31 = vmul.f32 0.7978846, %v3852_v36  ;;  %5447 = vmatpush3.msra.mxu1 %v9514_v7  ;;  %v3855_v28 = vadd.f32 %v3823_v10, %v8399_v16  ;;  %v3329_v42 = vadd.f32 %v8464_v61, %v8378_v22  ;;  %v9520_v36 = vld [vmem:[#allocation66_spill] sm:$0xff]  ;;  %v9523_v7 = vld [vmem:[#allocation68_spill] sm:$0xff] }
 0xbe9   : > { %v5846_v15 = vpop.eup %5845  ;;  %v3974_v37 = vmul.f32 %v3942_v29, %v3718_v25  ;;  %v3945_v13 = vadd.f32 1.0, %v5844_v62  ;;  %v8570_v1 = vpop.f32.mrf.mxu1  ;;  %4257 = vmatmul.mubr.f32.gmra.mxu0 %v3449_v33  ;;  %5863 = vtanh.f32 %v3359_v6  ;;  %5432 = vmatprep.subr.mxu1 %v9516_v19  ;;  %v8596_v27 = vadd.f32 %v8540_v55, %v9518_v0  ;;  %v9525_v19 = vld [vmem:[#allocation70_spill] sm:$0xff] }
 0xbea   : > { %v8572_v63 = vpop.f32.mrf.mxu0  ;;  %v5848_v40 = vpop.eup %5847  ;;  %v3420_v39 = vadd.f32 1.0, %v5846_v15  ;;  %5865 = vtanh.f32 %v3884_v31  ;;  %5448 = vmatpush3.msra.mxu1 %v9517_v11  ;;  %v3887_v57 = vmul.f32 0.7978846, %v3855_v28  ;;  %v3822_v61 = vmul.f32 %v8438_v34, %v8385_v23 }
 0xbeb   : > { %v5850_v25 = vpop.eup %5849  ;;  %4112 = vmatmul.mubr.f32.gmra.mxu1 %v3974_v37  ;;  %v3977_v14 = vmul.f32 %v3945_v13, %v3721_v24  ;;  %v3944_v38 = vadd.f32 1.0, %v5848_v40  ;;  %v8579_v58 = vpop.f32.mrf.mxu1  ;;  %v3298_v24 = vmul.f32 %v8452_v17, %v8396_v56  ;;  %5433 = vmatprep.subr.mxu1 %v9519_v46  ;;  %v3723_v17 = vmul.f32 0.5, %v8333_v60  ;;  %v9528_v46 = vld [vmem:[#allocation27_spill] sm:$0xff] }
 0xbec   : > { %v8581_v20 = vpop.f32.mrf.mxu0  ;;  %v3452_v41 = vmul.f32 %v3420_v39, %v3196_v4  ;;  %v3419_v53 = vadd.f32 1.0, %v5850_v25  ;;  %v5852_v18 = vpop.eup %5851  ;;  %v3198_v55 = vmul.f32 0.5, %v8330_v35  ;;  %5867 = vtanh.f32 %v3887_v57  ;;  %5449 = vmatpush3.msra.mxu1 %v9520_v36 }
 0xbed   : > { %4116 = vmatprep.mubr.f32.mxu1 %v3977_v14  ;;  %v3976_v3 = vmul.f32 %v3944_v38, %v3720_v12  ;;  %v8590_v54 = vpop.f32.mrf.mxu1  ;;  %v5854_v29 = vpop.eup %5853  ;;  %v3947_v4 = vadd.f32 1.0, %v5852_v18  ;;  %v3330_v21 = vadd.f32 %v3298_v24, %v8396_v56  ;;  %v3854_v34 = vadd.f32 %v3822_v61, %v8385_v23  ;;  %v9522_v12 = vld [vmem:[#allocation67_spill] sm:$0xff]  ;;  %v9527_v61 = vld [vmem:[#allocation72_spill] sm:$0xff] }
 0xbee   : > { %v8592_v9 = vpop.f32.mrf.mxu0  ;;  %4261 = vmatprep.mubr.f32.mxu0 %v3452_v41  ;;  %v3451_v8 = vmul.f32 %v3419_v53, %v3195_v59  ;;  %v5856_v33 = vpop.eup %5855  ;;  %v3422_v45 = vadd.f32 1.0, %v5854_v29  ;;  %v3197_v60 = vmul.f32 0.5, %v9521_v48  ;;  %5434 = vmatprep.subr.mxu1 %v9522_v12  ;;  %v3235_v39 = vmul.f32 0.044715, %v8596_v27  ;;  %v9524_v59 = vld [vmem:[#allocation69_spill] sm:$0xff]  ;;  %v9526_v24 = vld [vmem:[#allocation71_spill] sm:$0xff] }
 0xbef   : > { %4117 = vmatmul.mubr.f32.gmra.mxu1 %v3976_v3  ;;  %v8603_v49 = vpop.f32.mrf.mxu1  ;;  %v3979_v6 = vmul.f32 %v3947_v4, %v3723_v17  ;;  %v3421_v15 = vadd.f32 1.0, %v5856_v33  ;;  %v3362_v37 = vmul.f32 0.7978846, %v3330_v21  ;;  %v3886_v35 = vmul.f32 0.7978846, %v3854_v34  ;;  %v9529_v4 = vld [vmem:[#allocation81_spill] sm:$0xff] }
 0xbf0   : > { %v8605_v62 = vpop.f32.mrf.mxu0  ;;  %4262 = vmatmul.mubr.f32.gmra.mxu0 %v3451_v8  ;;  %v5858_v52 = vpop.eup %5857  ;;  %v3454_v40 = vmul.f32 %v3422_v45, %v3198_v55  ;;  %v3361_v31 = vmul.f32 0.7978846, %v3329_v42  ;;  %5450 = vmatpush3.msra.mxu1 %v9523_v7  ;;  %v3722_v25 = vmul.f32 0.5, %v8326_v5  ;;  %v3725_v53 = vmul.f32 0.5, %v8359_v43 }
 0xbf1   : > { %v8611_v13 = vpop.f32.mrf.mxu1  ;;  %4121 = vmatprep.mubr.f32.mxu1 %v3979_v6  ;;  %v3946_v14 = vadd.f32 1.0, %v5858_v52  ;;  %v3453_v38 = vmul.f32 %v3421_v15, %v3197_v60  ;;  %5869 = vtanh.f32 %v3362_v37  ;;  %5435 = vmatprep.subr.mxu1 %v9524_v59  ;;  %v8626_v28 = vadd.f32 %v8561_v32, %v9518_v0 }
 0xbf2   : > { %v8615_v10 = vpop.f32.mrf.mxu0  ;;  %4266 = vmatprep.mubr.f32.mxu0 %v3454_v40  ;;  %5871 = vtanh.f32 %v3886_v35  ;;  %5451 = vmatpush3.msra.mxu1 %v9525_v19  ;;  %v3200_v11 = vmul.f32 0.5, %v8349_v50  ;;  %v3724_v42 = vmul.f32 0.5, %v8341_v2  ;;  %v3267_v3 = vmul.f32 %v3235_v39, %v8596_v27 }
 0xbf3   : > { %v8619_v30 = vpop.f32.mrf.mxu1  ;;  %v3978_v41 = vmul.f32 %v3946_v14, %v3722_v25  ;;  %5873 = vtanh.f32 %v3361_v31  ;;  %v8633_v18 = vadd.f32 %v8542_v44, %v9526_v24  ;;  %v8639_v32 = vadd.f32 %v8551_v51, %v9527_v61 }
 0xbf4   : > { %4267 = vmatmul.mubr.f32.gmra.mxu0 %v3453_v38  ;;  %v5860_v5 = vpop.eup %5859  ;;  %v8635_v8 = vpop.f32.mrf.mxu0  ;;  %v8643_v50 = vadd.f32 %v8553_v47, %v9528_v46  ;;  %v8647_v2 = vadd.f32 %v8563_v26, %v9526_v24  ;;  %v3199_v21 = vmul.f32 0.5, %v9529_v4  ;;  %v3727_v33 = vmul.f32 0.5, %v8399_v16 }
 0xbf5   : > { %v5862_v57 = vpop.eup %5861  ;;  %4122 = vmatmul.mubr.f32.gmra.mxu1 %v3978_v41  ;;  %v3949_v43 = vadd.f32 1.0, %v5860_v5  ;;  %v8649_v29 = vpop.f32.mrf.mxu1  ;;  %v8655_v51 = vadd.f32 %v8579_v58, %v9518_v0  ;;  %v3202_v34 = vmul.f32 0.5, %v8396_v56  ;;  %v3237_v26 = vmul.f32 0.044715, %v8626_v28 }
 0xbf6   : > { %v5864_v44 = vpop.eup %5863  ;;  %v3424_v17 = vadd.f32 1.0, %v5862_v57  ;;  %v3299_v48 = vmul.f32 %v3267_v3, %v8596_v27  ;;  %v3760_v60 = vmul.f32 0.044715, %v8633_v18  ;;  %v8661_v15 = vpop.f32.mrf.mxu0  ;;  %v3236_v58 = vmul.f32 0.044715, %v8639_v32 }
 0xbf7   : > { %9530 = vst [vmem:[#allocation73_spill] sm:$0xff] %v8655_v51  ;;  %v5866_v55 = vpop.eup %5865  ;;  %v3981_v45 = vmul.f32 %v3949_v43, %v3725_v53  ;;  %v3423_v47 = vadd.f32 1.0, %v5864_v44  ;;  %v3761_v37 = vmul.f32 0.044715, %v8643_v50  ;;  %v3762_v12 = vmul.f32 0.044715, %v8647_v2  ;;  %v8666_v52 = vpop.f32.mrf.mxu1 }
 0xbf8   : > { %v3456_v36 = vmul.f32 %v3424_v17, %v3200_v11  ;;  %v3948_v6 = vadd.f32 1.0, %v5866_v55  ;;  %v3726_v40 = vmul.f32 0.5, %v8385_v23  ;;  %v8671_v39 = vadd.f32 %v8570_v1, %v9527_v61  ;;  %v3695_v19 = vpop.f32.mrf.mxu0 }
 0xbf9   : > { %4126 = vmatprep.mubr.f32.mxu1 %v3981_v45  ;;  %v3455_v16 = vmul.f32 %v3423_v47, %v3199_v21  ;;  %v3239_v35 = vmul.f32 0.044715, %v8655_v51  ;;  %v5868_v31 = vpop.eup %5867  ;;  %v3201_v7 = vmul.f32 0.5, %v8378_v22  ;;  %v3269_v25 = vmul.f32 %v3237_v26, %v8626_v28  ;;  %v3172_v5 = vpop.f32.mrf.mxu1 }
 0xbfa   : > { %4271 = vmatprep.mubr.f32.mxu0 %v3456_v36  ;;  %v3980_v56 = vmul.f32 %v3948_v6, %v3724_v42  ;;  %v8678_v14 = vadd.f32 %v8572_v63, %v9528_v46  ;;  %v8682_v38 = vadd.f32 %v8581_v20, %v9526_v24  ;;  %v3951_v23 = vadd.f32 1.0, %v5868_v31 }
 0xbfb   : > { %4272 = vmatmul.mubr.f32.gmra.mxu0 %v3455_v16  ;;  %v8685_v1 = vmul.f32 %v3760_v60, %v8633_v18  ;;  %v8689_v59 = vadd.f32 %v8590_v54, %v9527_v61  ;;  %v8693_v22 = vadd.f32 %v8603_v49, %v9518_v0  ;;  %v8696_v63 = vadd.f32 %v3299_v48, %v8596_v27  ;;  %v3176_v60 = vpop.f32.mrf.mxu1 }
 0xbfc   : > { %4127 = vmatmul.mubr.f32.gmra.mxu1 %v3980_v56  ;;  %v8699_v20 = vmul.f32 %v3236_v58, %v8639_v32  ;;  %v8702_v41 = vmul.f32 %v3761_v37, %v8643_v50  ;;  %v8705_v53 = vmul.f32 %v3762_v12, %v8647_v2  ;;  %v3983_v11 = vmul.f32 %v3951_v23, %v3727_v33 }
 0xbfd   : > { %9531 = vst [vmem:[#allocation43_spill] sm:$0xff] %v8693_v22  ;;  %v3238_v42 = vmul.f32 0.044715, %v8671_v39  ;;  %v3271_v49 = vmul.f32 %v3239_v35, %v8655_v51  ;;  %v8711_v3 = vadd.f32 %v8592_v9, %v9528_v46  ;;  %v3301_v44 = vmul.f32 %v3269_v25, %v8626_v28  ;;  %v3697_v9 = vpop.f32.mrf.mxu0 }
 0xbfe   : > { %v5870_v54 = vpop.eup %5869  ;;  %v3763_v17 = vmul.f32 0.044715, %v8678_v14  ;;  %v3764_v4 = vmul.f32 0.044715, %v8682_v38  ;;  %4131 = vmatprep.mubr.f32.mxu1 %v3983_v11  ;;  %v3240_v33 = vmul.f32 0.044715, %v8689_v59  ;;  %v8720_v47 = vadd.f32 %v8605_v62, %v9526_v24 }
 0xbff   : > { %v5872_v57 = vpop.eup %5871  ;;  %v3426_v43 = vadd.f32 1.0, %v5870_v54  ;;  %v3241_v45 = vmul.f32 0.044715, %v8693_v22  ;;  %v8724_v6 = vadd.f32 %v8611_v13, %v9527_v61  ;;  %v8728_v48 = vadd.f32 %v8619_v30, %v9518_v0 }
 0xc00   : > { %v5874_v21 = vpop.eup %5873  ;;  %v3950_v55 = vadd.f32 1.0, %v5872_v57  ;;  %v8731_v58 = vmul.f32 %v3238_v42, %v8671_v39  ;;  %v3303_v37 = vmul.f32 %v3271_v49, %v8655_v51  ;;  %v3765_v62 = vmul.f32 0.044715, %v8711_v3  ;;  %v3178_v42 = vpop.f32.mrf.mxu1 }
 0xc01   : > { %v3458_v26 = vmul.f32 %v3426_v43, %v3202_v34  ;;  %v3425_v36 = vadd.f32 1.0, %v5874_v21  ;;  %9532 = vst [vmem:[#allocation79_spill] sm:$0xff] %v8728_v48  ;;  %v8736_v12 = vadd.f32 %v3301_v44, %v8626_v28  ;;  %v8739_v13 = vmul.f32 %v3763_v17, %v8678_v14 }
 0xc02   : > { %v3982_v16 = vmul.f32 %v3950_v55, %v3726_v40  ;;  %v3243_v30 = vmul.f32 0.044715, %v8728_v48  ;;  %v8743_v56 = vmul.f32 %v3764_v4, %v8682_v38  ;;  %v8746_v40 = vmul.f32 %v3240_v33, %v8689_v59 }
 0xc03   : > { %4276 = vmatprep.mubr.f32.mxu0 %v3458_v26  ;;  %v3457_v34 = vmul.f32 %v3425_v36, %v3201_v7  ;;  %v3273_v35 = vmul.f32 %v3241_v45, %v8693_v22  ;;  %v3766_v31 = vmul.f32 0.044715, %v8720_v47  ;;  %v3701_v7 = vpop.f32.mrf.mxu0  ;;  %v3242_v25 = vmul.f32 0.044715, %v8724_v6  ;;  %v3182_v36 = vpop.f32.mrf.mxu1 }
 0xc04   : > { %4132 = vmatmul.mubr.f32.gmra.mxu1 %v3982_v16  ;;  %v8753_v23 = vadd.f32 %v8615_v10, %v9528_v46  ;;  %v3275_v54 = vmul.f32 %v3243_v30, %v8728_v48  ;;  %v8758_v11 = vadd.f32 %v8666_v52, %v9518_v0  ;;  %v8761_v49 = vadd.f32 %v3303_v37, %v8655_v51 }
 0xc05   : > { %4277 = vmatmul.mubr.f32.gmra.mxu0 %v3457_v34  ;;  %v8764_v57 = vmul.f32 %v3765_v62, %v8711_v3  ;;  %v8768_v43 = vadd.f32 %v8635_v8, %v9526_v24  ;;  %v8772_v10 = vadd.f32 %v8649_v29, %v9527_v61  ;;  %v8777_v52 = vadd.f32 %v8661_v15, %v9528_v46  ;;  %v3703_v33 = vpop.f32.mrf.mxu0 }
 0xc06   : > { %9533 = vst [vmem:[#allocation83_spill] sm:$0xff] %v8758_v11  ;;  %v3307_v44 = vmul.f32 %v3275_v54, %v8728_v48  ;;  %v3245_v17 = vmul.f32 0.044715, %v8758_v11  ;;  %v8781_v4 = vadd.f32 %v3695_v19, %v9526_v24  ;;  %v3305_v21 = vmul.f32 %v3273_v35, %v8693_v22 }
 0xc07   : > { %v8785_v8 = vmul.f32 %v3766_v31, %v8720_v47  ;;  %v8788_v55 = vadd.f32 %v3172_v5, %v9527_v61  ;;  %v8791_v29 = vadd.f32 %v3176_v60, %v9518_v0  ;;  %v3767_v15 = vmul.f32 0.044715, %v8753_v23 }
 0xc08   : > { %v3339_v45 = vadd.f32 %v3307_v44, %v8728_v48  ;;  %v8796_v26 = vadd.f32 %v3697_v9, %v9528_v46  ;;  %v8799_v19 = vadd.f32 %v3701_v7, %v9526_v24  ;;  %v3768_v16 = vmul.f32 0.044715, %v8768_v43 }
 0xc09   : > { %9534 = vst [vmem:[#allocation78_spill] sm:$0xff] %v8788_v55  ;;  %v3244_v5 = vmul.f32 0.044715, %v8772_v10  ;;  %v3277_v37 = vmul.f32 %v3245_v17, %v8758_v11  ;;  %v3247_v60 = vmul.f32 0.044715, %v8791_v29  ;;  %v8806_v62 = vmul.f32 %v3242_v25, %v8724_v6  ;;  %v3707_v25 = vpop.f32.mrf.mxu0 }
 0xc0a   : > { %v3769_v34 = vmul.f32 0.044715, %v8777_v52  ;;  %v3770_v9 = vmul.f32 0.044715, %v8781_v4  ;;  %v8811_v30 = vadd.f32 %v3178_v42, %v9527_v61  ;;  %v8814_v35 = vadd.f32 %v3305_v21, %v8693_v22 }
 0xc0b   : > { %v3246_v31 = vmul.f32 0.044715, %v8788_v55  ;;  %v8818_v7 = vadd.f32 %v3703_v33, %v9528_v46  ;;  %v8821_v54 = vadd.f32 %v3182_v36, %v9518_v0  ;;  %v8824_v44 = vmul.f32 %v3767_v15, %v8753_v23 }
 0xc0c   : > { %v3371_v17 = vmul.f32 0.7978846, %v3339_v45  ;;  %v3771_v48 = vmul.f32 0.044715, %v8796_v26  ;;  %v3772_v42 = vmul.f32 0.044715, %v8799_v19  ;;  %v8829_v21 = vmul.f32 %v3768_v16, %v8768_v43 }
 0xc0d   : > { %v8832_v22 = vmul.f32 %v3244_v5, %v8772_v10  ;;  %v3309_v33 = vmul.f32 %v3277_v37, %v8758_v11  ;;  %v3279_v0 = vmul.f32 %v3247_v60, %v8791_v29  ;;  %v8837_v36 = vmul.f32 %v3769_v34, %v8777_v52 }
 0xc0e   : > { %v8840_v15 = vmul.f32 %v3770_v9, %v8781_v4  ;;  %v3248_v45 = vmul.f32 0.044715, %v8811_v30  ;;  %v8844_v51 = vadd.f32 %v3707_v25, %v9526_v24  ;;  %v8847_v16 = vmul.f32 %v3246_v31, %v8788_v55  ;;  %v3709_v55 = vpop.f32.mrf.mxu0 }
 0xc0f   : > { %9535 = vst [vmem:[#allocation82_spill] sm:$0xff] %v8832_v22  ;;  %v3773_v5 = vmul.f32 0.044715, %v8818_v7  ;;  %v3249_v37 = vmul.f32 0.044715, %v8821_v54  ;;  %v3184_v22 = vpop.f32.mrf.mxu1  ;;  %v3825_v60 = vmul.f32 %v8702_v41, %v8643_v50  ;;  %5875 = vtanh.f32 %v3371_v17 }
 0xc10   : > { %9536 = vst [vmem:[#allocation44_spill] sm:$0xff] %v8847_v16  ;;  %v8854_v34 = vmul.f32 %v3771_v48, %v8796_v26  ;;  %v8857_v9 = vmul.f32 %v3772_v42, %v8799_v19  ;;  %v3300_v24 = vmul.f32 %v8699_v20, %v8639_v32  ;;  %v8862_v31 = vadd.f32 %v3309_v33, %v8758_v11 }
 0xc11   : > { %v3311_v25 = vmul.f32 %v3279_v0, %v8791_v29  ;;  %v3857_v16 = vadd.f32 %v3825_v60, %v8643_v50  ;;  %v3824_v41 = vmul.f32 %v8685_v1, %v8633_v18  ;;  %v8869_v17 = vmul.f32 %v3248_v45, %v8811_v30 }
 0xc12   : > { %9537 = vst [vmem:[#allocation45_spill] sm:$0xff] %v8862_v31  ;;  %v3774_v48 = vmul.f32 0.044715, %v8844_v51  ;;  %v8873_v42 = vadd.f32 %v3184_v22, %v9527_v61  ;;  %v3332_v20 = vadd.f32 %v3300_v24, %v8639_v32  ;;  %v8877_v33 = vmul.f32 %v3773_v5, %v8818_v7 }
 0xc13   : > { %v8880_v0 = vmul.f32 %v3249_v37, %v8821_v54  ;;  %v3889_v60 = vmul.f32 0.7978846, %v3857_v16  ;;  %v3856_v1 = vadd.f32 %v3824_v41, %v8633_v18  ;;  %v3363_v45 = vmul.f32 0.7978846, %v8696_v63 }
 0xc14   : > { %v3364_v11 = vmul.f32 0.7978846, %v3332_v20  ;;  %v3827_v31 = vmul.f32 %v8739_v13, %v8678_v14  ;;  %v3302_v61 = vmul.f32 %v8731_v58, %v8671_v39  ;;  %v8889_v22 = vadd.f32 %v3709_v55, %v9528_v46 }
 0xc15   : > { %5877 = vtanh.f32 %v3889_v60  ;;  %v3888_v5 = vmul.f32 0.7978846, %v3856_v1  ;;  %v3826_v37 = vmul.f32 %v8705_v53, %v8647_v2  ;;  %v8894_v16 = vmul.f32 0.5, %v8643_v50 }
 0xc16   : > { %5879 = vtanh.f32 %v3364_v11  ;;  %v3859_v63 = vadd.f32 %v3827_v31, %v8678_v14  ;;  %v3334_v24 = vadd.f32 %v3302_v61, %v8671_v39  ;;  %v8899_v13 = vadd.f32 %v3311_v25, %v8791_v29 }
 0xc17   : > { %5881 = vtanh.f32 %v3888_v5  ;;  %v3858_v46 = vadd.f32 %v3826_v37, %v8647_v2  ;;  %v3365_v58 = vmul.f32 0.7978846, %v8736_v12  ;;  %v3829_v50 = vmul.f32 %v8764_v57, %v8711_v3 }
 0xc18   : > { %5883 = vtanh.f32 %v3363_v45  ;;  %v3891_v55 = vmul.f32 0.7978846, %v3859_v63  ;;  %v3366_v41 = vmul.f32 0.7978846, %v3334_v24  ;;  %v3775_v53 = vmul.f32 0.044715, %v8889_v22 }
 0xc19   : > { %v3890_v11 = vmul.f32 0.7978846, %v3858_v46  ;;  %5885 = vtanh.f32 %v3365_v58  ;;  %v3304_v31 = vmul.f32 %v8746_v40, %v8689_v59  ;;  %v8909_v25 = vmul.f32 %v3774_v48, %v8844_v51 }
 0xc1a   : > { %v8912_v20 = vmul.f32 0.044715, %v8873_v42  ;;  %5887 = vtanh.f32 %v3891_v55  ;;  %v3861_v12 = vadd.f32 %v3829_v50, %v8711_v3  ;;  %v3204_v60 = vmul.f32 0.5, %v8639_v32 }
 0xc1b   : > { %5889 = vtanh.f32 %v3366_v41  ;;  %v3336_v57 = vadd.f32 %v3304_v31, %v8689_v59  ;;  %v3828_v1 = vmul.f32 %v8743_v56, %v8682_v38  ;;  %v3728_v45 = vmul.f32 0.5, %v8633_v18 }
 0xc1c   : > { %5891 = vtanh.f32 %v3890_v11  ;;  %v3893_v40 = vmul.f32 0.7978846, %v3861_v12  ;;  %v3367_v48 = vmul.f32 0.7978846, %v8761_v49  ;;  %v8921_v61 = vpop.eup %5875  ;;  %v8924_v5 = vmul.f32 %v3775_v53, %v8889_v22 }
 0xc1d   : > { %v3368_v37 = vmul.f32 0.7978846, %v3336_v57  ;;  %v3860_v32 = vadd.f32 %v3828_v1, %v8682_v38  ;;  %v3831_v63 = vmul.f32 %v8824_v44, %v8753_v23  ;;  %v3203_v24 = vmul.f32 0.5, %v8596_v27 }
 0xc1e   : > { %v3731_v56 = vmul.f32 0.5, %v8678_v14  ;;  %5893 = vtanh.f32 %v3893_v40  ;;  %v3306_v18 = vmul.f32 %v8806_v62, %v8724_v6  ;;  %v3830_v58 = vmul.f32 %v8785_v8, %v8720_v47 }
 0xc1f   : > { %5895 = vtanh.f32 %v3368_v37  ;;  %v3892_v49 = vmul.f32 0.7978846, %v3860_v32  ;;  %v3863_v46 = vadd.f32 %v3831_v63, %v8753_v23  ;;  %v3206_v55 = vmul.f32 0.5, %v8671_v39 }
 0xc20   : > { %5897 = vtanh.f32 %v3367_v48  ;;  %v3338_v44 = vadd.f32 %v3306_v18, %v8724_v6  ;;  %v3369_v27 = vmul.f32 0.7978846, %v8814_v35  ;;  %v3730_v14 = vmul.f32 0.5, %v8647_v2 }
 0xc21   : > { %5899 = vtanh.f32 %v3892_v49  ;;  %v3895_v41 = vmul.f32 0.7978846, %v3863_v46  ;;  %v3862_v62 = vadd.f32 %v3830_v58, %v8720_v47  ;;  %v3205_v53 = vmul.f32 0.5, %v8626_v28 }
 0xc22   : > { %v5878_v50 = vpop.eup %5877  ;;  %v3370_v11 = vmul.f32 0.7978846, %v3338_v44  ;;  %5901 = vtanh.f32 %v3369_v27  ;;  %v3833_v8 = vmul.f32 %v8837_v36, %v8777_v52  ;;  %v3832_v35 = vmul.f32 %v8829_v21, %v8768_v43 }
 0xc23   : > { %v5880_v39 = vpop.eup %5879  ;;  %v3953_v31 = vadd.f32 1.0, %v5878_v50  ;;  %5903 = vtanh.f32 %v3895_v41  ;;  %v3894_v12 = vmul.f32 0.7978846, %v3862_v62  ;;  %v3733_v1 = vmul.f32 0.5, %v8711_v3 }
 0xc24   : > { %v5882_v2 = vpop.eup %5881  ;;  %v3428_v57 = vadd.f32 1.0, %v5880_v39  ;;  %5905 = vtanh.f32 %v3370_v11  ;;  %v3865_v40 = vadd.f32 %v3833_v8, %v8777_v52  ;;  %v3864_v36 = vadd.f32 %v3832_v35, %v8768_v43  ;;  %v9538_v39 = vld [vmem:[#allocation73_spill] sm:$0xff] }
 0xc25   : > { %v5884_v28 = vpop.eup %5883  ;;  %v3985_v48 = vmul.f32 %v3953_v31, %v8894_v16  ;;  %v3952_v37 = vadd.f32 1.0, %v5882_v2  ;;  %5907 = vtanh.f32 %v3894_v12  ;;  %v3835_v21 = vmul.f32 %v8854_v34, %v8796_v26 }
 0xc26   : > { %v5886_v32 = vpop.eup %5885  ;;  %v3460_v63 = vmul.f32 %v3428_v57, %v3204_v60  ;;  %v3427_v18 = vadd.f32 1.0, %v5884_v28  ;;  %v3897_v49 = vmul.f32 0.7978846, %v3865_v40  ;;  %v3208_v44 = vmul.f32 0.5, %v8689_v59 }
 0xc27   : > { %v5888_v46 = vpop.eup %5887  ;;  %4136 = vmatprep.mubr.f32.mxu1 %v3985_v48  ;;  %v3984_v3 = vmul.f32 %v3952_v37, %v3728_v45  ;;  %v3429_v58 = vadd.f32 1.0, %v5886_v32  ;;  %v3896_v27 = vmul.f32 0.7978846, %v3864_v36  ;;  %v3867_v50 = vadd.f32 %v3835_v21, %v8796_v26 }
 0xc28   : > { %v5890_v41 = vpop.eup %5889  ;;  %4281 = vmatprep.mubr.f32.mxu0 %v3460_v63  ;;  %v3459_v16 = vmul.f32 %v3427_v18, %v3203_v24  ;;  %v3955_v62 = vadd.f32 1.0, %v5888_v46  ;;  %5909 = vtanh.f32 %v3897_v49  ;;  %v3732_v8 = vmul.f32 0.5, %v8682_v38 }
 0xc29   : > { %v5892_v60 = vpop.eup %5891  ;;  %4137 = vmatmul.mubr.f32.gmra.mxu1 %v3984_v3  ;;  %v3430_v11 = vadd.f32 1.0, %v5890_v41  ;;  %5911 = vtanh.f32 %v3896_v27  ;;  %v3834_v34 = vmul.f32 %v8840_v15, %v8781_v4  ;;  %v3207_v31 = vmul.f32 0.5, %v9538_v39 }
 0xc2a   : > { %4282 = vmatmul.mubr.f32.gmra.mxu0 %v3459_v16  ;;  %v3987_v45 = vmul.f32 %v3955_v62, %v3731_v56  ;;  %v3954_v59 = vadd.f32 1.0, %v5892_v60  ;;  %v3899_v12 = vmul.f32 0.7978846, %v3867_v50  ;;  %v3461_v2 = vmul.f32 %v3429_v58, %v3205_v53 }
 0xc2b   : > { %v5894_v24 = vpop.eup %5893  ;;  %v3462_v35 = vmul.f32 %v3430_v11, %v3206_v55  ;;  %v3866_v57 = vadd.f32 %v3834_v34, %v8781_v4  ;;  %v3837_v40 = vmul.f32 %v8877_v33, %v8818_v7  ;;  %v3836_v15 = vmul.f32 %v8857_v9, %v8799_v19 }
 0xc2c   : > { %v5896_v28 = vpop.eup %5895  ;;  %4141 = vmatprep.mubr.f32.mxu1 %v3987_v45  ;;  %v3986_v38 = vmul.f32 %v3954_v59, %v3730_v14  ;;  %v3957_v48 = vadd.f32 1.0, %v5894_v24  ;;  %5913 = vtanh.f32 %v3899_v12  ;;  %v3735_v36 = vmul.f32 0.5, %v8753_v23  ;;  %v9540_v12 = vld [vmem:[#allocation82_spill] sm:$0xff] }
 0xc2d   : > { %v5898_v56 = vpop.eup %5897  ;;  %4286 = vmatprep.mubr.f32.mxu0 %v3462_v35  ;;  %v3432_v37 = vadd.f32 1.0, %v5896_v28  ;;  %v3898_v55 = vmul.f32 0.7978846, %v3866_v57  ;;  %v3869_v53 = vadd.f32 %v3837_v40, %v8818_v7  ;;  %v3868_v14 = vadd.f32 %v3836_v15, %v8799_v19  ;;  %v9541_v40 = vld [vmem:[#allocation78_spill] sm:$0xff]  ;;  %v9542_v28 = vld [vmem:[#allocation44_spill] sm:$0xff] }
 0xc2e   : > { %v5900_v32 = vpop.eup %5899  ;;  %4142 = vmatmul.mubr.f32.gmra.mxu1 %v3986_v38  ;;  %4287 = vmatmul.mubr.f32.gmra.mxu0 %v3461_v2  ;;  %v3989_v33 = vmul.f32 %v3957_v48, %v3733_v1  ;;  %v3431_v63 = vadd.f32 1.0, %v5898_v56  ;;  %v3839_v18 = vmul.f32 %v8924_v5, %v8889_v22  ;;  %v3210_v58 = vmul.f32 0.5, %v8724_v6  ;;  %v9539_v6 = vld [vmem:[#allocation43_spill] sm:$0xff] }
 0xc2f   : > { %v5902_v49 = vpop.eup %5901  ;;  %v3464_v9 = vmul.f32 %v3432_v37, %v3208_v44  ;;  %v3956_v21 = vadd.f32 1.0, %v5900_v32  ;;  %5915 = vtanh.f32 %v3898_v55  ;;  %v3901_v46 = vmul.f32 0.7978846, %v3869_v53 }
 0xc30   : > { %v5904_v3 = vpop.eup %5903  ;;  %4146 = vmatprep.mubr.f32.mxu1 %v3989_v33  ;;  %v3463_v23 = vmul.f32 %v3431_v63, %v3207_v31  ;;  %v3900_v27 = vmul.f32 0.7978846, %v3868_v14  ;;  %v3871_v41 = vadd.f32 %v3839_v18, %v8889_v22  ;;  %v3433_v50 = vadd.f32 1.0, %v5902_v49 }
 0xc31   : > { %v5906_v1 = vpop.eup %5905  ;;  %4291 = vmatprep.mubr.f32.mxu0 %v3464_v9  ;;  %v3988_v16 = vmul.f32 %v3956_v21, %v3732_v8  ;;  %v3959_v62 = vadd.f32 1.0, %v5904_v3  ;;  %5917 = vtanh.f32 %v3901_v46  ;;  %v3734_v60 = vmul.f32 0.5, %v8720_v47 }
 0xc32   : > { %v5908_v5 = vpop.eup %5907  ;;  %4292 = vmatmul.mubr.f32.gmra.mxu0 %v3463_v23  ;;  %v3434_v44 = vadd.f32 1.0, %v5906_v1  ;;  %5919 = vtanh.f32 %v3900_v27  ;;  %v3903_v11 = vmul.f32 0.7978846, %v3871_v41  ;;  %v3209_v59 = vmul.f32 0.5, %v9539_v6 }
 0xc33   : > { %4147 = vmatmul.mubr.f32.gmra.mxu1 %v3988_v16  ;;  %v3991_v34 = vmul.f32 %v3959_v62, %v3735_v36  ;;  %v3958_v45 = vadd.f32 1.0, %v5908_v5  ;;  %v3838_v39 = vmul.f32 %v8909_v25, %v8844_v51  ;;  %v3282_v8 = vmul.f32 %v8912_v20, %v8873_v42 }
 0xc34   : > { %v3466_v31 = vmul.f32 %v3434_v44, %v3210_v58  ;;  %5921 = vtanh.f32 %v3903_v11  ;;  %v3308_v24 = vmul.f32 %v9540_v12, %v8772_v10  ;;  %v3465_v2 = vmul.f32 %v3433_v50, %v3209_v59 }
 0xc35   : > { %v5910_v35 = vpop.eup %5909  ;;  %4151 = vmatprep.mubr.f32.mxu1 %v3991_v34  ;;  %v3990_v47 = vmul.f32 %v3958_v45, %v3734_v60  ;;  %v3870_v57 = vadd.f32 %v3838_v39, %v8844_v51  ;;  %v3310_v38 = vmul.f32 %v9542_v28, %v9541_v40  ;;  %v3737_v25 = vmul.f32 0.5, %v8777_v52  ;;  %v9543_v52 = vld [vmem:[#allocation45_spill] sm:$0xff] }
 0xc36   : > { %v5912_v48 = vpop.eup %5911  ;;  %4296 = vmatprep.mubr.f32.mxu0 %v3466_v31  ;;  %v3961_v15 = vadd.f32 1.0, %v5910_v35  ;;  %v3736_v20 = vmul.f32 0.5, %v8768_v43  ;;  %v3340_v56 = vadd.f32 %v3308_v24, %v8772_v10  ;;  %v3312_v53 = vmul.f32 %v8869_v17, %v8811_v30 }
 0xc37   : > { %4152 = vmatmul.mubr.f32.gmra.mxu1 %v3990_v47  ;;  %4297 = vmatmul.mubr.f32.gmra.mxu0 %v3465_v2  ;;  %v3960_v37 = vadd.f32 1.0, %v5912_v48  ;;  %v3902_v36 = vmul.f32 0.7978846, %v3870_v57  ;;  %v3342_v55 = vadd.f32 %v3310_v38, %v9541_v40  ;;  %v3313_v32 = vmul.f32 %v8880_v0, %v8821_v54 }
 0xc38   : > { %v3993_v33 = vmul.f32 %v3961_v15, %v3737_v25  ;;  %v3372_v63 = vmul.f32 0.7978846, %v3340_v56  ;;  %v3373_v14 = vmul.f32 0.7978846, %v9543_v52  ;;  %v3344_v9 = vadd.f32 %v3312_v53, %v8811_v30  ;;  %v9544_v25 = vld [vmem:[#allocation79_spill] sm:$0xff] }
 0xc39   : > { %v5914_v18 = vpop.eup %5913  ;;  %v3992_v43 = vmul.f32 %v3960_v37, %v3736_v20  ;;  %5923 = vtanh.f32 %v3902_v36  ;;  %v3374_v49 = vmul.f32 0.7978846, %v3342_v55  ;;  %v3739_v21 = vmul.f32 0.5, %v8796_v26  ;;  %v9545_v53 = vld [vmem:[#allocation83_spill] sm:$0xff] }
 0xc3a   : > { %4156 = vmatprep.mubr.f32.mxu1 %v3993_v33  ;;  %v3963_v46 = vadd.f32 1.0, %v5914_v18  ;;  %5925 = vtanh.f32 %v3372_v63  ;;  %v3376_v17 = vmul.f32 0.7978846, %v3344_v9  ;;  %v3314_v0 = vmul.f32 %v3282_v8, %v8873_v42 }
 0xc3b   : > { %4157 = vmatmul.mubr.f32.gmra.mxu1 %v3992_v43  ;;  %5927 = vtanh.f32 %v3374_v49  ;;  %v3345_v23 = vadd.f32 %v3313_v32, %v8821_v54  ;;  %v3738_v27 = vmul.f32 0.5, %v8781_v4  ;;  %v3375_v1 = vmul.f32 0.7978846, %v8899_v13 }
 0xc3c   : > { %v5916_v3 = vpop.eup %5915  ;;  %v3995_v58 = vmul.f32 %v3963_v46, %v3739_v21  ;;  %5929 = vtanh.f32 %v3373_v14  ;;  %v3346_v16 = vadd.f32 %v3314_v0, %v8873_v42  ;;  %v3741_v5 = vmul.f32 0.5, %v8818_v7 }
 0xc3d   : > { %v3962_v41 = vadd.f32 1.0, %v5916_v3  ;;  %5931 = vtanh.f32 %v3376_v17  ;;  %v3740_v4 = vmul.f32 0.5, %v8799_v19  ;;  %v3377_v6 = vmul.f32 0.7978846, %v3345_v23 }
 0xc3e   : > { %v5918_v26 = vpop.eup %5917  ;;  %4161 = vmatprep.mubr.f32.mxu1 %v3995_v58  ;;  %v3378_v60 = vmul.f32 0.7978846, %v3346_v16  ;;  %5933 = vtanh.f32 %v3375_v1  ;;  %v3743_v13 = vmul.f32 0.5, %v8889_v22  ;;  %v3742_v12 = vmul.f32 0.5, %v8844_v51 }
 0xc3f   : > { %v5920_v62 = vpop.eup %5919  ;;  %v3994_v50 = vmul.f32 %v3962_v41, %v3738_v27  ;;  %v3965_v44 = vadd.f32 1.0, %v5918_v26  ;;  %v3212_v19 = vmul.f32 0.5, %v8772_v10  ;;  %v3435_v2 = vadd.f32 1.0, %v8921_v61 }
 0xc40   : > { %v3964_v11 = vadd.f32 1.0, %v5920_v62  ;;  %5935 = vtanh.f32 %v3378_v60  ;;  %v3211_v15 = vmul.f32 0.5, %v9544_v25  ;;  %v3214_v20 = vmul.f32 0.5, %v9541_v40 }
 0xc41   : > { %v5922_v34 = vpop.eup %5921  ;;  %4162 = vmatmul.mubr.f32.gmra.mxu1 %v3994_v50  ;;  %v3997_v45 = vmul.f32 %v3965_v44, %v3741_v5  ;;  %5937 = vtanh.f32 %v3377_v6  ;;  %v3213_v61 = vmul.f32 0.5, %v9545_v53  ;;  %v3216_v32 = vmul.f32 0.5, %v8811_v30  ;;  %v9546_v5 = vld [vmem:[#allocation35_spill] sm:$0xff] }
 0xc42   : > { %v3967_v59 = vadd.f32 1.0, %v5922_v34  ;;  %v3996_v39 = vmul.f32 %v3964_v11, %v3740_v4  ;;  %v3467_v56 = vmul.f32 %v3435_v2, %v3211_v15  ;;  %v3215_v40 = vmul.f32 0.5, %v8791_v29  ;;  %v9013_v29 = vld [vmem:[%s9203_s12] ss:$0 sm:$0xff] }
 0xc43   : > { %4166 = vmatprep.mubr.f32.mxu1 %v3997_v45  ;;  %v3218_v43 = vmul.f32 0.5, %v8873_v42  ;;  %v3217_v46 = vmul.f32 0.5, %v8821_v54 }
 0xc44   : > { %v3999_v8 = vmul.f32 %v3967_v59, %v3743_v13 }
 0xc45   : > { %4167 = vmatmul.mubr.f32.gmra.mxu1 %v3996_v39  ;;  %v9547_v39 = vld [vmem:[#allocation34_spill] sm:$0xff] }
 0xc46   : > { %v5924_v7 = vpop.eup %5923  ;;  %4171 = vmatprep.mubr.f32.mxu1 %v3999_v8 }
 0xc47   : > { %v5926_v31 = vpop.eup %5925  ;;  %v3966_v24 = vadd.f32 1.0, %v5924_v7 }
 0xc48   : > { %v5928_v35 = vpop.eup %5927  ;;  %v3436_v47 = vadd.f32 1.0, %v5926_v31 }
 0xc49   : > { %v3998_v22 = vmul.f32 %v3966_v24, %v3742_v12  ;;  %v5930_v57 = vpop.eup %5929  ;;  %v3438_v38 = vadd.f32 1.0, %v5928_v35 }
 0xc4a   : > { %v3468_v28 = vmul.f32 %v3436_v47, %v3212_v19  ;;  %v5932_v48 = vpop.eup %5931  ;;  %v3437_v51 = vadd.f32 1.0, %v5930_v57 }
 0xc4b   : > { %4172 = vmatmul.mubr.f32.gmra.mxu1 %v3998_v22  ;;  %v5934_v37 = vpop.eup %5933  ;;  %v3470_v36 = vmul.f32 %v3438_v38, %v3214_v20  ;;  %v3440_v55 = vadd.f32 1.0, %v5932_v48 }
 0xc4c   : > { %4301 = vmatprep.mubr.f32.mxu1 %v3468_v28  ;;  %v3469_v33 = vmul.f32 %v3437_v51, %v3213_v61  ;;  %v3439_v63 = vadd.f32 1.0, %v5934_v37 }
 0xc4d   : > { %v5936_v10 = vpop.eup %5935  ;;  %v3472_v14 = vmul.f32 %v3440_v55, %v3216_v32 }
 0xc4e   : > { %v5938_v52 = vpop.eup %5937  ;;  %v3442_v18 = vadd.f32 1.0, %v5936_v10  ;;  %v3471_v49 = vmul.f32 %v3439_v63, %v3215_v40 }
 0xc4f   : > { %4302 = vmatmul.mubr.f32.vlgmr.msra.gmra.mxu1 %v3467_v56  ;;  %v3441_v9 = vadd.f32 1.0, %v5938_v52 }
 0xc50   : > { %4306 = vmatprep.mubr.f32.mxu1 %v3470_v36  ;;  %v3474_v21 = vmul.f32 %v3442_v18, %v3218_v43 }
 0xc51   : > { %v3473_v17 = vmul.f32 %v3441_v9, %v3217_v46 }
 0xc53   : > { %4307 = vmatmul.mubr.f32.gmra.mxu1 %v3469_v33 }
 0xc54   : > { %4311 = vmatprep.mubr.f32.mxu1 %v3472_v14 }
 0xc57   : > { %4312 = vmatmul.mubr.f32.gmra.mxu1 %v3471_v49 }
 0xc58   : > { %4316 = vmatprep.mubr.f32.mxu1 %v3474_v21 }
 0xc5b   : > { %4317 = vmatmul.mubr.f32.gmra.mxu1 %v3473_v17 }
 0xc8f   : > { %v4956_v30 = vpop.f32.mrf.mxu1 }
 0xc91   : > { %v4957_v0 = vpop.f32.mrf.mxu1 }
 0xc92   : > { %v4958_v23 = vadd.f32 %v4957_v0, %v4956_v30 }
 0xc9b   : > { %v5036_v3 = vpop.f32.mrf.mxu0 }
 0xc9d   : > { %v5037_v58 = vpop.f32.mrf.mxu0 }
 0xc9e   : > { %v5038_v27 = vadd.f32 %v5037_v58, %v5036_v3 }
 0xc9f   : > { %v4959_v42 = vpop.f32.mrf.mxu1  ;;  %v5039_v41 = vpop.f32.mrf.mxu0 }
 0xca0   : > { %v4244_v1 = vadd.f32 %v5038_v27, %v4958_v23 }
 0xca1   : > { %v4960_v16 = vpop.f32.mrf.mxu1  ;;  %v5040_v54 = vpop.f32.mrf.mxu0 }
 0xca2   : > { %v4329_v26 = vadd.f32 %v9013_v29, %v4244_v1  ;;  %v4961_v62 = vadd.f32 %v4960_v16, %v4959_v42  ;;  %v5041_v50 = vadd.f32 %v5040_v54, %v5039_v41 }
 0xca4   : > { %v4345_v44 = vadd.f32 %v4329_v26, %v9546_v5  ;;  %v4249_v60 = vadd.f32 %v5041_v50, %v4961_v62  ;;  %v4962_v11 = vpop.f32.mrf.mxu1  ;;  %v5042_v34 = vpop.f32.mrf.mxu0 }
 0xca6   : > { %4361 = vst [vmem:[%s9018_s27] sm:$0xff] %v4345_v44  ;;  %v4330_v45 = vadd.f32 %v9013_v29, %v4249_v60  ;;  %v4963_v4 = vpop.f32.mrf.mxu1  ;;  %v5043_v6 = vpop.f32.mrf.mxu0 }
 0xca7   : > { %v4964_v13 = vadd.f32 %v4963_v4, %v4962_v11  ;;  %v5044_v59 = vadd.f32 %v5043_v6, %v5042_v34 }
 0xca8   : > { %v4346_v8 = vadd.f32 %v4330_v45, %v9547_v39 }
 0xca9   : > { %v5045_v7 = vpop.f32.mrf.mxu0  ;;  %v4254_v31 = vadd.f32 %v5044_v59, %v4964_v13 }
 0xcaa   : > { %4362 = vst [vmem:[%s9018_s27 + $0x8] sm:$0xff] %v4346_v8 }
 0xcab   : > { %v4965_v12 = vpop.f32.mrf.mxu1  ;;  %v5046_v24 = vpop.f32.mrf.mxu0  ;;  %v4331_v35 = vadd.f32 %v9013_v29, %v4254_v31 }
 0xcac   : > { %v5047_v47 = vadd.f32 %v5046_v24, %v5045_v7 }
 0xcad   : > { %v4966_v19 = vpop.f32.mrf.mxu1 }
 0xcae   : > { %v4967_v2 = vadd.f32 %v4966_v19, %v4965_v12 }
 0xcaf   : > { %6156 = shalt.err (!%p6153_p6)
}
 0xcb0   : > { %s6157_s17 = scalar_lea.hbm %s9031_s1, 2048  ;;  %s6161_s23 = scalar_lea.hbm %s9205_s14, 4096 }
 0xcb1   : > { %p6158_p4 = scmp.ne.s32.totalorder %s9031_s1, %s6157_s17  ;;  %p6162_p9 = scmp.lt.s32.totalorder %s9031_s1, %s9205_s14 }
 0xcb2   : > { %p6163_p11 = scmp.lt.s32.totalorder %s6161_s23, %s6157_s17 }
 0xcb3   : > { %p6159_p0 = pnand %p6158_p4, %p9548_p13 }
 0xcb4   : > { %p6164_p10 = por %p6163_p11, %p6162_p9 }
 0xcb5   : > { %p6160_p2 = pneg %p6159_p0 }
 0xcb7   : > { %p6165_p12 = pnand %p6164_p10, %p6160_p2 }
 0xcb9   : > { %6168 = shalt.err (!%p6165_p12)
}
 0xcba   : > { %s9322_s26 = smov 128   ;;  %s9324_s9 = smov 8   ;;  %v9549_v22 = vld [vmem:[#allocation37_spill] sm:$0xff]  ;;  %v4968_v28 = vpop.f32.mrf.mxu1  ;;  %v4259_v38 = vadd.f32 %v5047_v47, %v4967_v2  ;;  %v5048_v48 = vpop.f32.mrf.mxu0 }
 0xcbb   : > { %5479 = dma.vmem_to_hbm [thread:$0]  (%p9548_p13), %s9036_s5, 2048, %s9031_s1, %s9038_s24, %s9322_s26, %s9322_s26, %s9324_s9   ;;  %v4347_v57 = vadd.f32 %v4331_v35, %v9549_v22 }
 0xcbc   : > { %s9550_s30 = sld [smem:[#allocation92_spill]]  ;;  %s4433_s23 = sshll.u32 %s6833_s13, 4  ;;  %v4969_v25 = vpop.f32.mrf.mxu1  ;;  %v4332_v15 = vadd.f32 %v9013_v29, %v4259_v38  ;;  %v5049_v56 = vpop.f32.mrf.mxu0  ;;  %s9073_s23 = int_to_ptr.vmem [resolvable:$true] %s4433_s23 }
 0xcbd   : > { %4363 = vst [vmem:[%s9018_s27 + $0x10] sm:$0xff] %v4347_v57  ;;  %v4970_v20 = vadd.f32 %v4969_v25, %v4968_v28  ;;  %s6169_s1 = scalar_lea.vmem %s9073_s23, 2048  ;;  %s6295_s5 = smov [#allocation17]  }
 0xcbe   : > { %p6170_p1 = scmp.ne.s32.totalorder %s9073_s23, %s6169_s1  ;;  %s6173_s11 = sshll.u32 %s6295_s5, 4  ;;  %s6174_s11 = int_to_ptr.vmem [resolvable:$false] %s6173_s11 }
 0xcbf   : > { %s6175_s13 = scalar_lea.vmem %s6174_s11, 4096  ;;  %p6176_p8 = scmp.lt.s32.totalorder %s9073_s23, %s6174_s11 }
 0xcc0   : > { %p6171_p3 = pnand %p6170_p1, %p9548_p13  ;;  %p6177_p7 = scmp.lt.s32.totalorder %s6175_s13, %s6169_s1 }
 0xcc2   : > { %s9069_s22 = scalar_lea.hbm %s9550_s30, %s9024_s3  ;;  %p6172_p5 = pneg %p6171_p3 }
 0xcc3   : > { %p6178_p6 = por %p6177_p7, %p6176_p8 }
 0xcc5   : > { %p6179_p4 = pnand %p6178_p6, %p6172_p5 }
 0xcc7   : > { %6182 = shalt.err (!%p6179_p4)
}
 0xcc8   : > { %s6183_s2 = scalar_lea.hbm %s9069_s22, 2048  ;;  %s6187_s5 = scalar_lea.hbm %s9550_s30, 4096 }
 0xcc9   : > { %p6184_p0 = scmp.ne.s32.totalorder %s9069_s22, %s6183_s2  ;;  %p6188_p11 = scmp.lt.s32.totalorder %s9069_s22, %s9550_s30 }
 0xcca   : > { %p6189_p10 = scmp.lt.s32.totalorder %s6187_s5, %s6183_s2 }
 0xccb   : > { %p6185_p2 = pnand %p6184_p0, %p9548_p13 }
 0xccc   : > { %p6190_p12 = por %p6189_p10, %p6188_p11 }
 0xccd   : > { %p6186_p9 = pneg %p6185_p2 }
 0xccf   : > { %p6191_p1 = pnand %p6190_p12, %p6186_p9 }
 0xcd1   : > { %6194 = shalt.err (!%p6191_p1)
}
 0xcd2   : > { %s9551_s1 = smov 8   ;;  %s9552_s11 = smov 128   ;;  %v5050_v51 = vadd.f32 %v5049_v56, %v5048_v48  ;;  %v9553_v37 = vld [vmem:[#allocation36_spill] sm:$0xff]  ;;  %v5051_v10 = vpop.f32.mrf.mxu0  ;;  %v4971_v61 = vpop.f32.mrf.mxu1  ;;  %v9554_v63 = vld [vmem:[#allocation39_spill] sm:$0xff]  ;;  %v9555_v46 = vld [vmem:[#allocation38_spill] sm:$0xff] }
 0xcd3   : > { %5480 = dma.vmem_to_hbm [thread:$0]  (%p9548_p13), %s9073_s23, 2048, %s9069_s22, %s9038_s24, %s9552_s11, %s9552_s11, %s9551_s1   ;;  %v4348_v36 = vadd.f32 %v4332_v15, %v9553_v37  ;;  %v9556_v42 = vld [vmem:[#allocation33_spill] sm:$0xff]  ;;  %v9557_v44 = vld [vmem:[#allocation40_spill] sm:$0xff]  ;;  %v9558_v47 = vld [vmem:[#allocation31_spill] sm:$0xff] }
 0xcd4   : > { %v4264_v55 = vadd.f32 %v5050_v51, %v4970_v20  ;;  %v5052_v32 = vpop.f32.mrf.mxu0  ;;  %v4972_v14 = vpop.f32.mrf.mxu1  ;;  %v9559_v20 = vld [vmem:[#allocation32_spill] sm:$0xff]  ;;  %s4401_s24 = sshll.u32 %s9018_s27, 4  ;;  %s9566_s22 = sld [smem:[#allocation91_spill]]  ;;  %s9144_s24 = int_to_ptr.vmem [resolvable:$true] %s4401_s24 }
 0xcd5   : > { %4364 = vst [vmem:[%s9018_s27 + $0x18] sm:$0xff] %v4348_v36  ;;  %v5053_v33 = vadd.f32 %v5052_v32, %v5051_v10  ;;  %v4973_v18 = vadd.f32 %v4972_v14, %v4971_v61  ;;  %s4378_s13 = scalar_lea.sflag [#allocation4], %s6563_s28  ;;  %s6195_s2 = scalar_lea.vmem %s9144_s24, 2048 }
 0xcd6   : > { %v4333_v53 = vadd.f32 %v9013_v29, %v4264_v55  ;;  %v5054_v43 = vpop.f32.mrf.mxu0  ;;  %v4974_v9 = vpop.f32.mrf.mxu1  ;;  %p6196_p3 = scmp.ne.s32.totalorder %s9144_s24, %s6195_s2  ;;  %s6296_s25 = smov [#allocation14]  }
 0xcd7   : > { %v4269_v40 = vadd.f32 %v5053_v33, %v4973_v18  ;;  %s6199_s17 = sshll.u32 %s6296_s25, 4  ;;  %s6200_s17 = int_to_ptr.vmem [resolvable:$false] %s6199_s17 }
 0xcd8   : > { %v4349_v52 = vadd.f32 %v4333_v53, %v9554_v63  ;;  %v5055_v21 = vpop.f32.mrf.mxu0  ;;  %v4975_v30 = vpop.f32.mrf.mxu1  ;;  %v9560_v63 = vld [vmem:[#allocation29_spill] sm:$0xff]  ;;  %p6197_p5 = pnand %p6196_p3, %p9548_p13  ;;  %s6201_s5 = scalar_lea.vmem %s6200_s17, 4096 }
 0xcd9   : > { %v4334_v49 = vadd.f32 %v9013_v29, %v4269_v40  ;;  %v5056_v0 = vadd.f32 %v5055_v21, %v5054_v43  ;;  %v4976_v3 = vadd.f32 %v4975_v30, %v4974_v9  ;;  %v9561_v43 = vld [vmem:[#allocation30_spill] sm:$0xff]  ;;  %p6202_p7 = scmp.lt.s32.totalorder %s9144_s24, %s6200_s17  ;;  %p6203_p6 = scmp.lt.s32.totalorder %s6201_s5, %s6195_s2 }
 0xcda   : > { %4365 = vst [vmem:[%s9018_s27 + $0x20] sm:$0xff] %v4349_v52  ;;  %v4977_v27 = vpop.f32.mrf.mxu1  ;;  %v5057_v1 = vpop.f32.mrf.mxu0  ;;  %s9142_s23 = scalar_lea.hbm %s9566_s22, %s9024_s3  ;;  %p6198_p8 = pneg %p6197_p5 }
 0xcdb   : > { %v4350_v17 = vadd.f32 %v4334_v49, %v9555_v46  ;;  %v4274_v23 = vadd.f32 %v5056_v0, %v4976_v3  ;;  %p6204_p4 = por %p6203_p6, %p6202_p7 }
 0xcdc   : > { %v4978_v16 = vpop.f32.mrf.mxu1  ;;  %v5058_v26 = vpop.f32.mrf.mxu0 }
 0xcdd   : > { %4366 = vst [vmem:[%s9018_s27 + $0x28] sm:$0xff] %v4350_v17  ;;  %v4335_v58 = vadd.f32 %v9013_v29, %v4274_v23  ;;  %v4979_v54 = vadd.f32 %v4978_v16, %v4977_v27  ;;  %v5059_v62 = vadd.f32 %v5058_v26, %v5057_v1  ;;  %p6205_p0 = pnand %p6204_p4, %p6198_p8 }
 0xcdf   : > { %v4351_v41 = vadd.f32 %v4335_v58, %v9556_v42  ;;  %v4279_v50 = vadd.f32 %v5059_v62, %v4979_v54 }
 0xce1   : > { %4367 = vst [vmem:[%s9018_s27 + $0x30] sm:$0xff] %v4351_v41  ;;  %v4336_v5 = vadd.f32 %v9013_v29, %v4279_v50  ;;  %v9562_v50 = vld [vmem:[#allocation42_spill] sm:$0xff] }
 0xce3   : > { %v4352_v60 = vadd.f32 %v4336_v5, %v9557_v44 }
 0xce5   : > { %4368 = vst [vmem:[%s9018_s27 + $0x38] sm:$0xff] %v4352_v60 }
 0xce9   : > { %v4980_v11 = vpop.f32.mrf.mxu1 }
 0xcea   : > { %v5060_v34 = vpop.f32.mrf.mxu0 }
 0xceb   : > { %v4981_v45 = vpop.f32.mrf.mxu1 }
 0xcec   : > { %v4982_v4 = vadd.f32 %v4981_v45, %v4980_v11  ;;  %v5061_v6 = vpop.f32.mrf.mxu0 }
 0xced   : > { %v5062_v13 = vadd.f32 %v5061_v6, %v5060_v34  ;;  %v9563_v6 = vld [vmem:[#allocation28_spill] sm:$0xff] }
 0xcee   : > { %v4983_v59 = vpop.f32.mrf.mxu1  ;;  %v5063_v39 = vpop.f32.mrf.mxu0 }
 0xcef   : > { %v4284_v8 = vadd.f32 %v5062_v13, %v4982_v4 }
 0xcf0   : > { %v4984_v7 = vpop.f32.mrf.mxu1  ;;  %v5064_v31 = vpop.f32.mrf.mxu0 }
 0xcf1   : > { %v4337_v12 = vadd.f32 %v9013_v29, %v4284_v8  ;;  %v4985_v24 = vadd.f32 %v4984_v7, %v4983_v59  ;;  %v5065_v35 = vadd.f32 %v5064_v31, %v5063_v39 }
 0xcf2   : > { %v5066_v19 = vpop.f32.mrf.mxu0 }
 0xcf3   : > { %v4353_v2 = vadd.f32 %v4337_v12, %v9558_v47  ;;  %v4289_v22 = vadd.f32 %v5065_v35, %v4985_v24  ;;  %v4986_v57 = vpop.f32.mrf.mxu1  ;;  %v9564_v12 = vld [vmem:[#allocation25_spill] sm:$0xff] }
 0xcf4   : > { %v5067_v28 = vpop.f32.mrf.mxu0  ;;  %v9565_v47 = vld [vmem:[#allocation41_spill] sm:$0xff] }
 0xcf5   : > { %4369 = vst [vmem:[%s9018_s27 + $0x40] sm:$0xff] %v4353_v2  ;;  %v4338_v38 = vadd.f32 %v9013_v29, %v4289_v22  ;;  %v4987_v48 = vpop.f32.mrf.mxu1  ;;  %v5068_v25 = vadd.f32 %v5067_v28, %v5066_v19 }
 0xcf6   : > { %v4988_v15 = vadd.f32 %v4987_v48, %v4986_v57 }
 0xcf7   : > { %v4354_v56 = vadd.f32 %v4338_v38, %v9559_v20  ;;  %v4989_v51 = vpop.f32.mrf.mxu1  ;;  %v5069_v37 = vpop.f32.mrf.mxu0 }
 0xcf8   : > { %v4294_v36 = vadd.f32 %v5068_v25, %v4988_v15 }
 0xcf9   : > { %4370 = vst [vmem:[%s9018_s27 + $0x48] sm:$0xff] %v4354_v56  ;;  %v4990_v55 = vpop.f32.mrf.mxu1  ;;  %v5070_v10 = vpop.f32.mrf.mxu0 }
 0xcfa   : > { %v4339_v53 = vadd.f32 %v9013_v29, %v4294_v36  ;;  %v4991_v61 = vadd.f32 %v4990_v55, %v4989_v51  ;;  %v5071_v32 = vadd.f32 %v5070_v10, %v5069_v37 }
 0xcfb   : > { %v4992_v33 = vpop.f32.mrf.mxu1 }
 0xcfc   : > { %v4355_v52 = vadd.f32 %v4339_v53, %v9560_v63  ;;  %v4299_v14 = vadd.f32 %v5071_v32, %v4991_v61 }
 0xcfd   : > { %v4993_v18 = vpop.f32.mrf.mxu1 }
 0xcfe   : > { %4371 = vst [vmem:[%s9018_s27 + $0x50] sm:$0xff] %v4355_v52  ;;  %v4340_v40 = vadd.f32 %v9013_v29, %v4299_v14  ;;  %v4994_v58 = vadd.f32 %v4993_v18, %v4992_v33 }
 0xd00   : > { %v4356_v49 = vadd.f32 %v4340_v40, %v9561_v43 }
 0xd01   : > { %v4995_v9 = vpop.f32.mrf.mxu1 }
 0xd02   : > { %4372 = vst [vmem:[%s9018_s27 + $0x58] sm:$0xff] %v4356_v49 }
 0xd03   : > { %v4996_v21 = vpop.f32.mrf.mxu1 }
 0xd04   : > { %v4997_v16 = vadd.f32 %v4996_v21, %v4995_v9 }
 0xd05   : > { %v4998_v46 = vpop.f32.mrf.mxu1 }
 0xd07   : > { %v4999_v17 = vpop.f32.mrf.mxu1 }
 0xd08   : > { %v5000_v11 = vadd.f32 %v4999_v17, %v4998_v46 }
 0xd0b   : > { %v5001_v30 = vpop.f32.mrf.mxu1 }
 0xd0d   : > { %v5002_v0 = vpop.f32.mrf.mxu1 }
 0xd0e   : > { %v5003_v8 = vadd.f32 %v5002_v0, %v5001_v30 }
 0xd0f   : > { %v5072_v3 = vpop.f32.mrf.mxu1 }
 0xd11   : > { %v5073_v23 = vpop.f32.mrf.mxu1 }
 0xd12   : > { %v5074_v27 = vadd.f32 %v5073_v23, %v5072_v3 }
 0xd13   : > { %v5075_v42 = vpop.f32.mrf.mxu1 }
 0xd14   : > { %v4304_v41 = vadd.f32 %v5074_v27, %v4994_v58 }
 0xd15   : > { %v5076_v1 = vpop.f32.mrf.mxu1 }
 0xd16   : > { %v4341_v54 = vadd.f32 %v9013_v29, %v4304_v41  ;;  %v5077_v26 = vadd.f32 %v5076_v1, %v5075_v42 }
 0xd17   : > { %v5078_v62 = vpop.f32.mrf.mxu1 }
 0xd18   : > { %v4357_v5 = vadd.f32 %v4341_v54, %v9562_v50  ;;  %v4309_v44 = vadd.f32 %v5077_v26, %v4997_v16 }
 0xd19   : > { %v5079_v60 = vpop.f32.mrf.mxu1 }
 0xd1a   : > { %4373 = vst [vmem:[%s9018_s27 + $0x60] sm:$0xff] %v4357_v5  ;;  %v4342_v34 = vadd.f32 %v9013_v29, %v4309_v44  ;;  %v5080_v45 = vadd.f32 %v5079_v60, %v5078_v62 }
 0xd1b   : > { %v5081_v4 = vpop.f32.mrf.mxu1 }
 0xd1c   : > { %v4358_v13 = vadd.f32 %v4342_v34, %v9563_v6  ;;  %v4314_v59 = vadd.f32 %v5080_v45, %v5000_v11 }
 0xd1d   : > { %v5082_v39 = vpop.f32.mrf.mxu1 }
 0xd1e   : > { %4374 = vst [vmem:[%s9018_s27 + $0x68] sm:$0xff] %v4358_v13  ;;  %v4343_v7 = vadd.f32 %v9013_v29, %v4314_v59  ;;  %v5083_v31 = vadd.f32 %v5082_v39, %v5081_v4 }
 0xd20   : > { %v4359_v24 = vadd.f32 %v4343_v7, %v9564_v12  ;;  %v4319_v35 = vadd.f32 %v5083_v31, %v5003_v8 }
 0xd22   : > { %4375 = vst [vmem:[%s9018_s27 + $0x70] sm:$0xff] %v4359_v24  ;;  %v4344_v19 = vadd.f32 %v9013_v29, %v4319_v35 }
 0xd24   : > { %v4360_v2 = vadd.f32 %v4344_v19, %v9565_v47 }
 0xd26   : > { %4376 = vst [vmem:[%s9018_s27 + $0x78] sm:$0xff] %v4360_v2 }
 0xd27   : > { %6208 = shalt.err (!%p6205_p0)
}
 0xd28   : > { %s6209_s27 = scalar_lea.hbm %s9142_s23, 2048  ;;  %s6213_s26 = scalar_lea.hbm %s9566_s22, 4096 }
 0xd29   : > { %p6210_p2 = scmp.ne.s32.totalorder %s9142_s23, %s6209_s27  ;;  %p6214_p10 = scmp.lt.s32.totalorder %s9142_s23, %s9566_s22 }
 0xd2a   : > { %p6215_p12 = scmp.lt.s32.totalorder %s6213_s26, %s6209_s27 }
 0xd2b   : > { %p6211_p9 = pnand %p6210_p2, %p9548_p13 }
 0xd2c   : > { %p6216_p1 = por %p6215_p12, %p6214_p10 }
 0xd2d   : > { %p6212_p11 = pneg %p6211_p9 }
 0xd2f   : > { %p6217_p3 = pnand %p6216_p1, %p6212_p11 }
 0xd31   : > { %6220 = shalt.err (!%p6217_p3)
}
 0xd32   : > { %5478 = dma.vmem_to_hbm [thread:$0]  (%p9548_p13), %s9144_s24, 2048, %s9142_s23, %s4378_s13, %s9552_s11, %s9552_s11, %s9551_s1  }
 0xd33 PF: > { %s4448_s2 = sand.u32 1, %s6263_s18   ;;  %p9567_p5 = scmp.ne.s32.totalorder %s9348_s15, 0 }
 0xd34   : > { %p9568_p8 = scmp.ge.s32.totalorder %s6275_s21, 2  ;;  %s4449_s17 = scalar_lea.sflag [#allocation4], %s4448_s2 }
 0xd36   : > { %p5508_p7 = pnand %p9568_p8, %p9567_p5 }
 0xd38   : > { %p5509_p6 = pneg %p5508_p7 }
 0xd3a   : > { %6254 = dma.done.wait (%p5509_p6), %s4449_s17, 2048  }
 0xd3b   : > { %6256 = vsyncadd (%p5509_p6), %s4449_s17, 4294965248  ;;  %s9569_s29 = sadd.s32 4294967294, %s6275_s21  }
 0xd3c   : > { %s4457_s5 = sand.u32 1, %s9569_s29  }
 0xd3d   : > { %s4458_s27 = scalar_lea.sflag [#allocation16], %s4457_s5 }
 0xd3e   : > { %6258 = dma.done.wait (%p5509_p6), %s4458_s27, 4096  }
 0xd3f   : > { %6260 = vsyncadd (%p5509_p6), %s4458_s27, 4294963200  ;;  %s9570_s1 = sld [smem:[#allocation24_spill]]  ;;  %p35_p13 = scmp.ge.s32.totalorder %s6486_s16, 4  }
 0xd40   : > { %s9571_s18 = smov %s6267_s19  ;;  %s9572_s19 = smov %s6271_s20 }
 0xd41   : > { %s9574_s21 = smov %s6486_s16  ;;  %37 = sbr.rel (!%p35_p13) target bundleno = 19 (0x13), region = 173 }
 0xd45   : > { %s9573_s20 = smov %s9570_s1 }
 0xd46   :  { %4472 = vsyncpa [#allocation3], 1 }
 0xd47   :  { %4474 = vsyncpa [#allocation3 + $0x1], 1 }
 0xd48   :  { %4475 = vsyncpa [#allocation6], 1 }
 0xd49   :  { %4476 = vsyncpa [#allocation9], 1 }
 0xd4a   :  { %4477 = vsyncpa [#allocation12], 1 }
 0xd4b   :  { %4478 = vsyncpa [#allocation4], 1 }
 0xd4c   :  { %4480 = vsyncpa [#allocation4 + $0x1], 1 }
 0xd4d   :  { %4481 = vsyncpa [#allocation16], 1 }
 0xd4e   :  { %4483 = vsyncpa [#allocation16 + $0x1], 1 }

</bundles_post_ra>
